<compile_context>
chip_gen: v5e
topology: v5e:2x2
jax: 0.10.0
libtpu: 0.0.40
codegen_flags: <defaults>
</compile_context>

<pallas_src>
import functools

import jax
import jax.numpy as jnp
from jax import lax
from jax.experimental import pallas as pl
from jax.experimental.pallas import tpu as pltpu

_EPS = 1e-6


def _round_up(x, m):
    return ((x + m - 1) // m) * m


def _bmm(a, b):
    """(G, M, K) @ (G, K, N) -> (G, M, N), f32 accumulation on the MXU."""
    return lax.dot_general(a, b, (((2,), (1,)), ((0,), (0,))),
                           preferred_element_type=jnp.float32)


def _bmm_bt(a, b):
    """(G, M, K) @ (G, N, K)^T -> (G, M, N): contraction on the last dim of both."""
    return lax.dot_general(a, b, (((2,), (2,)), ((0,), (0,))),
                           preferred_element_type=jnp.float32)


# ---------------------------------------------------------------------------
# Pallas kernel: G slabs of (D, N) x + the shared (S, R, D) bases^T per grid step.
# ---------------------------------------------------------------------------
def _ham_kernel(x_ref, basesT_ref, out_ref, basesT_out_ref, *,
                steps, inv_t, mm_dtype, group, s_groups):
    G, S = group, s_groups
    x16 = x_ref[...].astype(mm_dtype)                     # (G, D, N) bf16 matmul operand
    basesT_all = basesT_ref[...].astype(jnp.float32)      # (S, R, D) f32 (bases transposed)
    R, D = basesT_all.shape[1], basesT_all.shape[2]

    # Slab g inside the block uses bases index g % S (G is a multiple of S).
    reps = G // S
    if reps == 1:
        basesT = basesT_all
    elif S == 1:
        basesT = jnp.broadcast_to(basesT_all, (G, R, D))
    else:
        basesT = jnp.concatenate([basesT_all] * reps, axis=0)

    # local_inference init: coef^T = softmax_over_R(inv_t * bases^T @ x)  -> (G, R, N).
    # The (R,D)@(D,N) product is reused as iteration 0's coef-update numerator (bases are
    # unchanged between the init and the first multiplicative update).
    num_cT = _bmm(basesT.astype(mm_dtype), x16)            # (G, R, N) f32
    logitsT = num_cT if inv_t == 1.0 else inv_t * num_cT   # skip the VPU mul when inv_t==1
    m = jnp.max(logitsT, axis=1, keepdims=True)
    e = jnp.exp(logitsT - m)
    coefT = e * pl.reciprocal(jnp.sum(e, axis=1, keepdims=True), approx=True)

    def body(_, carry):
        basesT, coefT, num_cT = carry
        bT16 = basesT.astype(mm_dtype)                                # (G, R, D)
        # coef^T <- coef^T * (bases^T x) / ((bases^T bases) coef^T + eps)
        btb = _bmm_bt(bT16, bT16)                                     # (G, R, R)
        den_cT = _bmm(btb.astype(mm_dtype), coefT.astype(mm_dtype))   # (G, R, N)
        coefT = coefT * num_cT * pl.reciprocal(den_cT + _EPS, approx=True)
        # bases^T <- bases^T * (coef^T x^T) / ((coef^T coef) bases^T + eps)
        c16 = coefT.astype(mm_dtype)
        num_bT = _bmm_bt(c16, x16)                                    # (G, R, D)
        ctc = _bmm_bt(c16, c16)                                       # (G, R, R)
        den_bT = _bmm(ctc.astype(mm_dtype), bT16)                     # (G, R, D)
        basesT = basesT * num_bT * pl.reciprocal(den_bT + _EPS, approx=True)
        # (bases^T x) with the UPDATED bases: consumed by the next iteration's coef update
        # or (after the last iteration) by the final compute_coef refinement.
        num_cT = _bmm(basesT.astype(mm_dtype), x16)                   # (G, R, N)
        return basesT, coefT, num_cT

    basesT, coefT, num_cT = lax.fori_loop(0, steps, body, (basesT, coefT, num_cT),
                                          unroll=True)

    # compute_coef: final refinement — exact division (one small tile) for accuracy.
    bT16 = basesT.astype(mm_dtype)
    btb = _bmm_bt(bT16, bT16)
    den_cT = _bmm(btb.astype(mm_dtype), coefT.astype(mm_dtype))
    coefT = coefT * num_cT / (den_cT + _EPS)

    # reconstruction: x_hat = bases @ coef^T -> (G, D, N), lane-dense bf16 writeback.
    bases_gdr = jnp.swapaxes(bT16, 1, 2)                   # tiny (R,D) relayout per slab
    out_ref[...] = _bmm(bases_gdr, coefT.astype(mm_dtype)).astype(out_ref.dtype)
    basesT_out_ref[...] = basesT.astype(basesT_out_ref.dtype)


# ---------------------------------------------------------------------------
# VMEM-budget helpers (generation aware).
# ---------------------------------------------------------------------------
def _vmem_capacity_bytes():
    try:
        info = pltpu.get_tpu_info()
        for name in ("vmem_capacity_bytes", "vmem_size_bytes", "vmem_bytes"):
            v = getattr(info, name, None)
            if v:
                return int(v)
    except Exception:
        pass
    return 64 * 1024 * 1024   # conservative default (v7x per-core VMEM)


def _vmem_need_bytes(G, S, D, N, R, mm_bytes=2):
    buffered = (2 * G * D * N * mm_bytes       # x in, double buffered (bf16)
                + 2 * G * D * N * mm_bytes     # x_hat out, double buffered (bf16)
                + 2 * S * R * D * 4            # shared bases in (f32)
                + 2 * G * R * D * 4)           # bases out (f32)
    live = (G * D * N * mm_bytes               # x16 held across the loop
            + 4 * G * R * N * 4                # coefT / num_cT / den_cT / exp temporaries
            + 3 * G * R * D * 4                # basesT / num_bT / den_bT
            + 2 * G * R * R * 4)               # btb / ctc
    return int(1.3 * (buffered + live))


def _choose_group(BS, S, D, N, R, budget_bytes, max_group=8):
    """Largest G (multiple of S, divides B*S, fits VMEM), preferring >= 2 grid steps."""
    cands = [g for g in range(S, min(BS, max_group) + 1, S)
             if BS % g == 0 and _vmem_need_bytes(g, S, D, N, R) <= budget_bytes]
    if not cands:
        return S
    multi = [g for g in cands if BS // g >= 2]
    return max(multi) if multi else max(cands)


def _ham_pallas(x_bsdn, basesT_srd, *, steps, inv_t, mm_dtype=jnp.bfloat16):
    BS, D, N = x_bsdn.shape
    S, R, _ = basesT_srd.shape

    cap = _vmem_capacity_bytes()
    G = _choose_group(BS, S, D, N, R, budget_bytes=int(0.6 * cap))
    need = _vmem_need_bytes(G, S, D, N, R)
    vmem_limit = int(min(0.7 * cap, max(2 * need, 32 * 1024 * 1024)))

    kernel = functools.partial(_ham_kernel, steps=steps, inv_t=float(inv_t),
                               mm_dtype=mm_dtype, group=G, s_groups=S)

    # Advisory cost hint so XLA schedules the surrounding ops around a long custom call.
    mm = lambda m, k, n: 2 * m * k * n
    per_iter = (mm(R, D, R) + mm(R, R, N) + mm(R, N, D) + mm(R, N, R)
                + mm(R, R, D) + mm(R, D, N))
    per_slab = (mm(R, D, N) + steps * per_iter + mm(R, D, R) + mm(R, R, N) + mm(D, R, N))
    cost = pl.CostEstimate(
        flops=int(BS * per_slab),
        transcendentals=int(BS * R * N),
        bytes_accessed=int(BS * (2 * D * N * x_bsdn.dtype.itemsize + R * D * 4)
                           + S * R * D * 4),
    )

    return pl.pallas_call(
        kernel,
        out_shape=(
            jax.ShapeDtypeStruct((BS, D, N), mm_dtype),     # bf16 writeback of x_hat
            jax.ShapeDtypeStruct((BS, R, D), jnp.float32),
        ),
        grid_spec=pltpu.PrefetchScalarGridSpec(
            num_scalar_prefetch=0,
            grid=(BS // G,),
            in_specs=[
                pl.BlockSpec((G, D, N), lambda i: (i, 0, 0)),
                # Shared bases^T: same small (S, R, D) block re-read per grid step
                # (no jnp.tile / per-batch HBM copies of the bases).
                pl.BlockSpec((S, R, D), lambda i: (0, 0, 0)),
            ],
            out_specs=[
                pl.BlockSpec((G, D, N), lambda i: (i, 0, 0)),
                pl.BlockSpec((G, R, D), lambda i: (i, 0, 0)),
            ],
        ),
        compiler_params=pltpu.CompilerParams(
            dimension_semantics=("parallel",),
            vmem_limit_bytes=vmem_limit,
        ),
        cost_estimate=cost,
    )(x_bsdn, basesT_srd)


# ---------------------------------------------------------------------------
# Module-level glue (parameter init, layout plumbing, online_update) in plain JAX.
# ---------------------------------------------------------------------------
def build_bases(key, S, D, R):
    # NMF2D._build_bases: uniform [0, 1), then F.normalize(dim=1) (L2 over D).
    b = jax.random.uniform(key, (S, D, R), dtype=jnp.float32)
    norm = jnp.sqrt(jnp.sum(b * b, axis=1, keepdims=True))
    return b / jnp.maximum(norm, 1e-12)


def ham_forward(x, bases_state, *, S=1, R=64, train_steps=6, eval_steps=7,
                inv_t=1.0, eta=0.9, training=True, mm_dtype=jnp.bfloat16):
    """x: (B, Num, C, H, W) f32; bases_state: (S, D, R) f32 (the module's self.bases).

    Returns (y, new_bases_state); new_bases_state reproduces online_update (EMA toward the
    batch-mean bases + L2-normalize over D), which the spec's forward applies unconditionally.
    """
    B, Num, C, H, W = x.shape
    D = C // S
    N = Num * H * W

    # x.permute(0,2,1,3,4).view(B*S, D, N); cast to bf16 BEFORE the permute so the pure-copy
    # XLA transpose moves 2 B/elem instead of 4.
    # TODO(synk): folding this permute/reshape into the kernel's BlockSpec/DMA would save
    # another activation round trip but needs Mosaic relayout support for arbitrary H*W.
    x_r = jnp.transpose(x.astype(mm_dtype), (0, 2, 1, 3, 4)).reshape(B * S, D, N)
    basesT_state = jnp.transpose(bases_state, (0, 2, 1))            # (S, R, D), tiny

    # Zero-pad N to a lane multiple (and D to a sublane multiple). Zero columns/rows of x
    # and of bases^T stay exactly zero through the multiplicative updates, so the padding
    # is numerically inert and is sliced off afterwards.
    Dp, Np = _round_up(D, 8), _round_up(N, 128)
    basesT_in = basesT_state
    if (Dp, Np) != (D, N):
        x_r = jnp.pad(x_r, ((0, 0), (0, Dp - D), (0, Np - N)))
        basesT_in = jnp.pad(basesT_state, ((0, 0), (0, 0), (0, Dp - D)))

    steps = train_steps if training else eval_steps
    x_hat, basesT = _ham_pallas(x_r, basesT_in, steps=steps, inv_t=inv_t,
                                mm_dtype=mm_dtype)
    x_hat = x_hat[:, :D, :N]
    basesT = basesT[:, :, :D]

    # x.view(B, C, Num, H, W).permute(0, 2, 1, 3, 4); transpose at bf16, cast fused at end.
    y = jnp.transpose(x_hat.reshape(B, C, Num, H, W), (0, 2, 1, 3, 4)).astype(x.dtype)

    # online_update (torch.no_grad): EMA toward batch-mean bases, then L2-normalize over D.
    bases_bsdr = jnp.transpose(basesT, (0, 2, 1)).reshape(B, S, D, R)
    update = jnp.mean(bases_bsdr, axis=0)                           # (S, D, R)
    new_state = bases_state + eta * (update - bases_state)
    norm = jnp.sqrt(jnp.sum(new_state * new_state, axis=1, keepdims=True))
    new_state = new_state / jnp.maximum(norm, 1e-12)
    return y, new_state


# ---------------------------------------------------------------------------
# Pure-JAX reference in the ORIGINAL (coef: (N, R), bases: (D, R)) formulation, with the
# same bf16-operand / f32-accumulation cast points as the kernel (exact divide + softmax).
# ---------------------------------------------------------------------------
def _ref_decomp(x, bases, steps, inv_t, mm_dtype=jnp.bfloat16):
    f32 = jnp.float32
    x16 = x.astype(mm_dtype)
    coef = jax.nn.softmax(
        inv_t * jnp.einsum("bdn,bdr->bnr", x16, bases.astype(mm_dtype),
                           preferred_element_type=f32), axis=-1)
    for _ in range(steps):
        b16 = bases.astype(mm_dtype)
        num_c = jnp.einsum("bdn,bdr->bnr", x16, b16, preferred_element_type=f32)
        btb = jnp.einsum("bdr,bds->brs", b16, b16, preferred_element_type=f32)
        den_c = jnp.einsum("bnr,brs->bns", coef.astype(mm_dtype), btb.astype(mm_dtype),
                           preferred_element_type=f32)
        coef = coef * num_c / (den_c + _EPS)
        c16 = coef.astype(mm_dtype)
        num_b = jnp.einsum("bdn,bnr->bdr", x16, c16, preferred_element_type=f32)
        ctc = jnp.einsum("bnr,bns->brs", c16, c16, preferred_element_type=f32)
        den_b = jnp.einsum("bdr,brs->bds", b16, ctc.astype(mm_dtype),
                           preferred_element_type=f32)
        bases = bases * num_b / (den_b + _EPS)
    b16 = bases.astype(mm_dtype)
    num_c = jnp.einsum("bdn,bdr->bnr", x16, b16, preferred_element_type=f32)
    btb = jnp.einsum("bdr,bds->brs", b16, b16, preferred_element_type=f32)
    den_c = jnp.einsum("bnr,brs->bns", coef.astype(mm_dtype), btb.astype(mm_dtype),
                       preferred_element_type=f32)
    coef = coef * num_c / (den_c + _EPS)
    xhat = jnp.einsum("bdr,bnr->bdn", b16, coef.astype(mm_dtype),
                      preferred_element_type=f32)
    return xhat, bases


if __name__ == "__main__":
    # Small shapes consistent with the 5-D forward: (B, Num, C, H, W); S=1 so D=C.
    # B=4 so the kernel runs with G=2 slabs per grid step over a 2-step grid.
    B, Num, C, H, W = 4, 2, 8, 8, 8
    S, R = 1, 64
    D = C // S
    N = Num * H * W

    key = jax.random.PRNGKey(0)
    kx, kb = jax.random.split(key)
    x = jax.random.uniform(kx, (B, Num, C, H, W), dtype=jnp.float32)
    bases_state = build_bases(kb, S, D, R)

    y, new_bases = ham_forward(x, bases_state, S=S, R=R, training=True)
    y = jax.block_until_ready(y)
    new_bases = jax.block_until_ready(new_bases)

    assert y.shape == (B, Num, C, H, W)
    assert new_bases.shape == (S, D, R)
    assert bool(jnp.all(jnp.isfinite(y)))

    # Cross-check the Pallas hot path against the pure-JAX reference (same cast points;
    # remaining differences are approx-reciprocal in the loop + bf16 writeback).
    x_r = jnp.transpose(x.astype(jnp.bfloat16), (0, 2, 1, 3, 4)).reshape(B * S, D, N)
    xhat_ref, _ = _ref_decomp(x_r, jnp.tile(bases_state, (B, 1, 1)),
                              steps=6, inv_t=1.0)
    y_ref = jnp.transpose(xhat_ref.reshape(B, C, Num, H, W), (0, 2, 1, 3, 4))
    assert jnp.allclose(y, y_ref, rtol=5e-2, atol=5e-2), (
        "kernel mismatch vs reference: max abs diff = "
        f"{float(jnp.max(jnp.abs(y - y_ref)))}")

    print("KERNEL_OK")
</pallas_src>

<mosaic_0001>
module attributes {stable_mosaic.version = 11 : i64} {
  func.func @_ham_kernel(%arg0: i32, %arg1: memref<2x8x128xbf16, #tpu.memory_space<vmem>>, %arg2: memref<1x64x8xf32, #tpu.memory_space<vmem>>, %arg3: memref<2x8x128xbf16, #tpu.memory_space<vmem>>, %arg4: memref<2x64x8xf32, #tpu.memory_space<vmem>>) attributes {dimension_semantics = [#tpu.dimension_semantics<parallel>], iteration_bounds = array<i64: 2>, scalar_prefetch = 0 : i64, scratch_operands = 0 : i64, tpu.core_type = #tpu.core_type<tc>, window_params = [{transform_indices = @transform_0, window_bounds = array<i64: 2, 8, 128>}, {pipeline_mode = #tpu.pipeline_mode<synchronous>, transform_indices = @transform_1, window_bounds = array<i64: 1, 64, 8>}, {transform_indices = @transform_2, window_bounds = array<i64: 2, 8, 128>}, {transform_indices = @transform_3, window_bounds = array<i64: 2, 64, 8>}]} {
    %c0 = arith.constant 0 : index
    %c0_0 = arith.constant 0 : index
    %c0_1 = arith.constant 0 : index
    %0 = vector.load %arg1[%c0, %c0_0, %c0_1] : memref<2x8x128xbf16, #tpu.memory_space<vmem>>, vector<2x8x128xbf16>
    %c0_2 = arith.constant 0 : index
    %c0_3 = arith.constant 0 : index
    %c0_4 = arith.constant 0 : index
    %1 = vector.load %arg2[%c0_2, %c0_3, %c0_4] : memref<1x64x8xf32, #tpu.memory_space<vmem>>, vector<1x64x8xf32>
    %2 = vector.shape_cast %1 : vector<1x64x8xf32> to vector<1x64x8xf32>
    %3 = vector.broadcast %2 : vector<1x64x8xf32> to vector<2x64x8xf32>
    %4 = arith.truncf %3 : vector<2x64x8xf32> to vector<2x64x8xbf16>
    %cst = arith.constant dense<0.000000e+00> : vector<2x64x128xf32>
    %5 = tpu.matmul %4, %0, %cst {dimension_numbers = #tpu.dot_dimension_numbers<[2], [1], [1], [2], [0, 0, 0, 1, 1, 2], [0], [0]>} : vector<2x64x8xbf16>, vector<2x8x128xbf16>, vector<2x64x128xf32> -> vector<2x64x128xf32>
    %cst_5 = arith.constant dense<0xFF800000> : vector<2x128xf32>
    %6 = vector.multi_reduction <maximumf>, %5, %cst_5 [1] : vector<2x64x128xf32> to vector<2x128xf32>
    %7 = vector.shape_cast %6 : vector<2x128xf32> to vector<2x1x128xf32>
    %8 = vector.broadcast %7 : vector<2x1x128xf32> to vector<2x64x128xf32>
    %9 = arith.subf %5, %8 : vector<2x64x128xf32>
    %10 = math.exp %9 : vector<2x64x128xf32>
    %cst_6 = arith.constant dense<0.000000e+00> : vector<2x128xf32>
    %11 = vector.multi_reduction <add>, %10, %cst_6 [1] : vector<2x64x128xf32> to vector<2x128xf32>
    %12 = vector.shape_cast %11 : vector<2x128xf32> to vector<2x1x128xf32>
    %13 = tpu.reciprocal %12 {approx = true} : vector<2x1x128xf32> -> vector<2x1x128xf32>
    %14 = vector.broadcast %13 : vector<2x1x128xf32> to vector<2x64x128xf32>
    %15 = arith.mulf %10, %14 : vector<2x64x128xf32>
    %c0_i32 = arith.constant 0 : i32
    %16 = arith.truncf %3 : vector<2x64x8xf32> to vector<2x64x8xbf16>
    %cst_7 = arith.constant dense<0.000000e+00> : vector<2x64x64xf32>
    %17 = tpu.matmul %16, %16, %cst_7 {dimension_numbers = #tpu.dot_dimension_numbers<[2], [2], [1], [1], [0, 0, 0, 1, 1, 1], [0], [0]>} : vector<2x64x8xbf16>, vector<2x64x8xbf16>, vector<2x64x64xf32> -> vector<2x64x64xf32>
    %18 = arith.truncf %17 : vector<2x64x64xf32> to vector<2x64x64xbf16>
    %19 = arith.truncf %15 : vector<2x64x128xf32> to vector<2x64x128xbf16>
    %cst_8 = arith.constant dense<0.000000e+00> : vector<2x64x128xf32>
    %20 = tpu.matmul %18, %19, %cst_8 {dimension_numbers = #tpu.dot_dimension_numbers<[2], [1], [1], [2], [0, 0, 0, 1, 1, 2], [0], [0]>} : vector<2x64x64xbf16>, vector<2x64x128xbf16>, vector<2x64x128xf32> -> vector<2x64x128xf32>
    %21 = arith.mulf %15, %5 : vector<2x64x128xf32>
    %cst_9 = arith.constant 9.99999997E-7 : f32
    %22 = vector.broadcast %cst_9 : f32 to vector<2x64x128xf32>
    %23 = arith.addf %20, %22 : vector<2x64x128xf32>
    %24 = tpu.reciprocal %23 {approx = true} : vector<2x64x128xf32> -> vector<2x64x128xf32>
    %25 = arith.mulf %21, %24 : vector<2x64x128xf32>
    %26 = arith.truncf %25 : vector<2x64x128xf32> to vector<2x64x128xbf16>
    %cst_10 = arith.constant dense<0.000000e+00> : vector<2x64x8xf32>
    %27 = tpu.matmul %26, %0, %cst_10 {dimension_numbers = #tpu.dot_dimension_numbers<[2], [2], [1], [1], [0, 0, 0, 1, 1, 1], [0], [0]>} : vector<2x64x128xbf16>, vector<2x8x128xbf16>, vector<2x64x8xf32> -> vector<2x64x8xf32>
    %cst_11 = arith.constant dense<0.000000e+00> : vector<2x64x64xf32>
    %28 = tpu.matmul %26, %26, %cst_11 {dimension_numbers = #tpu.dot_dimension_numbers<[2], [2], [1], [1], [0, 0, 0, 1, 1, 1], [0], [0]>} : vector<2x64x128xbf16>, vector<2x64x128xbf16>, vector<2x64x64xf32> -> vector<2x64x64xf32>
    %29 = arith.truncf %28 : vector<2x64x64xf32> to vector<2x64x64xbf16>
    %cst_12 = arith.constant dense<0.000000e+00> : vector<2x64x8xf32>
    %30 = tpu.matmul %29, %16, %cst_12 {dimension_numbers = #tpu.dot_dimension_numbers<[2], [1], [1], [2], [0, 0, 0, 1, 1, 2], [0], [0]>} : vector<2x64x64xbf16>, vector<2x64x8xbf16>, vector<2x64x8xf32> -> vector<2x64x8xf32>
    %31 = arith.mulf %3, %27 : vector<2x64x8xf32>
    %cst_13 = arith.constant 9.99999997E-7 : f32
    %32 = vector.broadcast %cst_13 : f32 to vector<2x64x8xf32>
    %33 = arith.addf %30, %32 : vector<2x64x8xf32>
    %34 = tpu.reciprocal %33 {approx = true} : vector<2x64x8xf32> -> vector<2x64x8xf32>
    %35 = arith.mulf %31, %34 : vector<2x64x8xf32>
    %36 = arith.truncf %35 : vector<2x64x8xf32> to vector<2x64x8xbf16>
    %cst_14 = arith.constant dense<0.000000e+00> : vector<2x64x128xf32>
    %37 = tpu.matmul %36, %0, %cst_14 {dimension_numbers = #tpu.dot_dimension_numbers<[2], [1], [1], [2], [0, 0, 0, 1, 1, 2], [0], [0]>} : vector<2x64x8xbf16>, vector<2x8x128xbf16>, vector<2x64x128xf32> -> vector<2x64x128xf32>
    %c1_i32 = arith.constant 1 : i32
    %38 = arith.truncf %35 : vector<2x64x8xf32> to vector<2x64x8xbf16>
    %cst_15 = arith.constant dense<0.000000e+00> : vector<2x64x64xf32>
    %39 = tpu.matmul %38, %38, %cst_15 {dimension_numbers = #tpu.dot_dimension_numbers<[2], [2], [1], [1], [0, 0, 0, 1, 1, 1], [0], [0]>} : vector<2x64x8xbf16>, vector<2x64x8xbf16>, vector<2x64x64xf32> -> vector<2x64x64xf32>
    %40 = arith.truncf %39 : vector<2x64x64xf32> to vector<2x64x64xbf16>
    %41 = arith.truncf %25 : vector<2x64x128xf32> to vector<2x64x128xbf16>
    %cst_16 = arith.constant dense<0.000000e+00> : vector<2x64x128xf32>
    %42 = tpu.matmul %40, %41, %cst_16 {dimension_numbers = #tpu.dot_dimension_numbers<[2], [1], [1], [2], [0, 0, 0, 1, 1, 2], [0], [0]>} : vector<2x64x64xbf16>, vector<2x64x128xbf16>, vector<2x64x128xf32> -> vector<2x64x128xf32>
    %43 = arith.mulf %25, %37 : vector<2x64x128xf32>
    %cst_17 = arith.constant 9.99999997E-7 : f32
    %44 = vector.broadcast %cst_17 : f32 to vector<2x64x128xf32>
    %45 = arith.addf %42, %44 : vector<2x64x128xf32>
    %46 = tpu.reciprocal %45 {approx = true} : vector<2x64x128xf32> -> vector<2x64x128xf32>
    %47 = arith.mulf %43, %46 : vector<2x64x128xf32>
    %48 = arith.truncf %47 : vector<2x64x128xf32> to vector<2x64x128xbf16>
    %cst_18 = arith.constant dense<0.000000e+00> : vector<2x64x8xf32>
    %49 = tpu.matmul %48, %0, %cst_18 {dimension_numbers = #tpu.dot_dimension_numbers<[2], [2], [1], [1], [0, 0, 0, 1, 1, 1], [0], [0]>} : vector<2x64x128xbf16>, vector<2x8x128xbf16>, vector<2x64x8xf32> -> vector<2x64x8xf32>
    %cst_19 = arith.constant dense<0.000000e+00> : vector<2x64x64xf32>
    %50 = tpu.matmul %48, %48, %cst_19 {dimension_numbers = #tpu.dot_dimension_numbers<[2], [2], [1], [1], [0, 0, 0, 1, 1, 1], [0], [0]>} : vector<2x64x128xbf16>, vector<2x64x128xbf16>, vector<2x64x64xf32> -> vector<2x64x64xf32>
    %51 = arith.truncf %50 : vector<2x64x64xf32> to vector<2x64x64xbf16>
    %cst_20 = arith.constant dense<0.000000e+00> : vector<2x64x8xf32>
    %52 = tpu.matmul %51, %38, %cst_20 {dimension_numbers = #tpu.dot_dimension_numbers<[2], [1], [1], [2], [0, 0, 0, 1, 1, 2], [0], [0]>} : vector<2x64x64xbf16>, vector<2x64x8xbf16>, vector<2x64x8xf32> -> vector<2x64x8xf32>
    %53 = arith.mulf %35, %49 : vector<2x64x8xf32>
    %cst_21 = arith.constant 9.99999997E-7 : f32
    %54 = vector.broadcast %cst_21 : f32 to vector<2x64x8xf32>
    %55 = arith.addf %52, %54 : vector<2x64x8xf32>
    %56 = tpu.reciprocal %55 {approx = true} : vector<2x64x8xf32> -> vector<2x64x8xf32>
    %57 = arith.mulf %53, %56 : vector<2x64x8xf32>
    %58 = arith.truncf %57 : vector<2x64x8xf32> to vector<2x64x8xbf16>
    %cst_22 = arith.constant dense<0.000000e+00> : vector<2x64x128xf32>
    %59 = tpu.matmul %58, %0, %cst_22 {dimension_numbers = #tpu.dot_dimension_numbers<[2], [1], [1], [2], [0, 0, 0, 1, 1, 2], [0], [0]>} : vector<2x64x8xbf16>, vector<2x8x128xbf16>, vector<2x64x128xf32> -> vector<2x64x128xf32>
    %c2_i32 = arith.constant 2 : i32
    %60 = arith.truncf %57 : vector<2x64x8xf32> to vector<2x64x8xbf16>
    %cst_23 = arith.constant dense<0.000000e+00> : vector<2x64x64xf32>
    %61 = tpu.matmul %60, %60, %cst_23 {dimension_numbers = #tpu.dot_dimension_numbers<[2], [2], [1], [1], [0, 0, 0, 1, 1, 1], [0], [0]>} : vector<2x64x8xbf16>, vector<2x64x8xbf16>, vector<2x64x64xf32> -> vector<2x64x64xf32>
    %62 = arith.truncf %61 : vector<2x64x64xf32> to vector<2x64x64xbf16>
    %63 = arith.truncf %47 : vector<2x64x128xf32> to vector<2x64x128xbf16>
    %cst_24 = arith.constant dense<0.000000e+00> : vector<2x64x128xf32>
    %64 = tpu.matmul %62, %63, %cst_24 {dimension_numbers = #tpu.dot_dimension_numbers<[2], [1], [1], [2], [0, 0, 0, 1, 1, 2], [0], [0]>} : vector<2x64x64xbf16>, vector<2x64x128xbf16>, vector<2x64x128xf32> -> vector<2x64x128xf32>
    %65 = arith.mulf %47, %59 : vector<2x64x128xf32>
    %cst_25 = arith.constant 9.99999997E-7 : f32
    %66 = vector.broadcast %cst_25 : f32 to vector<2x64x128xf32>
    %67 = arith.addf %64, %66 : vector<2x64x128xf32>
    %68 = tpu.reciprocal %67 {approx = true} : vector<2x64x128xf32> -> vector<2x64x128xf32>
    %69 = arith.mulf %65, %68 : vector<2x64x128xf32>
    %70 = arith.truncf %69 : vector<2x64x128xf32> to vector<2x64x128xbf16>
    %cst_26 = arith.constant dense<0.000000e+00> : vector<2x64x8xf32>
    %71 = tpu.matmul %70, %0, %cst_26 {dimension_numbers = #tpu.dot_dimension_numbers<[2], [2], [1], [1], [0, 0, 0, 1, 1, 1], [0], [0]>} : vector<2x64x128xbf16>, vector<2x8x128xbf16>, vector<2x64x8xf32> -> vector<2x64x8xf32>
    %cst_27 = arith.constant dense<0.000000e+00> : vector<2x64x64xf32>
    %72 = tpu.matmul %70, %70, %cst_27 {dimension_numbers = #tpu.dot_dimension_numbers<[2], [2], [1], [1], [0, 0, 0, 1, 1, 1], [0], [0]>} : vector<2x64x128xbf16>, vector<2x64x128xbf16>, vector<2x64x64xf32> -> vector<2x64x64xf32>
    %73 = arith.truncf %72 : vector<2x64x64xf32> to vector<2x64x64xbf16>
    %cst_28 = arith.constant dense<0.000000e+00> : vector<2x64x8xf32>
    %74 = tpu.matmul %73, %60, %cst_28 {dimension_numbers = #tpu.dot_dimension_numbers<[2], [1], [1], [2], [0, 0, 0, 1, 1, 2], [0], [0]>} : vector<2x64x64xbf16>, vector<2x64x8xbf16>, vector<2x64x8xf32> -> vector<2x64x8xf32>
    %75 = arith.mulf %57, %71 : vector<2x64x8xf32>
    %cst_29 = arith.constant 9.99999997E-7 : f32
    %76 = vector.broadcast %cst_29 : f32 to vector<2x64x8xf32>
    %77 = arith.addf %74, %76 : vector<2x64x8xf32>
    %78 = tpu.reciprocal %77 {approx = true} : vector<2x64x8xf32> -> vector<2x64x8xf32>
    %79 = arith.mulf %75, %78 : vector<2x64x8xf32>
    %80 = arith.truncf %79 : vector<2x64x8xf32> to vector<2x64x8xbf16>
    %cst_30 = arith.constant dense<0.000000e+00> : vector<2x64x128xf32>
    %81 = tpu.matmul %80, %0, %cst_30 {dimension_numbers = #tpu.dot_dimension_numbers<[2], [1], [1], [2], [0, 0, 0, 1, 1, 2], [0], [0]>} : vector<2x64x8xbf16>, vector<2x8x128xbf16>, vector<2x64x128xf32> -> vector<2x64x128xf32>
    %c3_i32 = arith.constant 3 : i32
    %82 = arith.truncf %79 : vector<2x64x8xf32> to vector<2x64x8xbf16>
    %cst_31 = arith.constant dense<0.000000e+00> : vector<2x64x64xf32>
    %83 = tpu.matmul %82, %82, %cst_31 {dimension_numbers = #tpu.dot_dimension_numbers<[2], [2], [1], [1], [0, 0, 0, 1, 1, 1], [0], [0]>} : vector<2x64x8xbf16>, vector<2x64x8xbf16>, vector<2x64x64xf32> -> vector<2x64x64xf32>
    %84 = arith.truncf %83 : vector<2x64x64xf32> to vector<2x64x64xbf16>
    %85 = arith.truncf %69 : vector<2x64x128xf32> to vector<2x64x128xbf16>
    %cst_32 = arith.constant dense<0.000000e+00> : vector<2x64x128xf32>
    %86 = tpu.matmul %84, %85, %cst_32 {dimension_numbers = #tpu.dot_dimension_numbers<[2], [1], [1], [2], [0, 0, 0, 1, 1, 2], [0], [0]>} : vector<2x64x64xbf16>, vector<2x64x128xbf16>, vector<2x64x128xf32> -> vector<2x64x128xf32>
    %87 = arith.mulf %69, %81 : vector<2x64x128xf32>
    %cst_33 = arith.constant 9.99999997E-7 : f32
    %88 = vector.broadcast %cst_33 : f32 to vector<2x64x128xf32>
    %89 = arith.addf %86, %88 : vector<2x64x128xf32>
    %90 = tpu.reciprocal %89 {approx = true} : vector<2x64x128xf32> -> vector<2x64x128xf32>
    %91 = arith.mulf %87, %90 : vector<2x64x128xf32>
    %92 = arith.truncf %91 : vector<2x64x128xf32> to vector<2x64x128xbf16>
    %cst_34 = arith.constant dense<0.000000e+00> : vector<2x64x8xf32>
    %93 = tpu.matmul %92, %0, %cst_34 {dimension_numbers = #tpu.dot_dimension_numbers<[2], [2], [1], [1], [0, 0, 0, 1, 1, 1], [0], [0]>} : vector<2x64x128xbf16>, vector<2x8x128xbf16>, vector<2x64x8xf32> -> vector<2x64x8xf32>
    %cst_35 = arith.constant dense<0.000000e+00> : vector<2x64x64xf32>
    %94 = tpu.matmul %92, %92, %cst_35 {dimension_numbers = #tpu.dot_dimension_numbers<[2], [2], [1], [1], [0, 0, 0, 1, 1, 1], [0], [0]>} : vector<2x64x128xbf16>, vector<2x64x128xbf16>, vector<2x64x64xf32> -> vector<2x64x64xf32>
    %95 = arith.truncf %94 : vector<2x64x64xf32> to vector<2x64x64xbf16>
    %cst_36 = arith.constant dense<0.000000e+00> : vector<2x64x8xf32>
    %96 = tpu.matmul %95, %82, %cst_36 {dimension_numbers = #tpu.dot_dimension_numbers<[2], [1], [1], [2], [0, 0, 0, 1, 1, 2], [0], [0]>} : vector<2x64x64xbf16>, vector<2x64x8xbf16>, vector<2x64x8xf32> -> vector<2x64x8xf32>
    %97 = arith.mulf %79, %93 : vector<2x64x8xf32>
    %cst_37 = arith.constant 9.99999997E-7 : f32
    %98 = vector.broadcast %cst_37 : f32 to vector<2x64x8xf32>
    %99 = arith.addf %96, %98 : vector<2x64x8xf32>
    %100 = tpu.reciprocal %99 {approx = true} : vector<2x64x8xf32> -> vector<2x64x8xf32>
    %101 = arith.mulf %97, %100 : vector<2x64x8xf32>
    %102 = arith.truncf %101 : vector<2x64x8xf32> to vector<2x64x8xbf16>
    %cst_38 = arith.constant dense<0.000000e+00> : vector<2x64x128xf32>
    %103 = tpu.matmul %102, %0, %cst_38 {dimension_numbers = #tpu.dot_dimension_numbers<[2], [1], [1], [2], [0, 0, 0, 1, 1, 2], [0], [0]>} : vector<2x64x8xbf16>, vector<2x8x128xbf16>, vector<2x64x128xf32> -> vector<2x64x128xf32>
    %c4_i32 = arith.constant 4 : i32
    %104 = arith.truncf %101 : vector<2x64x8xf32> to vector<2x64x8xbf16>
    %cst_39 = arith.constant dense<0.000000e+00> : vector<2x64x64xf32>
    %105 = tpu.matmul %104, %104, %cst_39 {dimension_numbers = #tpu.dot_dimension_numbers<[2], [2], [1], [1], [0, 0, 0, 1, 1, 1], [0], [0]>} : vector<2x64x8xbf16>, vector<2x64x8xbf16>, vector<2x64x64xf32> -> vector<2x64x64xf32>
    %106 = arith.truncf %105 : vector<2x64x64xf32> to vector<2x64x64xbf16>
    %107 = arith.truncf %91 : vector<2x64x128xf32> to vector<2x64x128xbf16>
    %cst_40 = arith.constant dense<0.000000e+00> : vector<2x64x128xf32>
    %108 = tpu.matmul %106, %107, %cst_40 {dimension_numbers = #tpu.dot_dimension_numbers<[2], [1], [1], [2], [0, 0, 0, 1, 1, 2], [0], [0]>} : vector<2x64x64xbf16>, vector<2x64x128xbf16>, vector<2x64x128xf32> -> vector<2x64x128xf32>
    %109 = arith.mulf %91, %103 : vector<2x64x128xf32>
    %cst_41 = arith.constant 9.99999997E-7 : f32
    %110 = vector.broadcast %cst_41 : f32 to vector<2x64x128xf32>
    %111 = arith.addf %108, %110 : vector<2x64x128xf32>
    %112 = tpu.reciprocal %111 {approx = true} : vector<2x64x128xf32> -> vector<2x64x128xf32>
    %113 = arith.mulf %109, %112 : vector<2x64x128xf32>
    %114 = arith.truncf %113 : vector<2x64x128xf32> to vector<2x64x128xbf16>
    %cst_42 = arith.constant dense<0.000000e+00> : vector<2x64x8xf32>
    %115 = tpu.matmul %114, %0, %cst_42 {dimension_numbers = #tpu.dot_dimension_numbers<[2], [2], [1], [1], [0, 0, 0, 1, 1, 1], [0], [0]>} : vector<2x64x128xbf16>, vector<2x8x128xbf16>, vector<2x64x8xf32> -> vector<2x64x8xf32>
    %cst_43 = arith.constant dense<0.000000e+00> : vector<2x64x64xf32>
    %116 = tpu.matmul %114, %114, %cst_43 {dimension_numbers = #tpu.dot_dimension_numbers<[2], [2], [1], [1], [0, 0, 0, 1, 1, 1], [0], [0]>} : vector<2x64x128xbf16>, vector<2x64x128xbf16>, vector<2x64x64xf32> -> vector<2x64x64xf32>
    %117 = arith.truncf %116 : vector<2x64x64xf32> to vector<2x64x64xbf16>
    %cst_44 = arith.constant dense<0.000000e+00> : vector<2x64x8xf32>
    %118 = tpu.matmul %117, %104, %cst_44 {dimension_numbers = #tpu.dot_dimension_numbers<[2], [1], [1], [2], [0, 0, 0, 1, 1, 2], [0], [0]>} : vector<2x64x64xbf16>, vector<2x64x8xbf16>, vector<2x64x8xf32> -> vector<2x64x8xf32>
    %119 = arith.mulf %101, %115 : vector<2x64x8xf32>
    %cst_45 = arith.constant 9.99999997E-7 : f32
    %120 = vector.broadcast %cst_45 : f32 to vector<2x64x8xf32>
    %121 = arith.addf %118, %120 : vector<2x64x8xf32>
    %122 = tpu.reciprocal %121 {approx = true} : vector<2x64x8xf32> -> vector<2x64x8xf32>
    %123 = arith.mulf %119, %122 : vector<2x64x8xf32>
    %124 = arith.truncf %123 : vector<2x64x8xf32> to vector<2x64x8xbf16>
    %cst_46 = arith.constant dense<0.000000e+00> : vector<2x64x128xf32>
    %125 = tpu.matmul %124, %0, %cst_46 {dimension_numbers = #tpu.dot_dimension_numbers<[2], [1], [1], [2], [0, 0, 0, 1, 1, 2], [0], [0]>} : vector<2x64x8xbf16>, vector<2x8x128xbf16>, vector<2x64x128xf32> -> vector<2x64x128xf32>
    %c5_i32 = arith.constant 5 : i32
    %126 = arith.truncf %123 : vector<2x64x8xf32> to vector<2x64x8xbf16>
    %cst_47 = arith.constant dense<0.000000e+00> : vector<2x64x64xf32>
    %127 = tpu.matmul %126, %126, %cst_47 {dimension_numbers = #tpu.dot_dimension_numbers<[2], [2], [1], [1], [0, 0, 0, 1, 1, 1], [0], [0]>} : vector<2x64x8xbf16>, vector<2x64x8xbf16>, vector<2x64x64xf32> -> vector<2x64x64xf32>
    %128 = arith.truncf %127 : vector<2x64x64xf32> to vector<2x64x64xbf16>
    %129 = arith.truncf %113 : vector<2x64x128xf32> to vector<2x64x128xbf16>
    %cst_48 = arith.constant dense<0.000000e+00> : vector<2x64x128xf32>
    %130 = tpu.matmul %128, %129, %cst_48 {dimension_numbers = #tpu.dot_dimension_numbers<[2], [1], [1], [2], [0, 0, 0, 1, 1, 2], [0], [0]>} : vector<2x64x64xbf16>, vector<2x64x128xbf16>, vector<2x64x128xf32> -> vector<2x64x128xf32>
    %131 = arith.mulf %113, %125 : vector<2x64x128xf32>
    %cst_49 = arith.constant 9.99999997E-7 : f32
    %132 = vector.broadcast %cst_49 : f32 to vector<2x64x128xf32>
    %133 = arith.addf %130, %132 : vector<2x64x128xf32>
    %134 = tpu.reciprocal %133 {approx = true} : vector<2x64x128xf32> -> vector<2x64x128xf32>
    %135 = arith.mulf %131, %134 : vector<2x64x128xf32>
    %136 = arith.truncf %135 : vector<2x64x128xf32> to vector<2x64x128xbf16>
    %cst_50 = arith.constant dense<0.000000e+00> : vector<2x64x8xf32>
    %137 = tpu.matmul %136, %0, %cst_50 {dimension_numbers = #tpu.dot_dimension_numbers<[2], [2], [1], [1], [0, 0, 0, 1, 1, 1], [0], [0]>} : vector<2x64x128xbf16>, vector<2x8x128xbf16>, vector<2x64x8xf32> -> vector<2x64x8xf32>
    %cst_51 = arith.constant dense<0.000000e+00> : vector<2x64x64xf32>
    %138 = tpu.matmul %136, %136, %cst_51 {dimension_numbers = #tpu.dot_dimension_numbers<[2], [2], [1], [1], [0, 0, 0, 1, 1, 1], [0], [0]>} : vector<2x64x128xbf16>, vector<2x64x128xbf16>, vector<2x64x64xf32> -> vector<2x64x64xf32>
    %139 = arith.truncf %138 : vector<2x64x64xf32> to vector<2x64x64xbf16>
    %cst_52 = arith.constant dense<0.000000e+00> : vector<2x64x8xf32>
    %140 = tpu.matmul %139, %126, %cst_52 {dimension_numbers = #tpu.dot_dimension_numbers<[2], [1], [1], [2], [0, 0, 0, 1, 1, 2], [0], [0]>} : vector<2x64x64xbf16>, vector<2x64x8xbf16>, vector<2x64x8xf32> -> vector<2x64x8xf32>
    %141 = arith.mulf %123, %137 : vector<2x64x8xf32>
    %cst_53 = arith.constant 9.99999997E-7 : f32
    %142 = vector.broadcast %cst_53 : f32 to vector<2x64x8xf32>
    %143 = arith.addf %140, %142 : vector<2x64x8xf32>
    %144 = tpu.reciprocal %143 {approx = true} : vector<2x64x8xf32> -> vector<2x64x8xf32>
    %145 = arith.mulf %141, %144 : vector<2x64x8xf32>
    %146 = arith.truncf %145 : vector<2x64x8xf32> to vector<2x64x8xbf16>
    %cst_54 = arith.constant dense<0.000000e+00> : vector<2x64x128xf32>
    %147 = tpu.matmul %146, %0, %cst_54 {dimension_numbers = #tpu.dot_dimension_numbers<[2], [1], [1], [2], [0, 0, 0, 1, 1, 2], [0], [0]>} : vector<2x64x8xbf16>, vector<2x8x128xbf16>, vector<2x64x128xf32> -> vector<2x64x128xf32>
    %148 = arith.truncf %145 : vector<2x64x8xf32> to vector<2x64x8xbf16>
    %cst_55 = arith.constant dense<0.000000e+00> : vector<2x64x64xf32>
    %149 = tpu.matmul %148, %148, %cst_55 {dimension_numbers = #tpu.dot_dimension_numbers<[2], [2], [1], [1], [0, 0, 0, 1, 1, 1], [0], [0]>} : vector<2x64x8xbf16>, vector<2x64x8xbf16>, vector<2x64x64xf32> -> vector<2x64x64xf32>
    %150 = arith.truncf %149 : vector<2x64x64xf32> to vector<2x64x64xbf16>
    %151 = arith.truncf %135 : vector<2x64x128xf32> to vector<2x64x128xbf16>
    %cst_56 = arith.constant dense<0.000000e+00> : vector<2x64x128xf32>
    %152 = tpu.matmul %150, %151, %cst_56 {dimension_numbers = #tpu.dot_dimension_numbers<[2], [1], [1], [2], [0, 0, 0, 1, 1, 2], [0], [0]>} : vector<2x64x64xbf16>, vector<2x64x128xbf16>, vector<2x64x128xf32> -> vector<2x64x128xf32>
    %153 = arith.mulf %135, %147 : vector<2x64x128xf32>
    %cst_57 = arith.constant 9.99999997E-7 : f32
    %154 = vector.broadcast %cst_57 : f32 to vector<2x64x128xf32>
    %155 = arith.addf %152, %154 : vector<2x64x128xf32>
    %156 = arith.divf %153, %155 : vector<2x64x128xf32>
    %157 = tpu.transpose %148, [0, 2, 1] : vector<2x64x8xbf16> -> vector<2x8x64xbf16>
    %158 = arith.truncf %156 : vector<2x64x128xf32> to vector<2x64x128xbf16>
    %cst_58 = arith.constant dense<0.000000e+00> : vector<2x8x128xf32>
    %159 = tpu.matmul %157, %158, %cst_58 {dimension_numbers = #tpu.dot_dimension_numbers<[2], [1], [1], [2], [0, 0, 0, 1, 1, 2], [0], [0]>} : vector<2x8x64xbf16>, vector<2x64x128xbf16>, vector<2x8x128xf32> -> vector<2x8x128xf32>
    %160 = arith.truncf %159 : vector<2x8x128xf32> to vector<2x8x128xbf16>
    %c0_59 = arith.constant 0 : index
    %c0_60 = arith.constant 0 : index
    %c0_61 = arith.constant 0 : index
    %161 = vector.load %arg3[%c0_59, %c0_60, %c0_61] : memref<2x8x128xbf16, #tpu.memory_space<vmem>>, vector<2x8x128xbf16>
    tpu.vector_store %arg3[%c0_59, %c0_60, %c0_61], %160 {strides = array<i32>} : memref<2x8x128xbf16, #tpu.memory_space<vmem>>, vector<2x8x128xbf16>,
    %c0_62 = arith.constant 0 : index
    %c0_63 = arith.constant 0 : index
    %c0_64 = arith.constant 0 : index
    %162 = vector.load %arg4[%c0_62, %c0_63, %c0_64] : memref<2x64x8xf32, #tpu.memory_space<vmem>>, vector<2x64x8xf32>
    tpu.vector_store %arg4[%c0_62, %c0_63, %c0_64], %145 {strides = array<i32>} : memref<2x64x8xf32, #tpu.memory_space<vmem>>, vector<2x64x8xf32>,
    return
  }
  func.func @transform_0(%arg0: i32) -> (i32, i32, i32) {
    %c0_i32 = arith.constant 0 : i32
    %c0_i32_0 = arith.constant 0 : i32
    %c0_i32_1 = arith.constant 0 : i32
    return %arg0, %c0_i32, %c0_i32_0 : i32, i32, i32
  }
  func.func @transform_1(%arg0: i32) -> (i32, i32, i32) {
    %c0_i32 = arith.constant 0 : i32
    %c0_i32_0 = arith.constant 0 : i32
    %c0_i32_1 = arith.constant 0 : i32
    %c0_i32_2 = arith.constant 0 : i32
    return %c0_i32, %c0_i32_0, %c0_i32_1 : i32, i32, i32
  }
  func.func @transform_2(%arg0: i32) -> (i32, i32, i32) {
    %c0_i32 = arith.constant 0 : i32
    %c0_i32_0 = arith.constant 0 : i32
    %c0_i32_1 = arith.constant 0 : i32
    return %arg0, %c0_i32, %c0_i32_0 : i32, i32, i32
  }
  func.func @transform_3(%arg0: i32) -> (i32, i32, i32) {
    %c0_i32 = arith.constant 0 : i32
    %c0_i32_0 = arith.constant 0 : i32
    %c0_i32_1 = arith.constant 0 : i32
    return %arg0, %c0_i32, %c0_i32_0 : i32, i32, i32
  }
}

</mosaic_0001>

<bundles_post_ra>
// kernel: tpu_custom_call.1
= control target key start
LH: loop header
LB: loop body
LE: loop exit
PB: predicated region body
PF: predicated region fallthrough
CT: control target
= control target key end

     0   :  { %9 = vsyncpa [#allocation3], 0  ;;  %s9092_s0 = inlined_call_operand.vmem [shape: bf16[4,8,128], index: 0, kind: input, shape index: {}]   ;;  %s9093_s1 = inlined_call_operand.vmem [shape: f32[1,64,8], index: 1, kind: input, shape index: {}]   ;;  %s9094_s2 = inlined_call_operand.hbm [shape: bf16[4,8,128], index: 2, kind: output, shape index: {0}]   ;;  %s9095_s3 = inlined_call_operand.vmem [shape: f32[4,64,8], index: 3, kind: output, shape index: {1}]  }
   0x1   :  { %11 = vsyncpa [#allocation3 + $0x1], 0  ;;  %s6511_s12 = smov 0   ;;  %s6513_s13 = smov 0  }
   0x2   :  { %s6515_s14 = smov 0   ;;  %s6517_s15 = smov 0  }
   0x3 LB: > { %s6532_s16 = sadd.s32 4294967295, %s6487_s15   ;;  %s5673_s17 = sadd.s32 4294967294, %s6487_s15   ;;  %s6487_s15 = sphi %s6517_s15, %s9127_s15   ;;  %s6483_s14 = sphi %s6515_s14, %s9126_s14   ;;  %s6479_s13 = sphi %s6513_s13, %s9125_s13   ;;  %s6475_s12 = sphi %s6511_s12, %s9124_s12  }
   0x4   : > { %s6536_s18 = sadd.s32 1, %s6487_s15   ;;  %s71_s19 = sadd.s32 1, %s6483_s14 }
   0x5   : > { %s68_s20 = ssub.s32 %s6487_s15, %s6536_s18  ;;  %p81_p0 = scmp.ne.s32.totalorder %s6483_s14, %s6479_s13 }
   0x6   : > { %p69_p1 = scmp.eq.s32.totalorder %s68_s20, 0  ;;  %p82_p2 = scmp.eq.s32.totalorder %s6532_s16, 1 }
   0x7   : > { %p87_p3 = scmp.ne.s32.totalorder %s6479_s13, %s6475_s12  ;;  %p88_p4 = scmp.eq.s32.totalorder %s5673_s17, 1 }
   0x8   : > { %s6547_s21 = scalar_select %p69_p1, %s6483_s14, %s71_s19  }
   0x9   : > { %p6549_p5 = por %p82_p2, %p81_p0  ;;  %p6553_p6 = por %p88_p4, %p87_p3 }
   0xa   : > { %p5676_p7 = scmp.ge.s32.totalorder %s6487_s15, 1  ;;  %p144_p8 = scmp.lt.s32.totalorder %s6487_s15, 3 }
   0xc   : > { %p145_p9 = pnand %p5676_p7, %p144_p8 }
   0xd   : > { %s5678_s24 = sshll.u32 (!%p145_p9), %s6532_s16, 1  ;;  %s5903_s4 = sshll.u32 (!%p145_p9), %s6532_s16, 3 }
   0xe   : > { %148 = sbr.rel (%p145_p9) target bundleno = 5194 (0x144a), region = 28  ;;  %p175_p10 = scmp.lt.s32.totalorder (!%p145_p9), %s5678_s24, 3 }
   0xf   : > { %s5577_s8 = scalar_lea.hbm (!%p145_p9), %s9094_s2, %s5903_s4  ;;  %s6445_s27 = scalar_lea.hbm (!%p145_p9), %s9094_s2, 16 }
  0x10   : > { %s5580_s11 = sshll.u32 (!%p145_p9), %s5577_s8, 4  ;;  %s5581_s11 = int_to_ptr.hbm [resolvable:$true] %s5580_s11 }
  0x11   : > { %s6439_s20 = sshra.s32 (!%p145_p9), %s5581_s11, 4  ;;  %s6440_s20 = int_to_ptr.hbm [resolvable:$true] %s6439_s20 }
  0x12   : > { %s6441_s25 = scalar_lea.hbm (!%p145_p9), %s6440_s20, 8  ;;  %p6446_p0 = scmp.lt.s32.totalorder (!%p145_p9), %s6440_s20, %s9094_s2 }
  0x13   : > { %v191_v0 = vld [vmem:[%s9093_s1] sm:$0xff]  ;;  %v192_v1 = vld [vmem:[%s9093_s1 + $0x8] sm:$0xff]  ;;  %v193_v2 = vld [vmem:[%s9093_s1 + $0x10] sm:$0xff]  ;;  %s9129_s24 = smov (!%p175_p10, %s5678_s24), 3  ;;  %vm240_vm0 = vcmask 1043456   ;;  %vm227_vm1 = vcmask 64512   ;;  %p6442_p11 = scmp.ne.s32.totalorder %s6440_s20, %s6441_s25 }
  0x14   : > { %v199_v3 = vpack.c.bf16 %v191_v0, %v191_v0  ;;  %v200_v4 = vpack.c.bf16 %v192_v1, %v192_v1  ;;  %v194_v5 = vld [vmem:[%s9093_s1 + $0x18] sm:$0xff]  ;;  %v201_v6 = vpack.c.bf16 %v193_v2, %v193_v2  ;;  %v195_v7 = vld [vmem:[%s9093_s1 + $0x20] sm:$0xff]  ;;  %v196_v8 = vld [vmem:[%s9093_s1 + $0x28] sm:$0xff]  ;;  %s5679_s10 = sshll.u32 %s9129_s24, 2  ;;  %vm536_vm2 = vcmask 523264   ;;  %p6447_p1 = scmp.lt.s32.totalorder %s6445_s27, %s6441_s25 }
  0x15   : > { %v202_v9 = vpack.c.bf16 %v194_v5, %v194_v5  ;;  %v203_v10 = vpack.c.bf16 %v195_v7, %v195_v7  ;;  %v204_v11 = vpack.c.bf16 %v196_v8, %v196_v8  ;;  %s6584_s19 = scalar_lea.vmem %s9092_s0, %s5679_s10  ;;  %v197_v25 = vld [vmem:[%s9093_s1 + $0x30] sm:$0xff]  ;;  %v198_v26 = vld [vmem:[%s9093_s1 + $0x38] sm:$0xff]  ;;  %p6443_p12 = pnand %p6442_p11, %p6549_p5 }
  0x16   : > { %v215_v12 = vunpack.c.l.b16 %v199_v3  ;;  %v216_v13 = vunpack.c.l.b16 %v200_v4  ;;  %v217_v14 = vunpack.c.l.b16 %v201_v6  ;;  %v189_v18 = vld [vmem:[%s6584_s19] sm:$0xf]  ;;  %v6588_v19 = vld [vmem:[%s6584_s19 + $0x4] sm:$0xf]  ;;  %v205_v27 = vpack.c.bf16 %v197_v25, %v197_v25  ;;  %p6448_p2 = por %p6447_p1, %p6446_p0 }
  0x17   : > { %v218_v15 = vunpack.c.l.b16 %v202_v9  ;;  %v219_v16 = vunpack.c.l.b16 %v203_v10  ;;  %v220_v17 = vunpack.c.l.b16 %v204_v11  ;;  %v6590_v20 = vsel %vm240_vm0, %v189_v18, 0  ;;  %p6444_p13 = pneg %p6443_p12 }
  0x18   : > { %v6592_v21 = vpack.c.b16 %v216_v13, %v215_v12  ;;  %v6597_v23 = vsel %vm240_vm0, %v6588_v19, 0  ;;  %251 = vmatpush.bf16.msra.mxu0 %v6590_v20  ;;  %5909 = vmatpush.bf16.msra.mxu1 %v6590_v20  ;;  %v206_v28 = vpack.c.bf16 %v198_v26, %v198_v26  ;;  %v221_v29 = vunpack.c.l.b16 %v205_v27 }
  0x19   : > { %v6594_v22 = vpack.c.b16 %v218_v15, %v217_v14  ;;  %v6601_v24 = vpack.c.b16 %v220_v17, %v219_v16  ;;  %5910 = vmatpush.bf16.msra.mxu2 %v6590_v20  ;;  %p6449_p3 = pnand %p6448_p2, %p6444_p13 }
  0x1a   : > { %v222_v30 = vunpack.c.l.b16 %v206_v28  ;;  %v229_v35 = vsel %vm227_vm1, %v6592_v21, 0 }
  0x1b   : > { %5683 = vmatmul.msk.bf16.vlgmr.msra.gmra.mxu0 %vm227_vm1, %v6592_v21  ;;  %5684 = vmatmul.msk.bf16.vlgmr.msra.gmra.mxu1 %vm227_vm1, %v6594_v22  ;;  %v235_v33 = vsel %vm227_vm1, %v6601_v24, 0  ;;  %v232_v34 = vsel %vm227_vm1, %v6594_v22, 0 }
  0x1c   : > { %283 = vmatpush.bf16.msrb.mxu1 %v6597_v23  ;;  %5685 = vmatmul.msk.bf16.vlgmr.msra.gmra.mxu2 %vm227_vm1, %v6601_v24  ;;  %v6617_v31 = vpack.c.b16 %v222_v30, %v221_v29 }
  0x1e   : > { %v238_v32 = vsel %vm227_vm1, %v6617_v31, 0 }
  0x1f   : > { %427 = vmatpush.bf16.xpose.msrb.mxu2 %v238_v32 }
  0x20   : > { %710 = vmatpush.bf16.xpose.msra.mxu1 %v189_v18 }
  0x27   : > { %428 = vmatpush.bf16.xpose.msrb.mxu2 %v235_v33 }
  0x2b   : > { %5687 = vmatmul.msk.bf16.vlgmr.msrb.gmra.mxu1 %vm227_vm1, %v6592_v21 }
  0x2c   : > { %5686 = vmatmul.msk.bf16.gmra.mxu2 %vm227_vm1, %v6617_v31  ;;  %915 = vmatpush.bf16.msrb.mxu1 %v6617_v31 }
  0x2f   : > { %429 = vmatpush.bf16.xpose.msrb.mxu2 %v232_v34 }
  0x30   : > { %916 = vmatpush.bf16.msrb.mxu1 %v6601_v24 }
  0x34   : > { %917 = vmatpush.bf16.msrb.mxu1 %v6594_v22 }
  0x37   : > { %430 = vmatpush.bf16.xpose.msrb.mxu2 %v229_v35 }
  0x38   : > { %918 = vmatpush.bf16.msrb.mxu1 %v6592_v21 }
  0x3b   : > { %5688 = vmatmul.msk.bf16.gmra.mxu1 %vm227_vm1, %v6594_v22 }
  0x3e   : > { %5691 = vmatmul.msk.bf16.vlgmr.msrb.gmra.mxu2 %vm227_vm1, %v6592_v21 }
  0x4b   : > { %5689 = vmatmul.msk.bf16.gmra.mxu1 %vm227_vm1, %v6601_v24 }
  0x4e   : > { %5692 = vmatmul.msk.bf16.gmra.mxu2 %vm227_vm1, %v6594_v22 }
  0x5b   : > { %5690 = vmatmul.msk.bf16.gmra.mxu1 %vm227_vm1, %v6617_v31 }
  0x5e   : > { %5693 = vmatmul.msk.bf16.gmra.mxu2 %vm227_vm1, %v6601_v24 }
  0x6e   : > { %5694 = vmatmul.msk.bf16.gmra.mxu2 %vm227_vm1, %v6617_v31 }
  0x98   : > { %v6649_v36 = vpop.f32.mrf.mxu1  ;;  %v6655_v39 = vpop.f32.mrf.mxu0 }
  0x99   : > { %v305_v45 = vmax.f32 %v6655_v39, %v6649_v36 }
  0x9f   : > { %v6651_v37 = vpop.f32.mrf.mxu2 }
  0xa0   : > { %v6653_v38 = vpop.f32.mrf.mxu1  ;;  %v6665_v44 = vpop.f32.mrf.mxu0  ;;  %v307_v47 = vmax.f32 %v305_v45, %v6651_v37 }
  0xa1   : > { %v306_v46 = vmax.f32 %v6665_v44, %v6653_v38 }
  0xa7   : > { %v6657_v40 = vpop.f32.mrf.mxu2 }
  0xa8   : > { %v6659_v41 = vpop.f32.mrf.mxu1  ;;  %v308_v48 = vmax.f32 %v306_v46, %v6657_v40 }
  0xaf   : > { %v6661_v42 = vpop.f32.mrf.mxu2 }
  0xb0   : > { %v6663_v43 = vpop.f32.mrf.mxu1  ;;  %v309_v50 = vmax.f32 %v307_v47, %v6661_v42 }
  0xb7   : > { %v6673_v49 = vpop.f32.mrf.mxu2 }
  0xb8   : > { %v310_v51 = vmax.f32 %v308_v48, %v6673_v49  ;;  %v6677_v52 = vpop.f32.mrf.mxu1 }
  0xb9   : > { %v318_v33 = vmax.f32 %v6659_v41, %v6677_v52 }
  0xba   : > { %v311_v53 = vmax.f32 %v309_v50, %v310_v51 }
  0xbc   : > { %v312_v54 = vrot.slane %v311_v53, 4 }
  0xbe   : > { %v313_v55 = vmax.f32 %v311_v53, %v312_v54 }
  0xc0   : > { %v314_v56 = vrot.slane %v313_v55, 2  ;;  %v6679_v57 = vpop.f32.mrf.mxu1 }
  0xc1   : > { %v319_v34 = vmax.f32 %v6663_v43, %v6679_v57 }
  0xc2   : > { %v315_v58 = vmax.f32 %v313_v55, %v314_v56 }
  0xc4   : > { %v316_v59 = vrot.slane %v315_v58, 1 }
  0xc6   : > { %v317_v60 = vmax.f32 %v315_v58, %v316_v59 }
  0xc8   : > { %v6681_v61 = vpop.f32.mrf.mxu1  ;;  %v331_v62 = vsub.f32 %v6655_v39, %v317_v60  ;;  %v332_v63 = vsub.f32 %v6665_v44, %v317_v60  ;;  %v333_v0 = vsub.f32 %v6649_v36, %v317_v60  ;;  %v334_v1 = vsub.f32 %v6653_v38, %v317_v60 }
  0xc9   : > { %v335_v4 = vsub.f32 %v6651_v37, %v317_v60  ;;  %v336_v6 = vsub.f32 %v6657_v40, %v317_v60  ;;  %v337_v9 = vsub.f32 %v6661_v42, %v317_v60  ;;  %v338_v11 = vsub.f32 %v6673_v49, %v317_v60 }
  0xca   : > { %v347_v2 = vmul.f32 1.442695, %v331_v62  ;;  %v349_v3 = vmul.f32 1.442695, %v332_v63  ;;  %v351_v5 = vmul.f32 1.442695, %v333_v0  ;;  %v320_v46 = vmax.f32 %v318_v33, %v6681_v61  ;;  %v6711_v0 = vpop.f32.mrf.mxu2 }
  0xcb   : > { %v353_v7 = vmul.f32 1.442695, %v334_v1  ;;  %v355_v10 = vmul.f32 1.442695, %v335_v4  ;;  %v357_v12 = vmul.f32 1.442695, %v336_v6 }
  0xcc   : > { %5959 = vpow2.f32 %v347_v2  ;;  %v359_v15 = vmul.f32 1.442695, %v337_v9  ;;  %v361_v18 = vmul.f32 1.442695, %v338_v11 }
  0xcd   : > { %5961 = vpow2.f32 %v349_v3 }
  0xce   : > { %5963 = vpow2.f32 %v351_v5 }
  0xcf   : > { %5965 = vpow2.f32 %v353_v7 }
  0xd0   : > { %v6689_v8 = vpop.f32.mrf.mxu1  ;;  %5967 = vpow2.f32 %v355_v10 }
  0xd1   : > { %5969 = vpow2.f32 %v357_v12  ;;  %v321_v47 = vmax.f32 %v319_v34, %v6689_v8 }
  0xd2   : > { %v6693_v13 = vpop.eup %5959  ;;  %5971 = vpow2.f32 %v359_v15  ;;  %v6717_v15 = vpop.f32.mrf.mxu2 }
  0xd3   : > { %v6695_v14 = vpop.eup %5961  ;;  %5973 = vpow2.f32 %v361_v18 }
  0xd4   : > { %v379_v16 = vadd.f32 %v6695_v14, %v6693_v13  ;;  %v5964_v17 = vpop.eup %5963 }
  0xd5   : > { %v5966_v26 = vpop.eup %5965 }
  0xd6   : > { %v380_v25 = vadd.f32 %v5964_v17, %v379_v16  ;;  %v5968_v29 = vpop.eup %5967 }
  0xd7   : > { %v5970_v32 = vpop.eup %5969 }
  0xd8   : > { %v6699_v27 = vpop.f32.mrf.mxu1  ;;  %v381_v28 = vadd.f32 %v5966_v26, %v380_v25  ;;  %v5972_v45 = vpop.eup %5971 }
  0xd9   : > { %v5974_v50 = vpop.eup %5973  ;;  %v322_v53 = vmax.f32 %v320_v46, %v6699_v27 }
  0xda   : > { %v382_v30 = vadd.f32 %v5968_v29, %v381_v28 }
  0xdc   : > { %v383_v35 = vadd.f32 %v5970_v32, %v382_v30 }
  0xde   : > { %v384_v48 = vadd.f32 %v5972_v45, %v383_v35 }
  0xe0   : > { %v6707_v51 = vpop.f32.mrf.mxu1  ;;  %v385_v55 = vadd.f32 %v5974_v50, %v384_v48 }
  0xe1   : > { %v323_v54 = vmax.f32 %v321_v47, %v6707_v51 }
  0xe2   : > { %v386_v58 = vrot.slane %v385_v55, 4 }
  0xe3   : > { %v324_v56 = vmax.f32 %v322_v53, %v323_v54 }
  0xe4   : > { %v387_v60 = vadd.f32 %v386_v58, %v385_v55 }
  0xe5   : > { %v325_v59 = vrot.slane %v324_v56, 4 }
  0xe6   : > { %v388_v63 = vrot.slane %v387_v60, 2 }
  0xe7   : > { %v326_v62 = vmax.f32 %v324_v56, %v325_v59 }
  0xe8   : > { %v389_v2 = vadd.f32 %v388_v63, %v387_v60 }
  0xe9   : > { %v327_v1 = vrot.slane %v326_v62, 2 }
  0xea   : > { %v390_v4 = vrot.slane %v389_v2, 1 }
  0xeb   : > { %v328_v3 = vmax.f32 %v326_v62, %v327_v1 }
  0xec   : > { %v391_v6 = vadd.f32 %v390_v4, %v389_v2 }
  0xed   : > { %v329_v5 = vrot.slane %v328_v3, 1 }
  0xee   : > { %5975 = vrcp.f32 %v391_v6  ;;  %v437_v6 = vpop.f32.mrf.mxu2 }
  0xef   : > { %v330_v7 = vmax.f32 %v328_v3, %v329_v5 }
  0xf1   : > { %v339_v9 = vsub.f32 %v6659_v41, %v330_v7  ;;  %v340_v10 = vsub.f32 %v6663_v43, %v330_v7  ;;  %v341_v11 = vsub.f32 %v6677_v52, %v330_v7  ;;  %v342_v12 = vsub.f32 %v6679_v57, %v330_v7 }
  0xf2   : > { %v343_v16 = vsub.f32 %v6681_v61, %v330_v7  ;;  %v344_v33 = vsub.f32 %v6689_v8, %v330_v7  ;;  %v345_v48 = vsub.f32 %v6699_v27, %v330_v7 }
  0xf3   : > { %v363_v18 = vmul.f32 1.442695, %v339_v9  ;;  %v365_v25 = vmul.f32 1.442695, %v340_v10  ;;  %v367_v28 = vmul.f32 1.442695, %v341_v11 }
  0xf4   : > { %v5976_v30 = vpop.eup %5975  ;;  %v369_v34 = vmul.f32 1.442695, %v342_v12  ;;  %v371_v53 = vmul.f32 1.442695, %v343_v16  ;;  %v375_v1 = vmul.f32 1.442695, %v345_v48 }
  0xf5   : > { %5977 = vpow2.f32 %v363_v18  ;;  %v6721_v35 = vmul.f32 %v5976_v30, %v5972_v45  ;;  %v6723_v46 = vmul.f32 %v5976_v30, %v5974_v50  ;;  %v6725_v47 = vmul.f32 %v5976_v30, %v5968_v29 }
  0xf6   : > { %5979 = vpow2.f32 %v365_v25  ;;  %v6728_v54 = vmul.f32 %v5976_v30, %v5970_v32  ;;  %v6734_v58 = vmul.f32 %v5976_v30, %v5964_v17  ;;  %v6736_v45 = vmul.f32 %v5976_v30, %v5966_v26 }
  0xf7   : > { %5981 = vpow2.f32 %v367_v28  ;;  %v466_v55 = vpack.c.bf16 %v6721_v35, %v6721_v35  ;;  %v467_v56 = vpack.c.bf16 %v6723_v46, %v6723_v46  ;;  %v346_v50 = vsub.f32 %v6707_v51, %v330_v7 }
  0xf8   : > { %v464_v29 = vpack.c.bf16 %v6725_v47, %v6725_v47  ;;  %v465_v59 = vpack.c.bf16 %v6728_v54, %v6728_v54  ;;  %5983 = vpow2.f32 %v369_v34  ;;  %v373_v32 = vmul.f32 1.442695, %v344_v33 }
  0xf9   : > { %v526_v60 = vunpack.c.l.b16 %v466_v55  ;;  %v527_v62 = vunpack.c.l.b16 %v467_v56  ;;  %5985 = vpow2.f32 %v371_v53  ;;  %v462_v4 = vpack.c.bf16 %v6734_v58, %v6734_v58 }
  0xfa   : > { %v524_v2 = vunpack.c.l.b16 %v464_v29  ;;  %v525_v17 = vunpack.c.l.b16 %v465_v59  ;;  %v463_v5 = vpack.c.bf16 %v6736_v45, %v6736_v45  ;;  %5987 = vpow2.f32 %v373_v32 }
  0xfb   : > { %v6743_v63 = vpop.eup %5977  ;;  %v531_v26 = vpack.c.b16 %v527_v62, %v526_v60  ;;  %v377_v10 = vmul.f32 1.442695, %v346_v50  ;;  %v6756_v11 = vmul.f32 %v5976_v30, %v6693_v13  ;;  %v6759_v12 = vmul.f32 %v5976_v30, %v6695_v14 }
  0xfc   : > { %v6745_v3 = vpop.eup %5979  ;;  %5989 = vpow2.f32 %v375_v1  ;;  %v530_v18 = vpack.c.b16 %v525_v17, %v524_v2  ;;  %v522_v28 = vunpack.c.l.b16 %v462_v4  ;;  %v523_v33 = vunpack.c.l.b16 %v463_v5  ;;  %v439_v2 = vpop.f32.mrf.mxu2 }
  0xfd   : > { %v6751_v7 = vpop.eup %5981  ;;  %v392_v9 = vadd.f32 %v6745_v3, %v6743_v63  ;;  %553 = vmatpush.bf16.msra.mxu3 %v531_v26  ;;  %v460_v34 = vpack.c.bf16 %v6756_v11, %v6756_v11  ;;  %v461_v48 = vpack.c.bf16 %v6759_v12, %v6759_v12  ;;  %v452_v13 = vpack.c.bf16 %v6711_v0, %v6711_v0 }
  0xfe   : > { %v5984_v25 = vpop.eup %5983  ;;  %v453_v14 = vpack.c.bf16 %v6717_v15, %v6717_v15  ;;  %5991 = vpow2.f32 %v377_v10  ;;  %v529_v50 = vpack.c.b16 %v523_v33, %v522_v28  ;;  %v454_v28 = vpack.c.bf16 %v437_v6, %v437_v6 }
  0xff   : > { %v393_v16 = vadd.f32 %v6751_v7, %v392_v9  ;;  %v5986_v30 = vpop.eup %5985  ;;  %v520_v29 = vunpack.c.l.b16 %v460_v34  ;;  %v521_v59 = vunpack.c.l.b16 %v461_v48  ;;  %v500_v62 = vunpack.c.l.b16 %v452_v13 }
 0x100   : > { %v5988_v56 = vpop.eup %5987  ;;  %v501_v1 = vunpack.c.l.b16 %v453_v14  ;;  %v455_v33 = vpack.c.bf16 %v439_v2, %v439_v2 }
 0x101   : > { %v394_v53 = vadd.f32 %v5984_v25, %v393_v16  ;;  %554 = vmatpush.bf16.msra.mxu3 %v530_v18  ;;  %v528_v0 = vpack.c.b16 %v521_v59, %v520_v29 }
 0x102   : > { %v5990_v32 = vpop.eup %5989  ;;  %v6770_v5 = vpack.c.b16 %v501_v1, %v500_v62  ;;  %v503_v13 = vunpack.c.l.b16 %v455_v33 }
 0x103   : > { %v395_v55 = vadd.f32 %v5986_v30, %v394_v53  ;;  %v502_v53 = vunpack.c.l.b16 %v454_v28 }
 0x104   : > { %v5992_v26 = vpop.eup %5991  ;;  %v442_v16 = vpop.f32.mrf.mxu2 }
 0x105   : > { %v396_v60 = vadd.f32 %v5988_v56, %v395_v55  ;;  %555 = vmatpush.bf16.msra.mxu3 %v529_v50 }
 0x107   : > { %v397_v17 = vadd.f32 %v5990_v32, %v396_v60  ;;  %v456_v60 = vpack.c.bf16 %v442_v16, %v442_v16 }
 0x109   : > { %v398_v4 = vadd.f32 %v5992_v26, %v397_v17  ;;  %556 = vmatpush.bf16.msra.mxu3 %v528_v0 }
 0x10b   : > { %v399_v15 = vrot.slane %v398_v4, 4 }
 0x10c   : > { %5695 = vmatmul.msk.bf16.vlgmr.msra.gmra.mxu3 %vm536_vm2, %v6770_v5  ;;  %v444_v14 = vpop.f32.mrf.mxu2 }
 0x10d   : > { %763 = vmatpush.bf16.xpose.msrb.mxu3 %v6588_v19  ;;  %v400_v9 = vadd.f32 %v399_v15, %v398_v4  ;;  %v509_v19 = vpack.c.b16 %v503_v13, %v502_v53  ;;  %v457_v62 = vpack.c.bf16 %v444_v14, %v444_v14 }
 0x10f   : > { %v401_v10 = vrot.slane %v400_v9, 2 }
 0x111   : > { %v402_v18 = vadd.f32 %v401_v10, %v400_v9  ;;  %v504_v9 = vunpack.c.l.b16 %v456_v60  ;;  %v505_v10 = vunpack.c.l.b16 %v457_v62 }
 0x113   : > { %v403_v34 = vrot.slane %v402_v18, 1  ;;  %v510_v33 = vpack.c.b16 %v505_v10, %v504_v9 }
 0x114   : > { %v447_v4 = vpop.f32.mrf.mxu2 }
 0x115   : > { %976 = vmatpush.bf16.msra.mxu3 %v6617_v31  ;;  %v404_v48 = vadd.f32 %v403_v34, %v402_v18 }
 0x117   : > { %5993 = vrcp.f32 %v404_v48 }
 0x119   : > { %977 = vmatpush.bf16.msra.mxu3 %v6601_v24 }
 0x11c   : > { %5696 = vmatmul.msk.bf16.gmra.mxu3 %vm536_vm2, %v509_v19  ;;  %v449_v13 = vpop.f32.mrf.mxu2 }
 0x11d   : > { %978 = vmatpush.bf16.msra.mxu3 %v6594_v22  ;;  %v5994_v55 = vpop.eup %5993 }
 0x11e   : > { %v6780_v31 = vmul.f32 %v5994_v55, %v5992_v26  ;;  %v6782_v6 = vmul.f32 %v5994_v55, %v5990_v32  ;;  %v6784_v50 = vmul.f32 %v5994_v55, %v5986_v30  ;;  %v6786_v24 = vmul.f32 %v5994_v55, %v5988_v56 }
 0x11f   : > { %v6789_v29 = vmul.f32 %v5994_v55, %v6751_v7  ;;  %v6795_v59 = vmul.f32 %v5994_v55, %v5984_v25  ;;  %v6804_v2 = vmul.f32 %v5994_v55, %v6743_v63  ;;  %v6807_v17 = vmul.f32 %v5994_v55, %v6745_v3 }
 0x120   : > { %v474_v22 = vpack.c.bf16 %v6782_v6, %v6782_v6  ;;  %v472_v32 = vpack.c.bf16 %v6784_v50, %v6784_v50  ;;  %v473_v30 = vpack.c.bf16 %v6786_v24, %v6786_v24  ;;  %v458_v55 = vpack.c.bf16 %v447_v4, %v447_v4 }
 0x121   : > { %979 = vmatpush.bf16.msra.mxu3 %v6592_v21  ;;  %v475_v21 = vpack.c.bf16 %v6780_v31, %v6780_v31  ;;  %v470_v7 = vpack.c.bf16 %v6789_v29, %v6789_v29  ;;  %v471_v15 = vpack.c.bf16 %v6795_v59, %v6795_v59  ;;  %v468_v63 = vpack.c.bf16 %v6804_v2, %v6804_v2 }
 0x122   : > { %v592_v56 = vunpack.c.l.b16 %v474_v22  ;;  %v590_v26 = vunpack.c.l.b16 %v472_v32  ;;  %v591_v0 = vunpack.c.l.b16 %v473_v30  ;;  %v469_v3 = vpack.c.bf16 %v6807_v17, %v6807_v17 }
 0x123   : > { %v593_v1 = vunpack.c.l.b16 %v475_v21  ;;  %v588_v16 = vunpack.c.l.b16 %v470_v7  ;;  %v589_v28 = vunpack.c.l.b16 %v471_v15  ;;  %v586_v48 = vunpack.c.l.b16 %v468_v63 }
 0x124   : > { %v596_v18 = vpack.c.b16 %v591_v0, %v590_v26  ;;  %v587_v53 = vunpack.c.l.b16 %v469_v3  ;;  %v459_v22 = vpack.c.bf16 %v449_v13, %v449_v13  ;;  %v506_v21 = vunpack.c.l.b16 %v458_v55 }
 0x125   : > { %v597_v25 = vpack.c.b16 %v593_v1, %v592_v56  ;;  %v595_v34 = vpack.c.b16 %v589_v28, %v588_v16  ;;  %v477_v26 = vmul.f32 %v6759_v12, %v6665_v44  ;;  %v478_v12 = vmul.f32 %v6734_v58, %v6649_v36 }
 0x126   : > { %v594_v14 = vpack.c.b16 %v587_v53, %v586_v48  ;;  %v507_v60 = vunpack.c.l.b16 %v459_v22  ;;  %v479_v3 = vmul.f32 %v6736_v45, %v6653_v38 }
 0x127   : > { %606 = vmatpush.bf16.msrb.mxu0 %v597_v25  ;;  %v476_v25 = vmul.f32 %v6756_v11, %v6655_v39 }
 0x128   : > { %v511_v62 = vpack.c.b16 %v507_v60, %v506_v21 }
 0x12b   : > { %607 = vmatpush.bf16.msrb.mxu0 %v596_v18 }
 0x12c   : > { %5697 = vmatmul.msk.bf16.gmra.mxu3 %vm536_vm2, %v510_v33 }
 0x12f   : > { %608 = vmatpush.bf16.msrb.mxu0 %v595_v34 }
 0x133   : > { %609 = vmatpush.bf16.msrb.mxu0 %v594_v14 }
 0x136   : > { %5699 = vmatmul.msk.bf16.vlgmr.msrb.gmra.mxu0 %vm536_vm2, %v6770_v5 }
 0x13c   : > { %5698 = vmatmul.msk.bf16.gmra.mxu3 %vm536_vm2, %v511_v62 }
 0x146   : > { %5700 = vmatmul.msk.bf16.gmra.mxu0 %vm536_vm2, %v509_v19 }
 0x156   : > { %5701 = vmatmul.msk.bf16.gmra.mxu0 %vm536_vm2, %v510_v33 }
 0x166   : > { %5702 = vmatmul.msk.bf16.gmra.mxu0 %vm536_vm2, %v511_v62 }
 0x18f   : > { %v558_v32 = vpop.f32.mrf.mxu3 }
 0x190   : > { %v559_v30 = vadd.f32 1e-06, %v558_v32 }
 0x192   : > { %5995 = vrcp.f32 %v559_v30  ;;  %v480_v30 = vmul.f32 %v6725_v47, %v6651_v37 }
 0x197   : > { %v560_v56 = vpop.f32.mrf.mxu3 }
 0x198   : > { %v561_v1 = vadd.f32 1e-06, %v560_v56  ;;  %v5996_v7 = vpop.eup %5995 }
 0x199   : > { %v6824_v5 = vmul.f32 %v5996_v7, %v476_v25  ;;  %v481_v25 = vmul.f32 %v6728_v54, %v6657_v40 }
 0x19a   : > { %5997 = vrcp.f32 %v561_v1  ;;  %v484_v1 = vmul.f32 %v6804_v2, %v6659_v41 }
 0x19b   : > { %v663_v9 = vpack.c.bf16 %v6824_v5, %v6824_v5 }
 0x19d   : > { %v687_v16 = vunpack.c.l.b16 %v663_v9  ;;  %v485_v9 = vmul.f32 %v6807_v17, %v6663_v43 }
 0x19f   : > { %v563_v19 = vpop.f32.mrf.mxu3 }
 0x1a0   : > { %v5998_v0 = vpop.eup %5997  ;;  %v564_v4 = vadd.f32 1e-06, %v563_v19 }
 0x1a1   : > { %v6828_v15 = vmul.f32 %v5998_v0, %v477_v26 }
 0x1a2   : > { %5999 = vrcp.f32 %v564_v4 }
 0x1a3   : > { %v664_v10 = vpack.c.bf16 %v6828_v15, %v6828_v15 }
 0x1a5   : > { %v688_v18 = vunpack.c.l.b16 %v664_v10 }
 0x1a7   : > { %v565_v39 = vpop.f32.mrf.mxu3  ;;  %v6834_v11 = vpack.c.b16 %v688_v18, %v687_v16 }
 0x1a8   : > { %v566_v28 = vadd.f32 1e-06, %v565_v39  ;;  %v6000_v44 = vpop.eup %5999 }
 0x1a9   : > { %711 = vmatmul.bf16.vlgmr.msra.gmra.mxu1 %v6834_v11  ;;  %v6839_v63 = vmul.f32 %v6000_v44, %v478_v12 }
 0x1aa   : > { %6001 = vrcp.f32 %v566_v28 }
 0x1ab   : > { %v665_v14 = vpack.c.bf16 %v6839_v63, %v6839_v63 }
 0x1ad   : > { %v689_v36 = vunpack.c.l.b16 %v665_v14  ;;  %v482_v14 = vmul.f32 %v6721_v35, %v6661_v42 }
 0x1af   : > { %v568_v33 = vpop.f32.mrf.mxu3 }
 0x1b0   : > { %v6002_v34 = vpop.eup %6001  ;;  %v569_v48 = vadd.f32 1e-06, %v568_v33 }
 0x1b1   : > { %v6843_v53 = vmul.f32 %v6002_v34, %v479_v3 }
 0x1b2   : > { %6003 = vrcp.f32 %v569_v48 }
 0x1b3   : > { %v611_v13 = vpop.f32.mrf.mxu0  ;;  %v666_v22 = vpack.c.bf16 %v6843_v53, %v6843_v53 }
 0x1b4   : > { %v612_v55 = vadd.f32 1e-06, %v611_v13 }
 0x1b5   : > { %v690_v58 = vunpack.c.l.b16 %v666_v22  ;;  %v486_v22 = vmul.f32 %v6789_v29, %v6677_v52 }
 0x1b6   : > { %6005 = vrcp.f32 %v612_v55 }
 0x1b7   : > { %v570_v21 = vpop.f32.mrf.mxu3  ;;  %v6849_v60 = vpack.c.b16 %v690_v58, %v689_v36  ;;  %v483_v58 = vmul.f32 %v6723_v46, %v6673_v49 }
 0x1b8   : > { %v571_v38 = vadd.f32 1e-06, %v570_v21  ;;  %v6004_v62 = vpop.eup %6003 }
 0x1b9   : > { %716 = vmatmul.bf16.gmra.mxu1 %v6849_v60  ;;  %v6856_v7 = vmul.f32 %v6004_v62, %v480_v30 }
 0x1ba   : > { %6007 = vrcp.f32 %v571_v38 }
 0x1bb   : > { %v613_v45 = vpop.f32.mrf.mxu0  ;;  %v667_v47 = vpack.c.bf16 %v6856_v7, %v6856_v7 }
 0x1bc   : > { %v614_v32 = vadd.f32 1e-06, %v613_v45  ;;  %v6006_v56 = vpop.eup %6005  ;;  %v487_v45 = vmul.f32 %v6795_v59, %v6679_v57 }
 0x1bd   : > { %v6860_v26 = vmul.f32 %v6006_v56, %v484_v1  ;;  %v691_v18 = vunpack.c.l.b16 %v667_v47 }
 0x1be   : > { %6009 = vrcp.f32 %v614_v32 }
 0x1bf   : > { %v573_v19 = vpop.f32.mrf.mxu3  ;;  %v671_v54 = vpack.c.bf16 %v6860_v26, %v6860_v26 }
 0x1c0   : > { %v6008_v0 = vpop.eup %6007  ;;  %v574_v4 = vadd.f32 1e-06, %v573_v19 }
 0x1c1   : > { %v6864_v10 = vmul.f32 %v6008_v0, %v481_v25  ;;  %v740_v44 = vunpack.c.l.b16 %v671_v54 }
 0x1c2   : > { %6011 = vrcp.f32 %v574_v4 }
 0x1c3   : > { %v616_v37 = vpop.f32.mrf.mxu0  ;;  %v668_v40 = vpack.c.bf16 %v6864_v10, %v6864_v10 }
 0x1c4   : > { %v6010_v41 = vpop.eup %6009  ;;  %v617_v2 = vadd.f32 1e-06, %v616_v37  ;;  %v488_v37 = vmul.f32 %v6784_v50, %v6681_v61 }
 0x1c5   : > { %v6868_v16 = vmul.f32 %v6010_v41, %v485_v9  ;;  %v692_v39 = vunpack.c.l.b16 %v668_v40  ;;  %v489_v41 = vmul.f32 %v6786_v24, %v6689_v8 }
 0x1c6   : > { %6013 = vrcp.f32 %v617_v2 }
 0x1c7   : > { %v672_v43 = vpack.c.bf16 %v6868_v16, %v6868_v16  ;;  %v575_v17 = vpop.f32.mrf.mxu3  ;;  %v6876_v28 = vpack.c.b16 %v692_v39, %v691_v18 }
 0x1c8   : > { %v576_v3 = vadd.f32 1e-06, %v575_v17  ;;  %v6012_v48 = vpop.eup %6011 }
 0x1c9   : > { %v741_v12 = vunpack.c.l.b16 %v672_v43  ;;  %721 = vmatmul.bf16.gmra.mxu1 %v6876_v28  ;;  %v6886_v36 = vmul.f32 %v6012_v48, %v482_v14 }
 0x1ca   : > { %6015 = vrcp.f32 %v576_v3 }
 0x1cb   : > { %v618_v33 = vpop.f32.mrf.mxu0  ;;  %v6879_v34 = vpack.c.b16 %v741_v12, %v740_v44  ;;  %v669_v35 = vpack.c.bf16 %v6886_v36, %v6886_v36  ;;  %v490_v12 = vmul.f32 %v6782_v6, %v6699_v27 }
 0x1cc   : > { %v619_v13 = vadd.f32 1e-06, %v618_v33  ;;  %v6014_v55 = vpop.eup %6013  ;;  %v491_v33 = vmul.f32 %v6780_v31, %v6707_v51 }
 0x1cd   : > { %764 = vmatmul.bf16.vlgmr.msrb.gmra.mxu3 %v6879_v34  ;;  %v6890_v21 = vmul.f32 %v6014_v55, %v486_v22  ;;  %v693_v46 = vunpack.c.l.b16 %v669_v35 }
 0x1ce   : > { %6017 = vrcp.f32 %v619_v13 }
 0x1cf   : > { %v673_v49 = vpack.c.bf16 %v6890_v21, %v6890_v21 }
 0x1d0   : > { %v6016_v38 = vpop.eup %6015 }
 0x1d1   : > { %v6894_v62 = vmul.f32 %v6016_v38, %v483_v58  ;;  %v742_v1 = vunpack.c.l.b16 %v673_v49 }
 0x1d3   : > { %v621_v42 = vpop.f32.mrf.mxu0  ;;  %v670_v29 = vpack.c.bf16 %v6894_v62, %v6894_v62 }
 0x1d4   : > { %v6018_v32 = vpop.eup %6017  ;;  %v622_v30 = vadd.f32 1e-06, %v621_v42 }
 0x1d5   : > { %v6898_v52 = vmul.f32 %v6018_v32, %v487_v45  ;;  %v694_v56 = vunpack.c.l.b16 %v670_v29 }
 0x1d6   : > { %6019 = vrcp.f32 %v622_v30 }
 0x1d7   : > { %v674_v57 = vpack.c.bf16 %v6898_v52, %v6898_v52  ;;  %v698_v59 = vpack.c.b16 %v694_v56, %v693_v46 }
 0x1d9   : > { %v743_v25 = vunpack.c.l.b16 %v674_v57  ;;  %726 = vmatmul.bf16.gmra.mxu1 %v698_v59  ;;  %789 = vmatpush.bf16.xpose.msra.mxu2 %v698_v59 }
 0x1db   : > { %v623_v19 = vpop.f32.mrf.mxu0  ;;  %v749_v0 = vpack.c.b16 %v743_v25, %v742_v1 }
 0x1dc   : > { %v624_v4 = vadd.f32 1e-06, %v623_v19  ;;  %v6020_v9 = vpop.eup %6019 }
 0x1dd   : > { %769 = vmatmul.bf16.gmra.mxu3 %v749_v0  ;;  %v6908_v47 = vmul.f32 %v6020_v9, %v488_v37 }
 0x1de   : > { %6021 = vrcp.f32 %v624_v4 }
 0x1df   : > { %v675_v39 = vpack.c.bf16 %v6908_v47, %v6908_v47 }
 0x1e1   : > { %790 = vmatpush.bf16.xpose.msra.mxu2 %v6876_v28  ;;  %v744_v61 = vunpack.c.l.b16 %v675_v39 }
 0x1e3   : > { %v626_v2 = vpop.f32.mrf.mxu0 }
 0x1e4   : > { %v6022_v40 = vpop.eup %6021  ;;  %v627_v54 = vadd.f32 1e-06, %v626_v2 }
 0x1e5   : > { %v6913_v18 = vmul.f32 %v6022_v40, %v489_v41 }
 0x1e6   : > { %6023 = vrcp.f32 %v627_v54 }
 0x1e7   : > { %v676_v43 = vpack.c.bf16 %v6913_v18, %v6913_v18 }
 0x1e9   : > { %v745_v50 = vunpack.c.l.b16 %v676_v43  ;;  %791 = vmatpush.bf16.xpose.msra.mxu2 %v6849_v60 }
 0x1eb   : > { %v628_v17 = vpop.f32.mrf.mxu0  ;;  %v750_v8 = vpack.c.b16 %v745_v50, %v744_v61 }
 0x1ec   : > { %v629_v24 = vadd.f32 1e-06, %v628_v17  ;;  %v6024_v44 = vpop.eup %6023 }
 0x1ed   : > { %774 = vmatmul.bf16.gmra.mxu3 %v750_v8  ;;  %v6922_v3 = vmul.f32 %v6024_v44, %v490_v12 }
 0x1ee   : > { %6025 = vrcp.f32 %v629_v24 }
 0x1ef   : > { %v677_v14 = vpack.c.bf16 %v6922_v3, %v6922_v3 }
 0x1f1   : > { %792 = vmatpush.bf16.xpose.msra.mxu2 %v6834_v11  ;;  %v746_v22 = vunpack.c.l.b16 %v677_v14 }
 0x1f4   : > { %v6026_v48 = vpop.eup %6025 }
 0x1f5   : > { %v6928_v13 = vmul.f32 %v6026_v48, %v491_v33 }
 0x1f7   : > { %v678_v55 = vpack.c.bf16 %v6928_v13, %v6928_v13 }
 0x1f8   : > { %793 = vmatmul.bf16.vlgmr.msra.gmra.mxu2 %v6834_v11 }
 0x1f9   : > { %1088 = vmatpush.bf16.msrb.mxu2 %v6590_v20  ;;  %v747_v27 = vunpack.c.l.b16 %v678_v55 }
 0x1fb   : > { %v751_v6 = vpack.c.b16 %v747_v27, %v746_v22 }
 0x1fd   : > { %1297 = vmatpush.bf16.msra.mxu2 %v698_v59  ;;  %779 = vmatmul.bf16.gmra.mxu3 %v751_v6 }
 0x1fe   : > { %818 = vmatpush.bf16.xpose.msra.mxu0 %v751_v6 }
 0x201   : > { %1298 = vmatpush.bf16.msra.mxu2 %v6876_v28 }
 0x205   : > { %1299 = vmatpush.bf16.msra.mxu2 %v6849_v60 }
 0x206   : > { %819 = vmatpush.bf16.xpose.msra.mxu0 %v750_v8 }
 0x208   : > { %798 = vmatmul.bf16.gmra.mxu2 %v6849_v60 }
 0x209   : > { %1300 = vmatpush.bf16.msra.mxu2 %v6834_v11 }
 0x20e   : > { %820 = vmatpush.bf16.xpose.msra.mxu0 %v749_v0 }
 0x216   : > { %821 = vmatpush.bf16.xpose.msra.mxu0 %v6879_v34 }
 0x218   : > { %803 = vmatmul.bf16.gmra.mxu2 %v6876_v28 }
 0x21d   : > { %822 = vmatmul.bf16.vlgmr.msra.gmra.mxu0 %v6879_v34 }
 0x21e   : > { %1149 = vmatpush.bf16.msrb.mxu0 %v6597_v23 }
 0x222   : > { %1358 = vmatpush.bf16.msra.mxu0 %v751_v6 }
 0x226   : > { %1359 = vmatpush.bf16.msra.mxu0 %v750_v8  ;;  %v712_v22 = vpop.f32.mrf.mxu1 }
 0x228   : > { %808 = vmatmul.bf16.gmra.mxu2 %v698_v59 }
 0x22a   : > { %1360 = vmatpush.bf16.msra.mxu0 %v749_v0 }
 0x22d   : > { %827 = vmatmul.bf16.gmra.mxu0 %v749_v0 }
 0x22e   : > { %1361 = vmatpush.bf16.msra.mxu0 %v6879_v34 }
 0x23d   : > { %832 = vmatmul.bf16.gmra.mxu0 %v750_v8 }
 0x24d   : > { %837 = vmatmul.bf16.gmra.mxu0 %v751_v6 }
 0x27b   : > { %v794_v51 = vpop.f32.mrf.mxu2 }
 0x27c   : > { %v843_v31 = vpack.c.bf16 %v794_v51, %v794_v51 }
 0x27e   : > { %v883_v58 = vunpack.c.l.b16 %v843_v31 }
 0x283   : > { %v796_v11 = vpop.f32.mrf.mxu2 }
 0x284   : > { %v844_v60 = vpack.c.bf16 %v796_v11, %v796_v11 }
 0x286   : > { %v884_v38 = vunpack.c.l.b16 %v844_v60  ;;  %v714_v60 = vpop.f32.mrf.mxu1 }
 0x288   : > { %v891_v45 = vpack.c.b16 %v884_v38, %v883_v58 }
 0x28a   : > { %5703 = vmatmul.msk.bf16.vlgmr.msrb.gmra.mxu1 %vm536_vm2, %v891_v45 }
 0x28b   : > { %v799_v28 = vpop.f32.mrf.mxu2 }
 0x28c   : > { %v845_v42 = vpack.c.bf16 %v799_v28, %v799_v28 }
 0x28e   : > { %v885_v30 = vunpack.c.l.b16 %v845_v42  ;;  %v717_v45 = vpop.f32.mrf.mxu1 }
 0x293   : > { %v801_v35 = vpop.f32.mrf.mxu2 }
 0x294   : > { %v846_v32 = vpack.c.bf16 %v801_v35, %v801_v35 }
 0x296   : > { %v886_v29 = vunpack.c.l.b16 %v846_v32 }
 0x298   : > { %v892_v49 = vpack.c.b16 %v886_v29, %v885_v30 }
 0x29a   : > { %v823_v34 = vpop.f32.mrf.mxu0  ;;  %5704 = vmatmul.msk.bf16.gmra.mxu1 %vm536_vm2, %v892_v49  ;;  %v6952_v49 = vpop.f32.mrf.mxu3 }
 0x29b   : > { %v804_v46 = vpop.f32.mrf.mxu2  ;;  %v851_v56 = vpack.c.bf16 %v823_v34, %v823_v34  ;;  %v719_v34 = vpop.f32.mrf.mxu1 }
 0x29c   : > { %v847_v25 = vpack.c.bf16 %v804_v46, %v804_v46 }
 0x29d   : > { %v948_v1 = vunpack.c.l.b16 %v851_v56 }
 0x29e   : > { %v887_v37 = vunpack.c.l.b16 %v847_v25 }
 0x2a2   : > { %v825_v57 = vpop.f32.mrf.mxu0  ;;  %v6956_v56 = vpop.f32.mrf.mxu3 }
 0x2a3   : > { %v852_v59 = vpack.c.bf16 %v825_v57, %v825_v57  ;;  %v806_v0 = vpop.f32.mrf.mxu2  ;;  %v6954_v46 = vpop.f32.mrf.mxu1 }
 0x2a4   : > { %v848_v9 = vpack.c.bf16 %v806_v0, %v806_v0 }
 0x2a5   : > { %v949_v19 = vunpack.c.l.b16 %v852_v59 }
 0x2a6   : > { %v888_v41 = vunpack.c.l.b16 %v848_v9 }
 0x2a7   : > { %v956_v4 = vpack.c.b16 %v949_v19, %v948_v1 }
 0x2a8   : > { %v893_v40 = vpack.c.b16 %v888_v41, %v887_v37 }
 0x2a9   : > { %5707 = vmatmul.msk.bf16.vlgmr.msra.gmra.mxu3 %vm536_vm2, %v956_v4 }
 0x2aa   : > { %v828_v2 = vpop.f32.mrf.mxu0  ;;  %5705 = vmatmul.msk.bf16.gmra.mxu1 %vm536_vm2, %v893_v40  ;;  %v6960_v59 = vpop.f32.mrf.mxu3 }
 0x2ab   : > { %v809_v54 = vpop.f32.mrf.mxu2  ;;  %v853_v39 = vpack.c.bf16 %v828_v2, %v828_v2  ;;  %v6958_v57 = vpop.f32.mrf.mxu1 }
 0x2ac   : > { %v849_v17 = vpack.c.bf16 %v809_v54, %v809_v54  ;;  %v6411_v54 = vld [vmem:[%s9093_s1] sm:$0xff] }
 0x2ad   : > { %v950_v50 = vunpack.c.l.b16 %v853_v39  ;;  %v859_v39 = vmul.f32 %v6411_v54, %v712_v22 }
 0x2ae   : > { %v889_v33 = vunpack.c.l.b16 %v849_v17 }
 0x2b2   : > { %v830_v43 = vpop.f32.mrf.mxu0  ;;  %v6964_v25 = vpop.f32.mrf.mxu3 }
 0x2b3   : > { %v854_v61 = vpack.c.bf16 %v830_v43, %v830_v43  ;;  %v811_v24 = vpop.f32.mrf.mxu2  ;;  %v6962_v1 = vpop.f32.mrf.mxu1 }
 0x2b4   : > { %v850_v44 = vpack.c.bf16 %v811_v24, %v811_v24 }
 0x2b5   : > { %v951_v8 = vunpack.c.l.b16 %v854_v61  ;;  %v6412_v61 = vld [vmem:[%s9093_s1 + $0x8] sm:$0xff] }
 0x2b6   : > { %v890_v48 = vunpack.c.l.b16 %v850_v44 }
 0x2b7   : > { %v957_v12 = vpack.c.b16 %v951_v8, %v950_v50  ;;  %v860_v50 = vmul.f32 %v6412_v61, %v714_v60 }
 0x2b8   : > { %v894_v55 = vpack.c.b16 %v890_v48, %v889_v33 }
 0x2b9   : > { %5708 = vmatmul.msk.bf16.gmra.mxu3 %vm536_vm2, %v957_v12 }
 0x2ba   : > { %v833_v14 = vpop.f32.mrf.mxu0  ;;  %5706 = vmatmul.msk.bf16.gmra.mxu1 %vm536_vm2, %v894_v55  ;;  %v6968_v0 = vpop.f32.mrf.mxu3 }
 0x2bb   : > { %v855_v27 = vpack.c.bf16 %v833_v14, %v833_v14  ;;  %v6966_v19 = vpop.f32.mrf.mxu1 }
 0x2bd   : > { %v952_v31 = vunpack.c.l.b16 %v855_v27 }
 0x2c2   : > { %v835_v6 = vpop.f32.mrf.mxu0  ;;  %v6970_v37 = vpop.f32.mrf.mxu3 }
 0x2c3   : > { %v856_v51 = vpack.c.bf16 %v835_v6, %v835_v6 }
 0x2c5   : > { %v953_v11 = vunpack.c.l.b16 %v856_v51 }
 0x2c7   : > { %v958_v58 = vpack.c.b16 %v953_v11, %v952_v31  ;;  %v6997_v11 = vld [vmem:[%s9093_s1 + $0x10] sm:$0xff] }
 0x2c8   : > { %v861_v60 = vmul.f32 %v6997_v11, %v717_v45 }
 0x2c9   : > { %5709 = vmatmul.msk.bf16.gmra.mxu3 %vm536_vm2, %v958_v58 }
 0x2ca   : > { %v838_v38 = vpop.f32.mrf.mxu0  ;;  %v6980_v17 = vpop.f32.mrf.mxu3 }
 0x2cb   : > { %v857_v28 = vpack.c.bf16 %v838_v38, %v838_v38  ;;  %v7005_v38 = vld [vmem:[%s9093_s1 + $0x18] sm:$0xff] }
 0x2cd   : > { %v954_v32 = vunpack.c.l.b16 %v857_v28  ;;  %v862_v28 = vmul.f32 %v7005_v38, %v719_v34 }
 0x2d2   : > { %v840_v42 = vpop.f32.mrf.mxu0  ;;  %v6990_v51 = vpop.f32.mrf.mxu3 }
 0x2d3   : > { %v858_v35 = vpack.c.bf16 %v840_v42, %v840_v42 }
 0x2d5   : > { %v955_v30 = vunpack.c.l.b16 %v858_v35 }
 0x2d7   : > { %v959_v29 = vpack.c.b16 %v955_v30, %v954_v32 }
 0x2d9   : > { %5710 = vmatmul.msk.bf16.gmra.mxu3 %vm536_vm2, %v959_v29 }
 0x307   : > { %v920_v4 = vpop.f32.mrf.mxu1 }
 0x308   : > { %v921_v9 = vadd.f32 1e-06, %v920_v4 }
 0x30a   : > { %6027 = vrcp.f32 %v921_v9 }
 0x30f   : > { %v922_v41 = vpop.f32.mrf.mxu1 }
 0x310   : > { %v923_v2 = vadd.f32 1e-06, %v922_v41  ;;  %v6028_v40 = vpop.eup %6027 }
 0x311   : > { %v6975_v43 = vmul.f32 %v6028_v40, %v859_v39 }
 0x312   : > { %6029 = vrcp.f32 %v923_v2 }
 0x313   : > { %v1033_v12 = vpack.c.bf16 %v6975_v43, %v6975_v43 }
 0x315   : > { %v1057_v14 = vunpack.c.l.b16 %v1033_v12 }
 0x317   : > { %v925_v8 = vpop.f32.mrf.mxu1 }
 0x318   : > { %v6030_v24 = vpop.eup %6029  ;;  %v926_v44 = vadd.f32 1e-06, %v925_v8 }
 0x319   : > { %v6984_v33 = vmul.f32 %v6030_v24, %v860_v50 }
 0x31a   : > { %6031 = vrcp.f32 %v926_v44  ;;  %v7021_v44 = vld [vmem:[%s9093_s1 + $0x20] sm:$0xff] }
 0x31b   : > { %v1034_v48 = vpack.c.bf16 %v6984_v33, %v6984_v33  ;;  %v863_v12 = vmul.f32 %v7021_v44, %v6954_v46  ;;  %v868_v46 = vmul.f32 %v6412_v61, %v6956_v56 }
 0x31d   : > { %v1058_v55 = vunpack.c.l.b16 %v1034_v48 }
 0x31f   : > { %v927_v22 = vpop.f32.mrf.mxu1  ;;  %v6988_v27 = vpack.c.b16 %v1058_v55, %v1057_v14  ;;  %v867_v14 = vmul.f32 %v6411_v54, %v6952_v49 }
 0x320   : > { %v928_v6 = vadd.f32 1e-06, %v927_v22  ;;  %v6032_v31 = vpop.eup %6031  ;;  %v7031_v22 = vld [vmem:[%s9093_s1 + $0x28] sm:$0xff] }
 0x321   : > { %5711 = vmatmul.msk.bf16.vlgmr.msrb.gmra.mxu2 %vm227_vm1, %v6988_v27  ;;  %v7000_v58 = vmul.f32 %v6032_v31, %v861_v60 }
 0x322   : > { %6033 = vrcp.f32 %v928_v6  ;;  %v864_v6 = vmul.f32 %v7031_v22, %v6958_v57 }
 0x323   : > { %v1035_v4 = vpack.c.bf16 %v7000_v58, %v7000_v58 }
 0x325   : > { %v1059_v41 = vunpack.c.l.b16 %v1035_v4 }
 0x327   : > { %v930_v42 = vpop.f32.mrf.mxu1 }
 0x328   : > { %v6034_v35 = vpop.eup %6033  ;;  %v931_v32 = vadd.f32 1e-06, %v930_v42 }
 0x329   : > { %v7008_v30 = vmul.f32 %v6034_v35, %v862_v28 }
 0x32a   : > { %6035 = vrcp.f32 %v931_v32 }
 0x32b   : > { %v1036_v45 = vpack.c.bf16 %v7008_v30, %v7008_v30 }
 0x32c   : > { %v981_v29 = vpop.f32.mrf.mxu3 }
 0x32d   : > { %v982_v9 = vadd.f32 1e-06, %v981_v29  ;;  %v1060_v2 = vunpack.c.l.b16 %v1036_v45 }
 0x32f   : > { %6037 = vrcp.f32 %v982_v9  ;;  %v932_v40 = vpop.f32.mrf.mxu1  ;;  %v7014_v39 = vpack.c.b16 %v1060_v2, %v1059_v41 }
 0x330   : > { %v933_v34 = vadd.f32 1e-06, %v932_v40  ;;  %v6036_v8 = vpop.eup %6035 }
 0x331   : > { %5712 = vmatmul.msk.bf16.gmra.mxu2 %vm227_vm1, %v7014_v39  ;;  %v7026_v55 = vmul.f32 %v6036_v8, %v863_v12 }
 0x332   : > { %6039 = vrcp.f32 %v933_v34 }
 0x333   : > { %v1037_v54 = vpack.c.bf16 %v7026_v55, %v7026_v55 }
 0x334   : > { %v983_v50 = vpop.f32.mrf.mxu3 }
 0x335   : > { %v984_v24 = vadd.f32 1e-06, %v983_v50  ;;  %v6038_v48 = vpop.eup %6037  ;;  %v1061_v61 = vunpack.c.l.b16 %v1037_v54 }
 0x336   : > { %v7035_v31 = vmul.f32 %v6038_v48, %v867_v14  ;;  %v6417_v14 = vld [vmem:[%s9093_s1 + $0x30] sm:$0xff] }
 0x337   : > { %6041 = vrcp.f32 %v984_v24  ;;  %v935_v60 = vpop.f32.mrf.mxu1 }
 0x338   : > { %v6040_v28 = vpop.eup %6039  ;;  %v936_v42 = vadd.f32 1e-06, %v935_v60  ;;  %v1041_v4 = vpack.c.bf16 %v7035_v31, %v7035_v31 }
 0x339   : > { %v7038_v35 = vmul.f32 %v6040_v28, %v864_v6  ;;  %v865_v6 = vmul.f32 %v6417_v14, %v6962_v1  ;;  %v869_v28 = vmul.f32 %v6997_v11, %v6960_v59  ;;  %v870_v1 = vmul.f32 %v7005_v38, %v6964_v25 }
 0x33a   : > { %6043 = vrcp.f32 %v936_v42  ;;  %v1118_v41 = vunpack.c.l.b16 %v1041_v4 }
 0x33b   : > { %v1038_v57 = vpack.c.bf16 %v7038_v35, %v7038_v35 }
 0x33c   : > { %v986_v49 = vpop.f32.mrf.mxu3 }
 0x33d   : > { %v6042_v32 = vpop.eup %6041  ;;  %v987_v29 = vadd.f32 1e-06, %v986_v49  ;;  %v1062_v45 = vunpack.c.l.b16 %v1038_v57 }
 0x33e   : > { %v7044_v9 = vmul.f32 %v6042_v32, %v868_v46  ;;  %v6418_v46 = vld [vmem:[%s9093_s1 + $0x38] sm:$0xff] }
 0x33f   : > { %6045 = vrcp.f32 %v987_v29  ;;  %v937_v40 = vpop.f32.mrf.mxu1  ;;  %v7050_v34 = vpack.c.b16 %v1062_v45, %v1061_v61  ;;  %v866_v49 = vmul.f32 %v6418_v46, %v6966_v19 }
 0x340   : > { %v1042_v56 = vpack.c.bf16 %v7044_v9, %v7044_v9  ;;  %v938_v50 = vadd.f32 1e-06, %v937_v40  ;;  %v6044_v12 = vpop.eup %6043 }
 0x341   : > { %5713 = vmatmul.msk.bf16.gmra.mxu2 %vm227_vm1, %v7050_v34  ;;  %v7064_v42 = vmul.f32 %v6044_v12, %v865_v6 }
 0x342   : > { %v1119_v2 = vunpack.c.l.b16 %v1042_v56  ;;  %6047 = vrcp.f32 %v938_v50 }
 0x343   : > { %v1039_v59 = vpack.c.bf16 %v7064_v42, %v7064_v42 }
 0x344   : > { %v988_v8 = vpop.f32.mrf.mxu3  ;;  %v7054_v24 = vpack.c.b16 %v1119_v2, %v1118_v41 }
 0x345   : > { %v989_v48 = vadd.f32 1e-06, %v988_v8  ;;  %v6046_v60 = vpop.eup %6045  ;;  %v1063_v45 = vunpack.c.l.b16 %v1039_v59 }
 0x346   : > { %5715 = vmatmul.msk.bf16.vlgmr.msrb.gmra.mxu0 %vm227_vm1, %v7054_v24  ;;  %v7070_v54 = vmul.f32 %v6046_v60, %v869_v28  ;;  %v871_v60 = vmul.f32 %v7021_v44, %v6968_v0 }
 0x347   : > { %6049 = vrcp.f32 %v989_v48 }
 0x348   : > { %v6048_v32 = vpop.eup %6047  ;;  %v1043_v19 = vpack.c.bf16 %v7070_v54, %v7070_v54 }
 0x349   : > { %v7074_v29 = vmul.f32 %v6048_v32, %v866_v49  ;;  %v872_v49 = vmul.f32 %v7031_v22, %v6970_v37  ;;  %v1076_v32 = vsel %vm227_vm1, %v7050_v34, 0  ;;  %v1073_v37 = vsel %vm227_vm1, %v7014_v39, 0 }
 0x34a   : > { %v1120_v2 = vunpack.c.l.b16 %v1043_v19 }
 0x34b   : > { %v1040_v61 = vpack.c.bf16 %v7074_v29, %v7074_v29 }
 0x34c   : > { %v991_v4 = vpop.f32.mrf.mxu3 }
 0x34d   : > { %v6050_v11 = vpop.eup %6049  ;;  %v992_v57 = vadd.f32 1e-06, %v991_v4  ;;  %v1064_v41 = vunpack.c.l.b16 %v1040_v61 }
 0x34e   : > { %v7078_v56 = vmul.f32 %v6050_v11, %v870_v1 }
 0x34f   : > { %6051 = vrcp.f32 %v992_v57  ;;  %v7086_v38 = vpack.c.b16 %v1064_v41, %v1063_v45 }
 0x350   : > { %v1044_v25 = vpack.c.bf16 %v7078_v56, %v7078_v56 }
 0x351   : > { %5714 = vmatmul.msk.bf16.gmra.mxu2 %vm227_vm1, %v7086_v38  ;;  %v1079_v50 = vsel %vm227_vm1, %v7086_v38, 0 }
 0x352   : > { %v1121_v40 = vunpack.c.l.b16 %v1044_v25  ;;  %1175 = vmatpush.bf16.xpose.msra.mxu1 %v1079_v50  ;;  %v873_v25 = vmul.f32 %v6417_v14, %v6980_v17  ;;  %v1070_v50 = vsel %vm227_vm1, %v6988_v27, 0 }
 0x354   : > { %v993_v8 = vpop.f32.mrf.mxu3  ;;  %v7092_v12 = vpack.c.b16 %v1121_v40, %v1120_v2  ;;  %v874_v40 = vmul.f32 %v6418_v46, %v6990_v51 }
 0x355   : > { %v994_v48 = vadd.f32 1e-06, %v993_v8  ;;  %v6052_v6 = vpop.eup %6051 }
 0x356   : > { %5716 = vmatmul.msk.bf16.gmra.mxu0 %vm227_vm1, %v7092_v12  ;;  %v7098_v28 = vmul.f32 %v6052_v6, %v871_v60  ;;  %v7122_v6 = vld [vmem:[%s6584_s19] sm:$0xf] }
 0x357   : > { %6053 = vrcp.f32 %v994_v48 }
 0x358   : > { %v1045_v57 = vpack.c.bf16 %v7098_v28, %v7098_v28 }
 0x35a   : > { %1176 = vmatpush.bf16.xpose.msra.mxu1 %v1076_v32  ;;  %v1122_v44 = vunpack.c.l.b16 %v1045_v57 }
 0x35c   : > { %v996_v1 = vpop.f32.mrf.mxu3 }
 0x35d   : > { %v6054_v4 = vpop.eup %6053  ;;  %v997_v59 = vadd.f32 1e-06, %v996_v1  ;;  %v1134_v1 = vsel %vm227_vm1, %v7092_v12, 0 }
 0x35e   : > { %v7104_v11 = vmul.f32 %v6054_v4, %v872_v49  ;;  %v1131_v4 = vsel %vm227_vm1, %v7054_v24, 0 }
 0x35f   : > { %6055 = vrcp.f32 %v997_v59  ;;  %v7145_v59 = vld [vmem:[%s6584_s19 + $0x4] sm:$0xf] }
 0x360   : > { %v1046_v0 = vpack.c.bf16 %v7104_v11, %v7104_v11 }
 0x362   : > { %v1123_v61 = vunpack.c.l.b16 %v1046_v0  ;;  %1177 = vmatpush.bf16.xpose.msra.mxu1 %v1073_v37 }
 0x364   : > { %v998_v22 = vpop.f32.mrf.mxu3  ;;  %v1128_v19 = vpack.c.b16 %v1123_v61, %v1122_v44 }
 0x365   : > { %v999_v45 = vadd.f32 1e-06, %v998_v22  ;;  %v6056_v41 = vpop.eup %6055 }
 0x366   : > { %5717 = vmatmul.msk.bf16.gmra.mxu0 %vm227_vm1, %v1128_v19  ;;  %v7114_v2 = vmul.f32 %v6056_v41, %v873_v25  ;;  %v1137_v32 = vsel %vm227_vm1, %v1128_v19, 0 }
 0x367   : > { %6057 = vrcp.f32 %v999_v45 }
 0x368   : > { %v1047_v60 = vpack.c.bf16 %v7114_v2, %v7114_v2 }
 0x36a   : > { %1178 = vmatpush.bf16.xpose.msra.mxu1 %v1070_v50  ;;  %v1124_v14 = vunpack.c.l.b16 %v1047_v60 }
 0x36d   : > { %v6058_v8 = vpop.eup %6057 }
 0x36e   : > { %v7119_v48 = vmul.f32 %v6058_v8, %v874_v40 }
 0x370   : > { %v1048_v17 = vpack.c.bf16 %v7119_v48, %v7119_v48 }
 0x371   : > { %5719 = vmatmul.msk.bf16.vlgmr.msra.gmra.mxu1 %vm227_vm1, %v6988_v27 }
 0x372   : > { %1462 = vmatpush.bf16.xpose.msrb.mxu1 %v7122_v6  ;;  %v1125_v49 = vunpack.c.l.b16 %v1048_v17 }
 0x374   : > { %v1129_v51 = vpack.c.b16 %v1125_v49, %v1124_v14 }
 0x376   : > { %5718 = vmatmul.msk.bf16.gmra.mxu0 %vm227_vm1, %v1129_v51  ;;  %v1140_v46 = vsel %vm227_vm1, %v1129_v51, 0 }
 0x377   : > { %1204 = vmatpush.bf16.xpose.msrb.mxu3 %v1140_v46 }
 0x37a   : > { %1667 = vmatpush.bf16.msra.mxu1 %v7086_v38 }
 0x37e   : > { %1668 = vmatpush.bf16.msra.mxu1 %v7050_v34 }
 0x37f   : > { %1205 = vmatpush.bf16.xpose.msrb.mxu3 %v1137_v32 }
 0x381   : > { %5720 = vmatmul.msk.bf16.gmra.mxu1 %vm227_vm1, %v7014_v39 }
 0x382   : > { %1669 = vmatpush.bf16.msra.mxu1 %v7014_v39 }
 0x386   : > { %1670 = vmatpush.bf16.msra.mxu1 %v6988_v27 }
 0x387   : > { %1206 = vmatpush.bf16.xpose.msrb.mxu3 %v1134_v1 }
 0x38f   : > { %1207 = vmatpush.bf16.xpose.msrb.mxu3 %v1131_v4 }
 0x391   : > { %5721 = vmatmul.msk.bf16.gmra.mxu1 %vm227_vm1, %v7050_v34 }
 0x396   : > { %5723 = vmatmul.msk.bf16.vlgmr.msrb.gmra.mxu3 %vm227_vm1, %v7054_v24 }
 0x397   : > { %1515 = vmatpush.bf16.xpose.msra.mxu3 %v7145_v59 }
 0x39f   : > { %1732 = vmatpush.bf16.msrb.mxu3 %v1129_v51 }
 0x3a1   : > { %5722 = vmatmul.msk.bf16.gmra.mxu1 %vm227_vm1, %v7086_v38 }
 0x3a3   : > { %1733 = vmatpush.bf16.msrb.mxu3 %v1128_v19 }
 0x3a6   : > { %5724 = vmatmul.msk.bf16.gmra.mxu3 %vm227_vm1, %v7092_v12 }
 0x3a7   : > { %1734 = vmatpush.bf16.msrb.mxu3 %v7092_v12 }
 0x3ab   : > { %1735 = vmatpush.bf16.msrb.mxu3 %v7054_v24 }
 0x3b6   : > { %5725 = vmatmul.msk.bf16.gmra.mxu3 %vm227_vm1, %v1128_v19 }
 0x3c6   : > { %5726 = vmatmul.msk.bf16.gmra.mxu3 %vm227_vm1, %v1129_v51 }
 0x3ee   : > { %v1180_v27 = vpop.f32.mrf.mxu1 }
 0x3ef   : > { %v1229_v39 = vpack.c.bf16 %v1180_v27, %v1180_v27 }
 0x3f1   : > { %v1269_v0 = vunpack.c.l.b16 %v1229_v39 }
 0x3f6   : > { %v1182_v34 = vpop.f32.mrf.mxu1 }
 0x3f7   : > { %v1230_v57 = vpack.c.bf16 %v1182_v34, %v1182_v34 }
 0x3f9   : > { %v1270_v44 = vunpack.c.l.b16 %v1230_v57 }
 0x3fb   : > { %v1277_v61 = vpack.c.b16 %v1270_v44, %v1269_v0 }
 0x3fd   : > { %5727 = vmatmul.msk.bf16.vlgmr.msra.gmra.mxu2 %vm536_vm2, %v1277_v61 }
 0x3fe   : > { %v1185_v24 = vpop.f32.mrf.mxu1 }
 0x3ff   : > { %v1231_v37 = vpack.c.bf16 %v1185_v24, %v1185_v24 }
 0x401   : > { %v1271_v45 = vunpack.c.l.b16 %v1231_v37 }
 0x406   : > { %v1187_v22 = vpop.f32.mrf.mxu1 }
 0x407   : > { %v1232_v38 = vpack.c.bf16 %v1187_v22, %v1187_v22 }
 0x409   : > { %v1272_v41 = vunpack.c.l.b16 %v1232_v38 }
 0x40b   : > { %v1278_v12 = vpack.c.b16 %v1272_v41, %v1271_v45 }
 0x40d   : > { %5728 = vmatmul.msk.bf16.gmra.mxu2 %vm536_vm2, %v1278_v12  ;;  %v1090_v12 = vpop.f32.mrf.mxu2 }
 0x40e   : > { %v1190_v19 = vpop.f32.mrf.mxu1 }
 0x40f   : > { %v1233_v25 = vpack.c.bf16 %v1190_v19, %v1190_v19 }
 0x411   : > { %v1273_v60 = vunpack.c.l.b16 %v1233_v25 }
 0x416   : > { %v1192_v40 = vpop.f32.mrf.mxu1 }
 0x417   : > { %v1234_v8 = vpack.c.bf16 %v1192_v40, %v1192_v40  ;;  %v1092_v40 = vpop.f32.mrf.mxu2 }
 0x419   : > { %v1209_v50 = vpop.f32.mrf.mxu3  ;;  %v1274_v17 = vunpack.c.l.b16 %v1234_v8 }
 0x41a   : > { %v1237_v49 = vpack.c.bf16 %v1209_v50, %v1209_v50 }
 0x41b   : > { %v1279_v14 = vpack.c.b16 %v1274_v17, %v1273_v60 }
 0x41c   : > { %v1330_v1 = vunpack.c.l.b16 %v1237_v49 }
 0x41d   : > { %5729 = vmatmul.msk.bf16.gmra.mxu2 %vm536_vm2, %v1279_v14 }
 0x41e   : > { %v1195_v51 = vpop.f32.mrf.mxu1 }
 0x41f   : > { %v1235_v39 = vpack.c.bf16 %v1195_v51, %v1195_v51  ;;  %v1095_v51 = vpop.f32.mrf.mxu2 }
 0x421   : > { %v1211_v46 = vpop.f32.mrf.mxu3  ;;  %v1275_v44 = vunpack.c.l.b16 %v1235_v39 }
 0x422   : > { %v1238_v32 = vpack.c.bf16 %v1211_v46, %v1211_v46 }
 0x424   : > { %v1331_v4 = vunpack.c.l.b16 %v1238_v32 }
 0x426   : > { %v1338_v27 = vpack.c.b16 %v1331_v4, %v1330_v1  ;;  %v1197_v34 = vpop.f32.mrf.mxu1 }
 0x427   : > { %v1236_v0 = vpack.c.bf16 %v1197_v34, %v1197_v34 }
 0x428   : > { %5731 = vmatmul.msk.bf16.vlgmr.msra.gmra.mxu0 %vm536_vm2, %v1338_v27  ;;  %v1097_v27 = vpop.f32.mrf.mxu2 }
 0x429   : > { %v1214_v57 = vpop.f32.mrf.mxu3  ;;  %v1276_v61 = vunpack.c.l.b16 %v1236_v0  ;;  %v7167_v0 = vpop.f32.mrf.mxu0 }
 0x42a   : > { %v1239_v37 = vpack.c.bf16 %v1214_v57, %v1214_v57 }
 0x42b   : > { %v1280_v24 = vpack.c.b16 %v1276_v61, %v1275_v44 }
 0x42c   : > { %v1332_v45 = vunpack.c.l.b16 %v1239_v37 }
 0x42d   : > { %5730 = vmatmul.msk.bf16.gmra.mxu2 %vm536_vm2, %v1280_v24 }
 0x430   : > { %v1100_v44 = vpop.f32.mrf.mxu2 }
 0x431   : > { %v1216_v22 = vpop.f32.mrf.mxu3  ;;  %v7170_v61 = vpop.f32.mrf.mxu0 }
 0x432   : > { %v1240_v38 = vpack.c.bf16 %v1216_v22, %v1216_v22 }
 0x434   : > { %v1333_v41 = vunpack.c.l.b16 %v1240_v38 }
 0x436   : > { %v1339_v19 = vpack.c.b16 %v1333_v41, %v1332_v45 }
 0x438   : > { %5732 = vmatmul.msk.bf16.gmra.mxu0 %vm536_vm2, %v1339_v19  ;;  %v1102_v24 = vpop.f32.mrf.mxu2 }
 0x439   : > { %v1219_v25 = vpop.f32.mrf.mxu3  ;;  %v7172_v37 = vpop.f32.mrf.mxu0 }
 0x43a   : > { %v1241_v50 = vpack.c.bf16 %v1219_v25, %v1219_v25 }
 0x43c   : > { %v1334_v17 = vunpack.c.l.b16 %v1241_v50 }
 0x440   : > { %v7174_v22 = vpop.f32.mrf.mxu2 }
 0x441   : > { %v1221_v8 = vpop.f32.mrf.mxu3  ;;  %v7176_v38 = vpop.f32.mrf.mxu0 }
 0x442   : > { %v1242_v60 = vpack.c.bf16 %v1221_v8, %v1221_v8 }
 0x444   : > { %v1335_v14 = vunpack.c.l.b16 %v1242_v60 }
 0x446   : > { %v1340_v49 = vpack.c.b16 %v1335_v14, %v1334_v17  ;;  %v1245_v14 = vmul.f32 %v1090_v12, %v6824_v5 }
 0x448   : > { %5733 = vmatmul.msk.bf16.gmra.mxu0 %vm536_vm2, %v1340_v49  ;;  %v7178_v45 = vpop.f32.mrf.mxu2 }
 0x449   : > { %v1224_v46 = vpop.f32.mrf.mxu3  ;;  %v7180_v41 = vpop.f32.mrf.mxu0 }
 0x44a   : > { %v1243_v32 = vpack.c.bf16 %v1224_v46, %v1224_v46  ;;  %v1246_v46 = vmul.f32 %v1092_v40, %v6828_v15 }
 0x44c   : > { %v1336_v39 = vunpack.c.l.b16 %v1243_v32 }
 0x451   : > { %v1226_v1 = vpop.f32.mrf.mxu3  ;;  %v7182_v50 = vpop.f32.mrf.mxu0 }
 0x452   : > { %v1244_v4 = vpack.c.bf16 %v1226_v1, %v1226_v1 }
 0x454   : > { %v1337_v34 = vunpack.c.l.b16 %v1244_v4 }
 0x456   : > { %v1341_v57 = vpack.c.b16 %v1337_v34, %v1336_v39 }
 0x458   : > { %5734 = vmatmul.msk.bf16.gmra.mxu0 %vm536_vm2, %v1341_v57 }
 0x459   : > { %v7188_v32 = vpop.f32.mrf.mxu0 }
 0x461   : > { %v7198_v40 = vpop.f32.mrf.mxu0 }
 0x480   : > { %v1302_v19 = vpop.f32.mrf.mxu2 }
 0x481   : > { %v1303_v25 = vadd.f32 1e-06, %v1302_v19 }
 0x483   : > { %6059 = vrcp.f32 %v1303_v25 }
 0x488   : > { %v1304_v8 = vpop.f32.mrf.mxu2 }
 0x489   : > { %v1305_v60 = vadd.f32 1e-06, %v1304_v8  ;;  %v6060_v17 = vpop.eup %6059 }
 0x48a   : > { %v7185_v49 = vmul.f32 %v6060_v17, %v1245_v14  ;;  %v1247_v17 = vmul.f32 %v1095_v51, %v6839_v63 }
 0x48b   : > { %6061 = vrcp.f32 %v1305_v60 }
 0x48c   : > { %v1415_v34 = vpack.c.bf16 %v7185_v49, %v7185_v49 }
 0x48e   : > { %v1439_v25 = vunpack.c.l.b16 %v1415_v34 }
 0x490   : > { %v1307_v1 = vpop.f32.mrf.mxu2 }
 0x491   : > { %v6062_v4 = vpop.eup %6061  ;;  %v1308_v39 = vadd.f32 1e-06, %v1307_v1 }
 0x492   : > { %v7192_v57 = vmul.f32 %v6062_v4, %v1246_v46  ;;  %v1248_v46 = vmul.f32 %v1097_v27, %v6843_v53 }
 0x493   : > { %6063 = vrcp.f32 %v1308_v39 }
 0x494   : > { %v1416_v19 = vpack.c.bf16 %v7192_v57, %v7192_v57 }
 0x496   : > { %v1440_v5 = vunpack.c.l.b16 %v1416_v19 }
 0x498   : > { %v1309_v12 = vpop.f32.mrf.mxu2  ;;  %v7196_v8 = vpack.c.b16 %v1440_v5, %v1439_v25 }
 0x499   : > { %v1310_v15 = vadd.f32 1e-06, %v1309_v12  ;;  %v6064_v60 = vpop.eup %6063 }
 0x49a   : > { %1463 = vmatmul.bf16.vlgmr.msrb.gmra.mxu1 %v7196_v8  ;;  %v7202_v14 = vmul.f32 %v6064_v60, %v1247_v17 }
 0x49b   : > { %6065 = vrcp.f32 %v1310_v15 }
 0x49c   : > { %v1417_v25 = vpack.c.bf16 %v7202_v14, %v7202_v14 }
 0x49e   : > { %v1441_v15 = vunpack.c.l.b16 %v1417_v25  ;;  %v1250_v25 = vmul.f32 %v1102_v24, %v6864_v10 }
 0x4a0   : > { %v1312_v1 = vpop.f32.mrf.mxu2 }
 0x4a1   : > { %v6066_v4 = vpop.eup %6065  ;;  %v1313_v39 = vadd.f32 1e-06, %v1312_v1  ;;  %v1249_v1 = vmul.f32 %v1100_v44, %v6856_v7 }
 0x4a2   : > { %v7205_v34 = vmul.f32 %v6066_v4, %v1248_v46 }
 0x4a3   : > { %6067 = vrcp.f32 %v1313_v39  ;;  %v1253_v39 = vmul.f32 %v7167_v0, %v6860_v26 }
 0x4a4   : > { %v1418_v12 = vpack.c.bf16 %v7205_v34, %v7205_v34 }
 0x4a5   : > { %v1363_v19 = vpop.f32.mrf.mxu0 }
 0x4a6   : > { %v1364_v5 = vadd.f32 1e-06, %v1363_v19  ;;  %v1442_v63 = vunpack.c.l.b16 %v1418_v12 }
 0x4a8   : > { %6069 = vrcp.f32 %v1364_v5  ;;  %v1314_v51 = vpop.f32.mrf.mxu2  ;;  %v7211_v60 = vpack.c.b16 %v1442_v63, %v1441_v15 }
 0x4a9   : > { %v1315_v53 = vadd.f32 1e-06, %v1314_v51  ;;  %v6068_v17 = vpop.eup %6067  ;;  %v1254_v51 = vmul.f32 %v7170_v61, %v6868_v16 }
 0x4aa   : > { %1468 = vmatmul.bf16.gmra.mxu1 %v7211_v60  ;;  %v7217_v19 = vmul.f32 %v6068_v17, %v1249_v1 }
 0x4ab   : > { %6071 = vrcp.f32 %v1315_v53 }
 0x4ac   : > { %v1419_v44 = vpack.c.bf16 %v7217_v19, %v7217_v19 }
 0x4ad   : > { %v1365_v27 = vpop.f32.mrf.mxu0 }
 0x4ae   : > { %v1366_v46 = vadd.f32 1e-06, %v1365_v27  ;;  %v6070_v4 = vpop.eup %6069  ;;  %v1443_v61 = vunpack.c.l.b16 %v1419_v44 }
 0x4af   : > { %v7220_v5 = vmul.f32 %v6070_v4, %v1253_v39 }
 0x4b0   : > { %6073 = vrcp.f32 %v1366_v46  ;;  %v1317_v12 = vpop.f32.mrf.mxu2 }
 0x4b1   : > { %v6072_v15 = vpop.eup %6071  ;;  %v1318_v63 = vadd.f32 1e-06, %v1317_v12  ;;  %v1423_v0 = vpack.c.bf16 %v7220_v5, %v7220_v5 }
 0x4b2   : > { %v7224_v53 = vmul.f32 %v6072_v15, %v1250_v25 }
 0x4b3   : > { %6075 = vrcp.f32 %v1318_v63  ;;  %v1492_v46 = vunpack.c.l.b16 %v1423_v0  ;;  %v1252_v0 = vmul.f32 %v7178_v45, %v6894_v62 }
 0x4b4   : > { %v1420_v24 = vpack.c.bf16 %v7224_v53, %v7224_v53 }
 0x4b5   : > { %v1368_v7 = vpop.f32.mrf.mxu0 }
 0x4b6   : > { %v6074_v27 = vpop.eup %6073  ;;  %v1369_v26 = vadd.f32 1e-06, %v1368_v7  ;;  %v1444_v17 = vunpack.c.l.b16 %v1420_v24  ;;  %v1251_v7 = vmul.f32 %v7174_v22, %v6886_v36 }
 0x4b7   : > { %v7230_v10 = vmul.f32 %v6074_v27, %v1254_v51  ;;  %v1255_v27 = vmul.f32 %v7172_v37, %v6890_v21 }
 0x4b8   : > { %6077 = vrcp.f32 %v1369_v26  ;;  %v1319_v4 = vpop.f32.mrf.mxu2  ;;  %v7236_v39 = vpack.c.b16 %v1444_v17, %v1443_v61  ;;  %v1256_v61 = vmul.f32 %v7176_v38, %v6898_v52 }
 0x4b9   : > { %v1424_v16 = vpack.c.bf16 %v7230_v10, %v7230_v10  ;;  %v1320_v25 = vadd.f32 1e-06, %v1319_v4  ;;  %v6076_v51 = vpop.eup %6075 }
 0x4ba   : > { %1473 = vmatmul.bf16.gmra.mxu1 %v7236_v39  ;;  %v7246_v26 = vmul.f32 %v6076_v51, %v1251_v7 }
 0x4bb   : > { %v1493_v1 = vunpack.c.l.b16 %v1424_v16  ;;  %6079 = vrcp.f32 %v1320_v25 }
 0x4bc   : > { %v1421_v22 = vpack.c.bf16 %v7246_v26, %v7246_v26 }
 0x4bd   : > { %v1370_v12 = vpop.f32.mrf.mxu0  ;;  %v7239_v15 = vpack.c.b16 %v1493_v1, %v1492_v46 }
 0x4be   : > { %v1371_v63 = vadd.f32 1e-06, %v1370_v12  ;;  %v6078_v44 = vpop.eup %6077  ;;  %v1445_v45 = vunpack.c.l.b16 %v1421_v22 }
 0x4bf   : > { %1516 = vmatmul.bf16.vlgmr.msra.gmra.mxu3 %v7239_v15  ;;  %v7250_v24 = vmul.f32 %v6078_v44, %v1255_v27  ;;  %v1257_v27 = vmul.f32 %v7180_v41, %v6908_v47 }
 0x4c0   : > { %6081 = vrcp.f32 %v1371_v63 }
 0x4c1   : > { %v6080_v16 = vpop.eup %6079  ;;  %v1425_v62 = vpack.c.bf16 %v7250_v24, %v7250_v24 }
 0x4c2   : > { %v7254_v17 = vmul.f32 %v6080_v16, %v1252_v0  ;;  %v1258_v16 = vmul.f32 %v7182_v50, %v6913_v18 }
 0x4c3   : > { %v1494_v25 = vunpack.c.l.b16 %v1425_v62 }
 0x4c4   : > { %v1422_v37 = vpack.c.bf16 %v7254_v17, %v7254_v17 }
 0x4c5   : > { %v1373_v36 = vpop.f32.mrf.mxu0 }
 0x4c6   : > { %v6082_v46 = vpop.eup %6081  ;;  %v1374_v1 = vadd.f32 1e-06, %v1373_v36  ;;  %v1446_v4 = vunpack.c.l.b16 %v1422_v37 }
 0x4c7   : > { %v7258_v21 = vmul.f32 %v6082_v46, %v1256_v61 }
 0x4c8   : > { %6083 = vrcp.f32 %v1374_v1  ;;  %v1450_v38 = vpack.c.b16 %v1446_v4, %v1445_v45  ;;  %v1259_v4 = vmul.f32 %v7188_v32, %v6922_v3 }
 0x4c9   : > { %v1426_v52 = vpack.c.bf16 %v7258_v21, %v7258_v21 }
 0x4ca   : > { %1478 = vmatmul.bf16.gmra.mxu1 %v1450_v38  ;;  %1541 = vmatpush.bf16.xpose.msrb.mxu2 %v1450_v38 }
 0x4cb   : > { %v1495_v12 = vunpack.c.l.b16 %v1426_v52 }
 0x4cd   : > { %v1375_v51 = vpop.f32.mrf.mxu0  ;;  %v1501_v63 = vpack.c.b16 %v1495_v12, %v1494_v25  ;;  %v1260_v25 = vmul.f32 %v7198_v40, %v6928_v13 }
 0x4ce   : > { %v1376_v7 = vadd.f32 1e-06, %v1375_v51  ;;  %v6084_v44 = vpop.eup %6083 }
 0x4cf   : > { %1521 = vmatmul.bf16.gmra.mxu3 %v1501_v63  ;;  %v7268_v0 = vmul.f32 %v6084_v44, %v1257_v27 }
 0x4d0   : > { %6085 = vrcp.f32 %v1376_v7 }
 0x4d1   : > { %v1427_v1 = vpack.c.bf16 %v7268_v0, %v7268_v0 }
 0x4d2   : > { %1542 = vmatpush.bf16.xpose.msrb.mxu2 %v7236_v39 }
 0x4d3   : > { %v1496_v47 = vunpack.c.l.b16 %v1427_v1 }
 0x4d5   : > { %v1378_v61 = vpop.f32.mrf.mxu0 }
 0x4d6   : > { %v6086_v36 = vpop.eup %6085  ;;  %v1379_v22 = vadd.f32 1e-06, %v1378_v61 }
 0x4d7   : > { %v7273_v46 = vmul.f32 %v6086_v36, %v1258_v16 }
 0x4d8   : > { %6087 = vrcp.f32 %v1379_v22 }
 0x4d9   : > { %v1428_v37 = vpack.c.bf16 %v7273_v46, %v7273_v46 }
 0x4da   : > { %1543 = vmatpush.bf16.xpose.msrb.mxu2 %v7211_v60 }
 0x4db   : > { %v1497_v41 = vunpack.c.l.b16 %v1428_v37 }
 0x4dd   : > { %v1380_v62 = vpop.f32.mrf.mxu0  ;;  %v1502_v18 = vpack.c.b16 %v1497_v41, %v1496_v47 }
 0x4de   : > { %v1381_v50 = vadd.f32 1e-06, %v1380_v62  ;;  %v6088_v45 = vpop.eup %6087 }
 0x4df   : > { %1526 = vmatmul.bf16.gmra.mxu3 %v1502_v18  ;;  %v7282_v52 = vmul.f32 %v6088_v45, %v1259_v4 }
 0x4e0   : > { %6089 = vrcp.f32 %v1381_v50 }
 0x4e1   : > { %v1429_v7 = vpack.c.bf16 %v7282_v52, %v7282_v52 }
 0x4e2   : > { %1544 = vmatpush.bf16.xpose.msrb.mxu2 %v7196_v8 }
 0x4e3   : > { %v1498_v27 = vunpack.c.l.b16 %v1429_v7 }
 0x4e6   : > { %v6090_v12 = vpop.eup %6089 }
 0x4e7   : > { %v7288_v51 = vmul.f32 %v6090_v12, %v1260_v25 }
 0x4e9   : > { %v1430_v44 = vpack.c.bf16 %v7288_v51, %v7288_v51  ;;  %1545 = vmatmul.bf16.vlgmr.msrb.gmra.mxu2 %v7196_v8 }
 0x4ea   : > { %1844 = vmatpush.bf16.msra.mxu2 %v6590_v20 }
 0x4eb   : > { %v1499_v3 = vunpack.c.l.b16 %v1430_v44 }
 0x4ed   : > { %v1503_v32 = vpack.c.b16 %v1499_v3, %v1498_v27 }
 0x4ee   : > { %2053 = vmatpush.bf16.msrb.mxu2 %v1450_v38 }
 0x4ef   : > { %1531 = vmatmul.bf16.gmra.mxu3 %v1503_v32  ;;  %1570 = vmatpush.bf16.xpose.msrb.mxu0 %v1503_v32 }
 0x4f2   : > { %2054 = vmatpush.bf16.msrb.mxu2 %v7236_v39 }
 0x4f6   : > { %2055 = vmatpush.bf16.msrb.mxu2 %v7211_v60 }
 0x4f7   : > { %1571 = vmatpush.bf16.xpose.msrb.mxu0 %v1502_v18 }
 0x4f9   : > { %1550 = vmatmul.bf16.gmra.mxu2 %v7211_v60 }
 0x4fa   : > { %2056 = vmatpush.bf16.msrb.mxu2 %v7196_v8 }
 0x4ff   : > { %1572 = vmatpush.bf16.xpose.msrb.mxu0 %v1501_v63 }
 0x507   : > { %1573 = vmatpush.bf16.xpose.msrb.mxu0 %v7239_v15 }
 0x509   : > { %1555 = vmatmul.bf16.gmra.mxu2 %v7236_v39 }
 0x50e   : > { %1574 = vmatmul.bf16.vlgmr.msrb.gmra.mxu0 %v7239_v15 }
 0x50f   : > { %1905 = vmatpush.bf16.msra.mxu0 %v6597_v23 }
 0x513   : > { %2114 = vmatpush.bf16.msrb.mxu0 %v1503_v32 }
 0x517   : > { %2115 = vmatpush.bf16.msrb.mxu0 %v1502_v18 }
 0x519   : > { %1560 = vmatmul.bf16.gmra.mxu2 %v1450_v38 }
 0x51b   : > { %2116 = vmatpush.bf16.msrb.mxu0 %v1501_v63 }
 0x51e   : > { %1579 = vmatmul.bf16.gmra.mxu0 %v1501_v63 }
 0x51f   : > { %2117 = vmatpush.bf16.msrb.mxu0 %v7239_v15 }
 0x52e   : > { %1584 = vmatmul.bf16.gmra.mxu0 %v1502_v18 }
 0x53e   : > { %1589 = vmatmul.bf16.gmra.mxu0 %v1503_v32 }
 0x56c   : > { %v1546_v13 = vpop.f32.mrf.mxu2 }
 0x56d   : > { %v1595_v8 = vpack.c.bf16 %v1546_v13, %v1546_v13 }
 0x56f   : > { %v1635_v16 = vunpack.c.l.b16 %v1595_v8 }
 0x574   : > { %v1548_v40 = vpop.f32.mrf.mxu2 }
 0x575   : > { %v1596_v60 = vpack.c.bf16 %v1548_v40, %v1548_v40 }
 0x577   : > { %v1636_v61 = vunpack.c.l.b16 %v1596_v60 }
 0x579   : > { %v1643_v36 = vpack.c.b16 %v1636_v61, %v1635_v16 }
 0x57b   : > { %5735 = vmatmul.msk.bf16.vlgmr.msra.gmra.mxu1 %vm536_vm2, %v1643_v36 }
 0x57c   : > { %v1551_v39 = vpop.f32.mrf.mxu2 }
 0x57d   : > { %v1597_v22 = vpack.c.bf16 %v1551_v39, %v1551_v39 }
 0x57f   : > { %v1637_v47 = vunpack.c.l.b16 %v1597_v22 }
 0x584   : > { %v1553_v1 = vpop.f32.mrf.mxu2 }
 0x585   : > { %v1598_v37 = vpack.c.bf16 %v1553_v1, %v1553_v1 }
 0x587   : > { %v1638_v41 = vunpack.c.l.b16 %v1598_v37 }
 0x589   : > { %v1644_v38 = vpack.c.b16 %v1638_v41, %v1637_v47 }
 0x58b   : > { %v1575_v15 = vpop.f32.mrf.mxu0  ;;  %5736 = vmatmul.msk.bf16.gmra.mxu1 %vm536_vm2, %v1644_v38 }
 0x58c   : > { %v1556_v63 = vpop.f32.mrf.mxu2  ;;  %v1603_v62 = vpack.c.bf16 %v1575_v15, %v1575_v15 }
 0x58d   : > { %v1599_v4 = vpack.c.bf16 %v1556_v63, %v1556_v63  ;;  %v1464_v63 = vpop.f32.mrf.mxu1 }
 0x58e   : > { %v1700_v45 = vunpack.c.l.b16 %v1603_v62 }
 0x58f   : > { %v1639_v27 = vunpack.c.l.b16 %v1599_v4 }
 0x593   : > { %v1577_v18 = vpop.f32.mrf.mxu0 }
 0x594   : > { %v1604_v50 = vpack.c.bf16 %v1577_v18, %v1577_v18  ;;  %v1558_v12 = vpop.f32.mrf.mxu2 }
 0x595   : > { %v1600_v44 = vpack.c.bf16 %v1558_v12, %v1558_v12 }
 0x596   : > { %v1701_v25 = vunpack.c.l.b16 %v1604_v50 }
 0x597   : > { %v1640_v3 = vunpack.c.l.b16 %v1600_v44 }
 0x598   : > { %v1708_v7 = vpack.c.b16 %v1701_v25, %v1700_v45  ;;  %v1466_v25 = vpop.f32.mrf.mxu1 }
 0x599   : > { %v1645_v13 = vpack.c.b16 %v1640_v3, %v1639_v27 }
 0x59a   : > { %5739 = vmatmul.msk.bf16.vlgmr.msrb.gmra.mxu3 %vm536_vm2, %v1708_v7 }
 0x59b   : > { %v1580_v32 = vpop.f32.mrf.mxu0  ;;  %5737 = vmatmul.msk.bf16.gmra.mxu1 %vm536_vm2, %v1645_v13 }
 0x59c   : > { %v1561_v8 = vpop.f32.mrf.mxu2  ;;  %v1605_v40 = vpack.c.bf16 %v1580_v32, %v1580_v32 }
 0x59d   : > { %v1601_v36 = vpack.c.bf16 %v1561_v8, %v1561_v8 }
 0x59e   : > { %v1702_v61 = vunpack.c.l.b16 %v1605_v40 }
 0x59f   : > { %v1641_v47 = vunpack.c.l.b16 %v1601_v36 }
 0x5a0   : > { %v1469_v44 = vpop.f32.mrf.mxu1 }
 0x5a3   : > { %v1582_v60 = vpop.f32.mrf.mxu0 }
 0x5a4   : > { %v1606_v16 = vpack.c.bf16 %v1582_v60, %v1582_v60  ;;  %v1563_v22 = vpop.f32.mrf.mxu2 }
 0x5a5   : > { %v1602_v37 = vpack.c.bf16 %v1563_v22, %v1563_v22 }
 0x5a6   : > { %v1703_v39 = vunpack.c.l.b16 %v1606_v16  ;;  %v7312_v16 = vpop.f32.mrf.mxu3 }
 0x5a7   : > { %v1642_v41 = vunpack.c.l.b16 %v1602_v37 }
 0x5a8   : > { %v1709_v1 = vpack.c.b16 %v1703_v39, %v1702_v61  ;;  %v1471_v60 = vpop.f32.mrf.mxu1 }
 0x5a9   : > { %v1646_v38 = vpack.c.b16 %v1642_v41, %v1641_v47 }
 0x5aa   : > { %5740 = vmatmul.msk.bf16.gmra.mxu3 %vm536_vm2, %v1709_v1 }
 0x5ab   : > { %v1585_v15 = vpop.f32.mrf.mxu0  ;;  %5738 = vmatmul.msk.bf16.gmra.mxu1 %vm536_vm2, %v1646_v38 }
 0x5ac   : > { %v1607_v62 = vpack.c.bf16 %v1585_v15, %v1585_v15 }
 0x5ae   : > { %v1704_v45 = vunpack.c.l.b16 %v1607_v62  ;;  %v7314_v36 = vpop.f32.mrf.mxu3 }
 0x5b0   : > { %v1474_v61 = vpop.f32.mrf.mxu1 }
 0x5b3   : > { %v1587_v18 = vpop.f32.mrf.mxu0 }
 0x5b4   : > { %v1608_v50 = vpack.c.bf16 %v1587_v18, %v1587_v18 }
 0x5b6   : > { %v1705_v4 = vunpack.c.l.b16 %v1608_v50  ;;  %v7316_v22 = vpop.f32.mrf.mxu3 }
 0x5b8   : > { %v1710_v12 = vpack.c.b16 %v1705_v4, %v1704_v45  ;;  %v1476_v39 = vpop.f32.mrf.mxu1  ;;  %v1611_v4 = vmul.f32 %v1464_v63, %v6975_v43 }
 0x5ba   : > { %5741 = vmatmul.msk.bf16.gmra.mxu3 %vm536_vm2, %v1710_v12 }
 0x5bb   : > { %v1590_v7 = vpop.f32.mrf.mxu0 }
 0x5bc   : > { %v1609_v27 = vpack.c.bf16 %v1590_v7, %v1590_v7  ;;  %v1612_v7 = vmul.f32 %v1466_v25, %v6984_v33 }
 0x5be   : > { %v1706_v13 = vunpack.c.l.b16 %v1609_v27  ;;  %v7320_v37 = vpop.f32.mrf.mxu3 }
 0x5c0   : > { %v7318_v1 = vpop.f32.mrf.mxu1 }
 0x5c3   : > { %v1592_v3 = vpop.f32.mrf.mxu0 }
 0x5c4   : > { %v1610_v32 = vpack.c.bf16 %v1592_v3, %v1592_v3 }
 0x5c6   : > { %v1707_v8 = vunpack.c.l.b16 %v1610_v32  ;;  %v7324_v41 = vpop.f32.mrf.mxu3 }
 0x5c8   : > { %v1711_v40 = vpack.c.b16 %v1707_v8, %v1706_v13  ;;  %v7322_v47 = vpop.f32.mrf.mxu1 }
 0x5ca   : > { %5742 = vmatmul.msk.bf16.gmra.mxu3 %vm536_vm2, %v1711_v40 }
 0x5ce   : > { %v7326_v62 = vpop.f32.mrf.mxu3 }
 0x5d6   : > { %v7332_v27 = vpop.f32.mrf.mxu3 }
 0x5de   : > { %v7342_v25 = vpop.f32.mrf.mxu3 }
 0x5f8   : > { %v1672_v15 = vpop.f32.mrf.mxu1 }
 0x5f9   : > { %v1673_v38 = vadd.f32 1e-06, %v1672_v15 }
 0x5fb   : > { %6091 = vrcp.f32 %v1673_v38 }
 0x600   : > { %v1674_v18 = vpop.f32.mrf.mxu1 }
 0x601   : > { %v1675_v50 = vadd.f32 1e-06, %v1674_v18  ;;  %v6092_v45 = vpop.eup %6091 }
 0x602   : > { %v7329_v12 = vmul.f32 %v6092_v45, %v1611_v4  ;;  %v1613_v45 = vmul.f32 %v1469_v44, %v7000_v58 }
 0x603   : > { %6093 = vrcp.f32 %v1675_v50 }
 0x604   : > { %v1789_v8 = vpack.c.bf16 %v7329_v12, %v7329_v12 }
 0x606   : > { %v1813_v38 = vunpack.c.l.b16 %v1789_v8 }
 0x608   : > { %v1677_v3 = vpop.f32.mrf.mxu1 }
 0x609   : > { %v6094_v32 = vpop.eup %6093  ;;  %v1678_v13 = vadd.f32 1e-06, %v1677_v3 }
 0x60a   : > { %v7336_v40 = vmul.f32 %v6094_v32, %v1612_v7  ;;  %v1614_v7 = vmul.f32 %v1471_v60, %v7008_v30 }
 0x60b   : > { %6095 = vrcp.f32 %v1678_v13 }
 0x60c   : > { %v1790_v15 = vpack.c.bf16 %v7336_v40, %v7336_v40 }
 0x60e   : > { %v1814_v43 = vunpack.c.l.b16 %v1790_v15 }
 0x610   : > { %v7340_v63 = vpack.c.b16 %v1814_v43, %v1813_v38  ;;  %v1679_v18 = vpop.f32.mrf.mxu1 }
 0x611   : > { %v1680_v33 = vadd.f32 1e-06, %v1679_v18  ;;  %v6096_v50 = vpop.eup %6095 }
 0x612   : > { %5743 = vmatmul.msk.bf16.vlgmr.msra.gmra.mxu2 %vm227_vm1, %v7340_v63  ;;  %v7347_v4 = vmul.f32 %v6096_v50, %v1613_v45 }
 0x613   : > { %6097 = vrcp.f32 %v1680_v33 }
 0x614   : > { %v1791_v38 = vpack.c.bf16 %v7347_v4, %v7347_v4 }
 0x616   : > { %v1815_v33 = vunpack.c.l.b16 %v1791_v38  ;;  %v1616_v38 = vmul.f32 %v1476_v39, %v7038_v35 }
 0x618   : > { %v1682_v3 = vpop.f32.mrf.mxu1 }
 0x619   : > { %v6098_v32 = vpop.eup %6097  ;;  %v1683_v13 = vadd.f32 1e-06, %v1682_v3  ;;  %v1615_v3 = vmul.f32 %v1474_v61, %v7026_v55 }
 0x61a   : > { %v7350_v8 = vmul.f32 %v6098_v32, %v1614_v7 }
 0x61b   : > { %6099 = vrcp.f32 %v1683_v13  ;;  %v1619_v13 = vmul.f32 %v7312_v16, %v7035_v31 }
 0x61c   : > { %v1792_v18 = vpack.c.bf16 %v7350_v8, %v7350_v8 }
 0x61d   : > { %v1737_v15 = vpop.f32.mrf.mxu3 }
 0x61e   : > { %v1738_v43 = vadd.f32 1e-06, %v1737_v15  ;;  %v1816_v58 = vunpack.c.l.b16 %v1792_v18 }
 0x620   : > { %6101 = vrcp.f32 %v1738_v43  ;;  %v1684_v44 = vpop.f32.mrf.mxu1  ;;  %v7356_v50 = vpack.c.b16 %v1816_v58, %v1815_v33 }
 0x621   : > { %v1685_v30 = vadd.f32 1e-06, %v1684_v44  ;;  %v6100_v45 = vpop.eup %6099  ;;  %v1620_v44 = vmul.f32 %v7314_v36, %v7044_v9 }
 0x622   : > { %5744 = vmatmul.msk.bf16.gmra.mxu2 %vm227_vm1, %v7356_v50  ;;  %v7363_v15 = vmul.f32 %v6100_v45, %v1615_v3 }
 0x623   : > { %6103 = vrcp.f32 %v1685_v30 }
 0x624   : > { %v1793_v61 = vpack.c.bf16 %v7363_v15, %v7363_v15 }
 0x625   : > { %v1739_v60 = vpop.f32.mrf.mxu3 }
 0x626   : > { %v1740_v7 = vadd.f32 1e-06, %v1739_v60  ;;  %v6102_v32 = vpop.eup %6101  ;;  %v1817_v36 = vunpack.c.l.b16 %v1793_v61 }
 0x627   : > { %v7366_v43 = vmul.f32 %v6102_v32, %v1619_v13 }
 0x628   : > { %6105 = vrcp.f32 %v1740_v7  ;;  %v1687_v18 = vpop.f32.mrf.mxu1 }
 0x629   : > { %v6104_v33 = vpop.eup %6103  ;;  %v1688_v58 = vadd.f32 1e-06, %v1687_v18  ;;  %v1797_v16 = vpack.c.bf16 %v7366_v43, %v7366_v43 }
 0x62a   : > { %v7370_v30 = vmul.f32 %v6104_v33, %v1616_v38 }
 0x62b   : > { %6107 = vrcp.f32 %v1688_v58  ;;  %v1874_v7 = vunpack.c.l.b16 %v1797_v16  ;;  %v1618_v16 = vmul.f32 %v7322_v47, %v7074_v29 }
 0x62c   : > { %v1794_v39 = vpack.c.bf16 %v7370_v30, %v7370_v30 }
 0x62d   : > { %v1742_v55 = vpop.f32.mrf.mxu3 }
 0x62e   : > { %v6106_v60 = vpop.eup %6105  ;;  %v1743_v31 = vadd.f32 1e-06, %v1742_v55  ;;  %v1818_v45 = vunpack.c.l.b16 %v1794_v39  ;;  %v1617_v55 = vmul.f32 %v7318_v1, %v7064_v42 }
 0x62f   : > { %v7376_v35 = vmul.f32 %v6106_v60, %v1620_v44  ;;  %v1621_v60 = vmul.f32 %v7316_v22, %v7070_v54 }
 0x630   : > { %6109 = vrcp.f32 %v1743_v31  ;;  %v1689_v32 = vpop.f32.mrf.mxu1  ;;  %v7382_v13 = vpack.c.b16 %v1818_v45, %v1817_v36  ;;  %v1622_v36 = vmul.f32 %v7320_v37, %v7078_v56 }
 0x631   : > { %v1798_v9 = vpack.c.bf16 %v7376_v35, %v7376_v35  ;;  %v1690_v38 = vadd.f32 1e-06, %v1689_v32  ;;  %v6108_v44 = vpop.eup %6107 }
 0x632   : > { %5745 = vmatmul.msk.bf16.gmra.mxu2 %vm227_vm1, %v7382_v13  ;;  %v7394_v31 = vmul.f32 %v6108_v44, %v1617_v55 }
 0x633   : > { %v1875_v3 = vunpack.c.l.b16 %v1798_v9  ;;  %6111 = vrcp.f32 %v1690_v38 }
 0x634   : > { %v1795_v45 = vpack.c.bf16 %v7394_v31, %v7394_v31 }
 0x635   : > { %v7384_v18 = vpack.c.b16 %v1875_v3, %v1874_v7  ;;  %v1744_v33 = vpop.f32.mrf.mxu3 }
 0x636   : > { %v1745_v58 = vadd.f32 1e-06, %v1744_v33  ;;  %v6110_v61 = vpop.eup %6109  ;;  %v1819_v47 = vunpack.c.l.b16 %v1795_v45 }
 0x637   : > { %5747 = vmatmul.msk.bf16.vlgmr.msra.gmra.mxu0 %vm227_vm1, %v7384_v18  ;;  %v7398_v39 = vmul.f32 %v6110_v61, %v1621_v60 }
 0x638   : > { %6113 = vrcp.f32 %v1745_v58 }
 0x639   : > { %v6112_v9 = vpop.eup %6111  ;;  %v1799_v29 = vpack.c.bf16 %v7398_v39, %v7398_v39 }
 0x63a   : > { %v7402_v42 = vmul.f32 %v6112_v9, %v1618_v16  ;;  %v1623_v16 = vmul.f32 %v7324_v41, %v7098_v28 }
 0x63b   : > { %v1876_v38 = vunpack.c.l.b16 %v1799_v29 }
 0x63c   : > { %v1796_v22 = vpack.c.bf16 %v7402_v42, %v7402_v42 }
 0x63d   : > { %v1747_v1 = vpop.f32.mrf.mxu3 }
 0x63e   : > { %v6114_v7 = vpop.eup %6113  ;;  %v1748_v3 = vadd.f32 1e-06, %v1747_v1  ;;  %v1820_v32 = vunpack.c.l.b16 %v1796_v22  ;;  %v1832_v1 = vsel %vm227_vm1, %v7382_v13, 0 }
 0x63f   : > { %v7406_v54 = vmul.f32 %v6114_v7, %v1622_v36  ;;  %v1624_v36 = vmul.f32 %v7326_v62, %v7104_v11  ;;  %v1829_v11 = vsel %vm227_vm1, %v7356_v50, 0 }
 0x640   : > { %6115 = vrcp.f32 %v1748_v3  ;;  %v7414_v37 = vpack.c.b16 %v1820_v32, %v1819_v47 }
 0x641   : > { %v1800_v56 = vpack.c.bf16 %v7406_v54, %v7406_v54 }
 0x642   : > { %5746 = vmatmul.msk.bf16.gmra.mxu2 %vm227_vm1, %v7414_v37  ;;  %v1835_v44 = vsel %vm227_vm1, %v7414_v37, 0 }
 0x643   : > { %v1877_v33 = vunpack.c.l.b16 %v1800_v56  ;;  %1931 = vmatpush.bf16.xpose.msrb.mxu1 %v1835_v44 }
 0x645   : > { %v1749_v58 = vpop.f32.mrf.mxu3  ;;  %v7420_v55 = vpack.c.b16 %v1877_v33, %v1876_v38  ;;  %v1625_v33 = vmul.f32 %v7332_v27, %v7114_v2 }
 0x646   : > { %v1750_v61 = vadd.f32 1e-06, %v1749_v58  ;;  %v6116_v60 = vpop.eup %6115  ;;  %v1626_v58 = vmul.f32 %v7342_v25, %v7119_v48 }
 0x647   : > { %5748 = vmatmul.msk.bf16.gmra.mxu0 %vm227_vm1, %v7420_v55  ;;  %v7426_v9 = vmul.f32 %v6116_v60, %v1623_v16 }
 0x648   : > { %6117 = vrcp.f32 %v1750_v61  ;;  %v1826_v61 = vsel %vm227_vm1, %v7340_v63, 0 }
 0x649   : > { %v1801_v29 = vpack.c.bf16 %v7426_v9, %v7426_v9 }
 0x64b   : > { %1932 = vmatpush.bf16.xpose.msrb.mxu1 %v1832_v1  ;;  %v1878_v41 = vunpack.c.l.b16 %v1801_v29 }
 0x64d   : > { %v1752_v45 = vpop.f32.mrf.mxu3 }
 0x64e   : > { %v6118_v7 = vpop.eup %6117  ;;  %v1753_v3 = vadd.f32 1e-06, %v1752_v45  ;;  %v1890_v45 = vsel %vm227_vm1, %v7420_v55, 0 }
 0x64f   : > { %v7432_v22 = vmul.f32 %v6118_v7, %v1624_v36  ;;  %v1887_v7 = vsel %vm227_vm1, %v7384_v18, 0 }
 0x650   : > { %6119 = vrcp.f32 %v1753_v3 }
 0x651   : > { %v1802_v28 = vpack.c.bf16 %v7432_v22, %v7432_v22 }
 0x653   : > { %v1879_v47 = vunpack.c.l.b16 %v1802_v28  ;;  %1933 = vmatpush.bf16.xpose.msrb.mxu1 %v1829_v11 }
 0x655   : > { %v1754_v62 = vpop.f32.mrf.mxu3  ;;  %v1884_v32 = vpack.c.b16 %v1879_v47, %v1878_v41 }
 0x656   : > { %v1755_v56 = vadd.f32 1e-06, %v1754_v62  ;;  %v6120_v38 = vpop.eup %6119 }
 0x657   : > { %5749 = vmatmul.msk.bf16.gmra.mxu0 %vm227_vm1, %v1884_v32  ;;  %v7443_v44 = vmul.f32 %v6120_v38, %v1625_v33 }
 0x658   : > { %6121 = vrcp.f32 %v1755_v56 }
 0x659   : > { %v1803_v36 = vpack.c.bf16 %v7443_v44, %v7443_v44 }
 0x65b   : > { %1934 = vmatpush.bf16.xpose.msrb.mxu1 %v1826_v61  ;;  %v1880_v27 = vunpack.c.l.b16 %v1803_v36 }
 0x65e   : > { %v6122_v60 = vpop.eup %6121 }
 0x65f   : > { %v7449_v16 = vmul.f32 %v6122_v60, %v1626_v58 }
 0x661   : > { %v1804_v2 = vpack.c.bf16 %v7449_v16, %v7449_v16 }
 0x662   : > { %5751 = vmatmul.msk.bf16.vlgmr.msrb.gmra.mxu1 %vm227_vm1, %v7340_v63 }
 0x663   : > { %2218 = vmatpush.bf16.xpose.msra.mxu1 %v7122_v6  ;;  %v1881_v1 = vunpack.c.l.b16 %v1804_v2  ;;  %v1893_v6 = vsel %vm227_vm1, %v1884_v32, 0 }
 0x665   : > { %v1885_v48 = vpack.c.b16 %v1881_v1, %v1880_v27 }
 0x667   : > { %5750 = vmatmul.msk.bf16.gmra.mxu0 %vm227_vm1, %v1885_v48  ;;  %v1896_v25 = vsel %vm227_vm1, %v1885_v48, 0 }
 0x668   : > { %1960 = vmatpush.bf16.xpose.msra.mxu3 %v1896_v25 }
 0x66b   : > { %2423 = vmatpush.bf16.msrb.mxu1 %v7414_v37 }
 0x66f   : > { %2424 = vmatpush.bf16.msrb.mxu1 %v7382_v13 }
 0x670   : > { %1961 = vmatpush.bf16.xpose.msra.mxu3 %v1893_v6 }
 0x672   : > { %5752 = vmatmul.msk.bf16.gmra.mxu1 %vm227_vm1, %v7356_v50 }
 0x673   : > { %2425 = vmatpush.bf16.msrb.mxu1 %v7356_v50 }
 0x677   : > { %2426 = vmatpush.bf16.msrb.mxu1 %v7340_v63 }
 0x678   : > { %1962 = vmatpush.bf16.xpose.msra.mxu3 %v1890_v45 }
 0x680   : > { %1963 = vmatpush.bf16.xpose.msra.mxu3 %v1887_v7 }
 0x682   : > { %5753 = vmatmul.msk.bf16.gmra.mxu1 %vm227_vm1, %v7382_v13 }
 0x687   : > { %5755 = vmatmul.msk.bf16.vlgmr.msra.gmra.mxu3 %vm227_vm1, %v7384_v18 }
 0x688   : > { %2271 = vmatpush.bf16.xpose.msrb.mxu3 %v7145_v59 }
 0x690   : > { %2488 = vmatpush.bf16.msra.mxu3 %v1885_v48 }
 0x692   : > { %5754 = vmatmul.msk.bf16.gmra.mxu1 %vm227_vm1, %v7414_v37 }
 0x694   : > { %2489 = vmatpush.bf16.msra.mxu3 %v1884_v32 }
 0x697   : > { %5756 = vmatmul.msk.bf16.gmra.mxu3 %vm227_vm1, %v7420_v55 }
 0x698   : > { %2490 = vmatpush.bf16.msra.mxu3 %v7420_v55 }
 0x69c   : > { %2491 = vmatpush.bf16.msra.mxu3 %v7384_v18 }
 0x6a7   : > { %5757 = vmatmul.msk.bf16.gmra.mxu3 %vm227_vm1, %v1884_v32 }
 0x6b7   : > { %5758 = vmatmul.msk.bf16.gmra.mxu3 %vm227_vm1, %v1885_v48 }
 0x6df   : > { %v1936_v59 = vpop.f32.mrf.mxu1 }
 0x6e0   : > { %v1985_v63 = vpack.c.bf16 %v1936_v59, %v1936_v59 }
 0x6e2   : > { %v2025_v3 = vunpack.c.l.b16 %v1985_v63 }
 0x6e7   : > { %v1938_v50 = vpop.f32.mrf.mxu1 }
 0x6e8   : > { %v1986_v13 = vpack.c.bf16 %v1938_v50, %v1938_v50 }
 0x6ea   : > { %v2026_v29 = vunpack.c.l.b16 %v1986_v13 }
 0x6ec   : > { %v2033_v28 = vpack.c.b16 %v2026_v29, %v2025_v3 }
 0x6ee   : > { %5759 = vmatmul.msk.bf16.vlgmr.msrb.gmra.mxu2 %vm536_vm2, %v2033_v28 }
 0x6ef   : > { %v1941_v18 = vpop.f32.mrf.mxu1 }
 0x6f0   : > { %v1987_v41 = vpack.c.bf16 %v1941_v18, %v1941_v18 }
 0x6f2   : > { %v2027_v11 = vunpack.c.l.b16 %v1987_v41 }
 0x6f7   : > { %v1943_v47 = vpop.f32.mrf.mxu1 }
 0x6f8   : > { %v1988_v37 = vpack.c.bf16 %v1943_v47, %v1943_v47 }
 0x6fa   : > { %v2028_v62 = vunpack.c.l.b16 %v1988_v37 }
 0x6fc   : > { %v2034_v55 = vpack.c.b16 %v2028_v62, %v2027_v11  ;;  %v1846_v11 = vpop.f32.mrf.mxu2 }
 0x6fe   : > { %5760 = vmatmul.msk.bf16.gmra.mxu2 %vm536_vm2, %v2034_v55 }
 0x6ff   : > { %v1946_v32 = vpop.f32.mrf.mxu1 }
 0x700   : > { %v1989_v56 = vpack.c.bf16 %v1946_v32, %v1946_v32 }
 0x702   : > { %v2029_v61 = vunpack.c.l.b16 %v1989_v56 }
 0x704   : > { %v1848_v32 = vpop.f32.mrf.mxu2 }
 0x707   : > { %v1948_v38 = vpop.f32.mrf.mxu1 }
 0x708   : > { %v1990_v58 = vpack.c.bf16 %v1948_v38, %v1948_v38 }
 0x70a   : > { %v1965_v33 = vpop.f32.mrf.mxu3  ;;  %v2030_v60 = vunpack.c.l.b16 %v1990_v58 }
 0x70b   : > { %v1993_v2 = vpack.c.bf16 %v1965_v33, %v1965_v33 }
 0x70c   : > { %v2035_v36 = vpack.c.b16 %v2030_v60, %v2029_v61 }
 0x70d   : > { %v2086_v25 = vunpack.c.l.b16 %v1993_v2 }
 0x70e   : > { %5761 = vmatmul.msk.bf16.gmra.mxu2 %vm536_vm2, %v2035_v36  ;;  %v1851_v36 = vpop.f32.mrf.mxu2 }
 0x70f   : > { %v1951_v27 = vpop.f32.mrf.mxu1 }
 0x710   : > { %v1991_v7 = vpack.c.bf16 %v1951_v27, %v1951_v27 }
 0x712   : > { %v1967_v1 = vpop.f32.mrf.mxu3  ;;  %v2031_v13 = vunpack.c.l.b16 %v1991_v7 }
 0x713   : > { %v1994_v48 = vpack.c.bf16 %v1967_v1, %v1967_v1 }
 0x715   : > { %v2087_v6 = vunpack.c.l.b16 %v1994_v48 }
 0x717   : > { %v2094_v45 = vpack.c.b16 %v2087_v6, %v2086_v25  ;;  %v1953_v59 = vpop.f32.mrf.mxu1  ;;  %v1853_v25 = vpop.f32.mrf.mxu2 }
 0x718   : > { %v1992_v50 = vpack.c.bf16 %v1953_v59, %v1953_v59  ;;  %v7491_v59 = vpop.f32.mrf.mxu0 }
 0x719   : > { %5763 = vmatmul.msk.bf16.vlgmr.msrb.gmra.mxu0 %vm536_vm2, %v2094_v45 }
 0x71a   : > { %v1970_v63 = vpop.f32.mrf.mxu3  ;;  %v2032_v3 = vunpack.c.l.b16 %v1992_v50 }
 0x71b   : > { %v1995_v28 = vpack.c.bf16 %v1970_v63, %v1970_v63 }
 0x71c   : > { %v2036_v29 = vpack.c.b16 %v2032_v3, %v2031_v13 }
 0x71d   : > { %v2088_v47 = vunpack.c.l.b16 %v1995_v28 }
 0x71e   : > { %5762 = vmatmul.msk.bf16.gmra.mxu2 %vm536_vm2, %v2036_v29 }
 0x71f   : > { %v1856_v63 = vpop.f32.mrf.mxu2 }
 0x720   : > { %v7494_v50 = vpop.f32.mrf.mxu0 }
 0x722   : > { %v1972_v18 = vpop.f32.mrf.mxu3 }
 0x723   : > { %v1996_v41 = vpack.c.bf16 %v1972_v18, %v1972_v18 }
 0x725   : > { %v2089_v37 = vunpack.c.l.b16 %v1996_v41 }
 0x727   : > { %v2095_v62 = vpack.c.b16 %v2089_v37, %v2088_v47  ;;  %v1858_v13 = vpop.f32.mrf.mxu2 }
 0x728   : > { %v7496_v3 = vpop.f32.mrf.mxu0 }
 0x729   : > { %5764 = vmatmul.msk.bf16.gmra.mxu0 %vm536_vm2, %v2095_v62 }
 0x72a   : > { %v1975_v55 = vpop.f32.mrf.mxu3 }
 0x72b   : > { %v1997_v56 = vpack.c.bf16 %v1975_v55, %v1975_v55 }
 0x72d   : > { %v2090_v58 = vunpack.c.l.b16 %v1997_v56 }
 0x72f   : > { %v7498_v29 = vpop.f32.mrf.mxu2 }
 0x730   : > { %v7500_v28 = vpop.f32.mrf.mxu0 }
 0x732   : > { %v1977_v38 = vpop.f32.mrf.mxu3 }
 0x733   : > { %v1998_v33 = vpack.c.bf16 %v1977_v38, %v1977_v38 }
 0x735   : > { %v2091_v61 = vunpack.c.l.b16 %v1998_v33  ;;  %v2001_v33 = vmul.f32 %v1846_v11, %v7185_v49 }
 0x737   : > { %v2096_v60 = vpack.c.b16 %v2091_v61, %v2090_v58  ;;  %v7502_v18 = vpop.f32.mrf.mxu2  ;;  %v2002_v61 = vmul.f32 %v1848_v32, %v7192_v57 }
 0x738   : > { %v7504_v41 = vpop.f32.mrf.mxu0 }
 0x739   : > { %5765 = vmatmul.msk.bf16.gmra.mxu0 %vm536_vm2, %v2096_v60 }
 0x73a   : > { %v1980_v2 = vpop.f32.mrf.mxu3 }
 0x73b   : > { %v1999_v27 = vpack.c.bf16 %v1980_v2, %v1980_v2 }
 0x73d   : > { %v2092_v6 = vunpack.c.l.b16 %v1999_v27 }
 0x740   : > { %v7506_v62 = vpop.f32.mrf.mxu0 }
 0x742   : > { %v1982_v1 = vpop.f32.mrf.mxu3 }
 0x743   : > { %v2000_v48 = vpack.c.bf16 %v1982_v1, %v1982_v1 }
 0x745   : > { %v2093_v45 = vunpack.c.l.b16 %v2000_v48 }
 0x747   : > { %v2097_v7 = vpack.c.b16 %v2093_v45, %v2092_v6 }
 0x748   : > { %v7512_v60 = vpop.f32.mrf.mxu0 }
 0x749   : > { %5766 = vmatmul.msk.bf16.gmra.mxu0 %vm536_vm2, %v2097_v7 }
 0x750   : > { %v7522_v32 = vpop.f32.mrf.mxu0 }
 0x771   : > { %v2058_v47 = vpop.f32.mrf.mxu2 }
 0x772   : > { %v2059_v37 = vadd.f32 1e-06, %v2058_v47 }
 0x774   : > { %6123 = vrcp.f32 %v2059_v37 }
 0x779   : > { %v2060_v55 = vpop.f32.mrf.mxu2 }
 0x77a   : > { %v2061_v56 = vadd.f32 1e-06, %v2060_v55  ;;  %v6124_v38 = vpop.eup %6123  ;;  %v2003_v55 = vmul.f32 %v1851_v36, %v7202_v14 }
 0x77b   : > { %v7509_v58 = vmul.f32 %v6124_v38, %v2001_v33  ;;  %v2004_v38 = vmul.f32 %v1853_v25, %v7205_v34 }
 0x77c   : > { %6125 = vrcp.f32 %v2061_v56 }
 0x77d   : > { %v2171_v48 = vpack.c.bf16 %v7509_v58, %v7509_v58 }
 0x77f   : > { %v2195_v7 = vunpack.c.l.b16 %v2171_v48 }
 0x781   : > { %v2063_v2 = vpop.f32.mrf.mxu2 }
 0x782   : > { %v6126_v27 = vpop.eup %6125  ;;  %v2064_v1 = vadd.f32 1e-06, %v2063_v2 }
 0x783   : > { %v7516_v6 = vmul.f32 %v6126_v27, %v2002_v61 }
 0x784   : > { %6127 = vrcp.f32 %v2064_v1 }
 0x785   : > { %v2172_v45 = vpack.c.bf16 %v7516_v6, %v7516_v6 }
 0x787   : > { %v2196_v49 = vunpack.c.l.b16 %v2172_v45 }
 0x789   : > { %v2065_v11 = vpop.f32.mrf.mxu2  ;;  %v7520_v47 = vpack.c.b16 %v2196_v49, %v2195_v7 }
 0x78a   : > { %v2066_v57 = vadd.f32 1e-06, %v2065_v11  ;;  %v6128_v37 = vpop.eup %6127 }
 0x78b   : > { %2219 = vmatmul.bf16.vlgmr.msra.gmra.mxu1 %v7520_v47  ;;  %v7526_v56 = vmul.f32 %v6128_v37, %v2003_v55  ;;  %v2005_v55 = vmul.f32 %v1856_v63, %v7217_v19 }
 0x78c   : > { %6129 = vrcp.f32 %v2066_v57 }
 0x78d   : > { %v2173_v48 = vpack.c.bf16 %v7526_v56, %v7526_v56 }
 0x78f   : > { %v2197_v49 = vunpack.c.l.b16 %v2173_v48 }
 0x791   : > { %v2068_v33 = vpop.f32.mrf.mxu2 }
 0x792   : > { %v6130_v61 = vpop.eup %6129  ;;  %v2069_v2 = vadd.f32 1e-06, %v2068_v33  ;;  %v2009_v33 = vmul.f32 %v7491_v59, %v7220_v5 }
 0x793   : > { %v7529_v27 = vmul.f32 %v6130_v61, %v2004_v38 }
 0x794   : > { %6131 = vrcp.f32 %v2069_v2  ;;  %v2006_v2 = vmul.f32 %v1858_v13, %v7224_v53 }
 0x795   : > { %v2174_v7 = vpack.c.bf16 %v7529_v27, %v7529_v27 }
 0x796   : > { %v2119_v1 = vpop.f32.mrf.mxu0 }
 0x797   : > { %v2120_v45 = vadd.f32 1e-06, %v2119_v1  ;;  %v2198_v14 = vunpack.c.l.b16 %v2174_v7 }
 0x799   : > { %6133 = vrcp.f32 %v2120_v45  ;;  %v2070_v36 = vpop.f32.mrf.mxu2  ;;  %v7535_v11 = vpack.c.b16 %v2198_v14, %v2197_v49  ;;  %v2010_v49 = vmul.f32 %v7494_v50, %v7230_v10 }
 0x79a   : > { %v2071_v34 = vadd.f32 1e-06, %v2070_v36  ;;  %v6132_v57 = vpop.eup %6131 }
 0x79b   : > { %2224 = vmatmul.bf16.gmra.mxu1 %v7535_v11  ;;  %v7541_v61 = vmul.f32 %v6132_v57, %v2005_v55 }
 0x79c   : > { %6135 = vrcp.f32 %v2071_v34 }
 0x79d   : > { %v2175_v63 = vpack.c.bf16 %v7541_v61, %v7541_v61 }
 0x79e   : > { %v2121_v25 = vpop.f32.mrf.mxu0 }
 0x79f   : > { %v2122_v37 = vadd.f32 1e-06, %v2121_v25  ;;  %v6134_v38 = vpop.eup %6133  ;;  %v2199_v50 = vunpack.c.l.b16 %v2175_v63 }
 0x7a0   : > { %v7544_v1 = vmul.f32 %v6134_v38, %v2009_v33 }
 0x7a1   : > { %6137 = vrcp.f32 %v2122_v37  ;;  %v2073_v48 = vpop.f32.mrf.mxu2 }
 0x7a2   : > { %v6136_v45 = vpop.eup %6135  ;;  %v2074_v7 = vadd.f32 1e-06, %v2073_v48  ;;  %v2179_v59 = vpack.c.bf16 %v7544_v1, %v7544_v1 }
 0x7a3   : > { %v7548_v14 = vmul.f32 %v6136_v45, %v2006_v2 }
 0x7a4   : > { %6139 = vrcp.f32 %v2074_v7  ;;  %v2248_v25 = vunpack.c.l.b16 %v2179_v59  ;;  %v2007_v7 = vmul.f32 %v7498_v29, %v7246_v26 }
 0x7a5   : > { %v2176_v13 = vpack.c.bf16 %v7548_v14, %v7548_v14 }
 0x7a6   : > { %v2124_v19 = vpop.f32.mrf.mxu0 }
 0x7a7   : > { %v6138_v36 = vpop.eup %6137  ;;  %v2125_v5 = vadd.f32 1e-06, %v2124_v19  ;;  %v2200_v34 = vunpack.c.l.b16 %v2176_v13  ;;  %v2011_v19 = vmul.f32 %v7496_v3, %v7250_v24  ;;  %v2012_v13 = vmul.f32 %v7500_v28, %v7258_v21 }
 0x7a8   : > { %v7554_v53 = vmul.f32 %v6138_v36, %v2010_v49  ;;  %v2008_v36 = vmul.f32 %v7502_v18, %v7254_v17 }
 0x7a9   : > { %6141 = vrcp.f32 %v2125_v5  ;;  %v2075_v37 = vpop.f32.mrf.mxu2  ;;  %v7560_v55 = vpack.c.b16 %v2200_v34, %v2199_v50 }
 0x7aa   : > { %v2180_v10 = vpack.c.bf16 %v7554_v53, %v7554_v53  ;;  %v2076_v38 = vadd.f32 1e-06, %v2075_v37  ;;  %v6140_v48 = vpop.eup %6139 }
 0x7ab   : > { %2229 = vmatmul.bf16.gmra.mxu1 %v7560_v55  ;;  %v7570_v63 = vmul.f32 %v6140_v48, %v2007_v7  ;;  %v2013_v7 = vmul.f32 %v7504_v41, %v7268_v0 }
 0x7ac   : > { %v2249_v57 = vunpack.c.l.b16 %v2180_v10  ;;  %6143 = vrcp.f32 %v2076_v38 }
 0x7ad   : > { %v2177_v29 = vpack.c.bf16 %v7570_v63, %v7570_v63 }
 0x7ae   : > { %v2126_v33 = vpop.f32.mrf.mxu0  ;;  %v7563_v2 = vpack.c.b16 %v2249_v57, %v2248_v25 }
 0x7af   : > { %v2127_v45 = vadd.f32 1e-06, %v2126_v33  ;;  %v6142_v49 = vpop.eup %6141  ;;  %v2201_v18 = vunpack.c.l.b16 %v2177_v29 }
 0x7b0   : > { %2272 = vmatmul.bf16.vlgmr.msrb.gmra.mxu3 %v7563_v2  ;;  %v7574_v5 = vmul.f32 %v6142_v49, %v2011_v19  ;;  %v2014_v19 = vmul.f32 %v7506_v62, %v7273_v46 }
 0x7b1   : > { %6145 = vrcp.f32 %v2127_v45 }
 0x7b2   : > { %v6144_v59 = vpop.eup %6143  ;;  %v2181_v17 = vpack.c.bf16 %v7574_v5, %v7574_v5 }
 0x7b3   : > { %v7578_v10 = vmul.f32 %v6144_v59, %v2008_v36 }
 0x7b4   : > { %v2250_v57 = vunpack.c.l.b16 %v2181_v17  ;;  %v2015_v17 = vmul.f32 %v7512_v60, %v7282_v52 }
 0x7b5   : > { %v2178_v3 = vpack.c.bf16 %v7578_v10, %v7578_v10 }
 0x7b6   : > { %v2129_v26 = vpop.f32.mrf.mxu0 }
 0x7b7   : > { %v6146_v50 = vpop.eup %6145  ;;  %v2130_v34 = vadd.f32 1e-06, %v2129_v26  ;;  %v2202_v25 = vunpack.c.l.b16 %v2178_v3 }
 0x7b8   : > { %v7582_v24 = vmul.f32 %v6146_v50, %v2012_v13 }
 0x7b9   : > { %6147 = vrcp.f32 %v2130_v34  ;;  %v2206_v28 = vpack.c.b16 %v2202_v25, %v2201_v18  ;;  %v2016_v25 = vmul.f32 %v7522_v32, %v7288_v51 }
 0x7ba   : > { %v2182_v21 = vpack.c.bf16 %v7582_v24, %v7582_v24 }
 0x7bb   : > { %2234 = vmatmul.bf16.gmra.mxu1 %v2206_v28  ;;  %2297 = vmatpush.bf16.xpose.msra.mxu2 %v2206_v28 }
 0x7bc   : > { %v2251_v37 = vunpack.c.l.b16 %v2182_v21 }
 0x7be   : > { %v2131_v38 = vpop.f32.mrf.mxu0  ;;  %v2257_v33 = vpack.c.b16 %v2251_v37, %v2250_v57 }
 0x7bf   : > { %v2132_v48 = vadd.f32 1e-06, %v2131_v38  ;;  %v6148_v45 = vpop.eup %6147 }
 0x7c0   : > { %2277 = vmatmul.bf16.gmra.mxu3 %v2257_v33  ;;  %v7592_v49 = vmul.f32 %v6148_v45, %v2013_v7 }
 0x7c1   : > { %6149 = vrcp.f32 %v2132_v48 }
 0x7c2   : > { %v2183_v29 = vpack.c.bf16 %v7592_v49, %v7592_v49 }
 0x7c3   : > { %2298 = vmatpush.bf16.xpose.msra.mxu2 %v7560_v55 }
 0x7c4   : > { %v2252_v0 = vunpack.c.l.b16 %v2183_v29 }
 0x7c6   : > { %v2134_v36 = vpop.f32.mrf.mxu0 }
 0x7c7   : > { %v6150_v59 = vpop.eup %6149  ;;  %v2135_v13 = vadd.f32 1e-06, %v2134_v36 }
 0x7c8   : > { %v7597_v26 = vmul.f32 %v6150_v59, %v2014_v19 }
 0x7c9   : > { %6151 = vrcp.f32 %v2135_v13 }
 0x7ca   : > { %v2184_v50 = vpack.c.bf16 %v7597_v26, %v7597_v26 }
 0x7cb   : > { %2299 = vmatpush.bf16.xpose.msra.mxu2 %v7535_v11 }
 0x7cc   : > { %v2253_v41 = vunpack.c.l.b16 %v2184_v50 }
 0x7ce   : > { %v2136_v34 = vpop.f32.mrf.mxu0  ;;  %v2258_v46 = vpack.c.b16 %v2253_v41, %v2252_v0 }
 0x7cf   : > { %v2137_v62 = vadd.f32 1e-06, %v2136_v34  ;;  %v6152_v3 = vpop.eup %6151 }
 0x7d0   : > { %2282 = vmatmul.bf16.gmra.mxu3 %v2258_v46  ;;  %v7606_v18 = vmul.f32 %v6152_v3, %v2015_v17 }
 0x7d1   : > { %6153 = vrcp.f32 %v2137_v62 }
 0x7d2   : > { %v2185_v37 = vpack.c.bf16 %v7606_v18, %v7606_v18 }
 0x7d3   : > { %2300 = vmatpush.bf16.xpose.msra.mxu2 %v7520_v47 }
 0x7d4   : > { %v2254_v48 = vunpack.c.l.b16 %v2185_v37 }
 0x7d7   : > { %v6154_v21 = vpop.eup %6153 }
 0x7d8   : > { %v7612_v57 = vmul.f32 %v6154_v21, %v2016_v25 }
 0x7da   : > { %v2186_v38 = vpack.c.bf16 %v7612_v57, %v7612_v57  ;;  %2301 = vmatmul.bf16.vlgmr.msra.gmra.mxu2 %v7520_v47 }
 0x7db   : > { %2600 = vmatpush.bf16.msrb.mxu2 %v6590_v20 }
 0x7dc   : > { %v2255_v52 = vunpack.c.l.b16 %v2186_v38 }
 0x7de   : > { %v2259_v60 = vpack.c.b16 %v2255_v52, %v2254_v48 }
 0x7df   : > { %2809 = vmatpush.bf16.msra.mxu2 %v2206_v28 }
 0x7e0   : > { %2287 = vmatmul.bf16.gmra.mxu3 %v2259_v60  ;;  %2326 = vmatpush.bf16.xpose.msra.mxu0 %v2259_v60 }
 0x7e3   : > { %2810 = vmatpush.bf16.msra.mxu2 %v7560_v55 }
 0x7e7   : > { %2811 = vmatpush.bf16.msra.mxu2 %v7535_v11 }
 0x7e8   : > { %2327 = vmatpush.bf16.xpose.msra.mxu0 %v2258_v46 }
 0x7ea   : > { %2306 = vmatmul.bf16.gmra.mxu2 %v7535_v11 }
 0x7eb   : > { %2812 = vmatpush.bf16.msra.mxu2 %v7520_v47 }
 0x7f0   : > { %2328 = vmatpush.bf16.xpose.msra.mxu0 %v2257_v33 }
 0x7f8   : > { %2329 = vmatpush.bf16.xpose.msra.mxu0 %v7563_v2 }
 0x7fa   : > { %2311 = vmatmul.bf16.gmra.mxu2 %v7560_v55 }
 0x7ff   : > { %2330 = vmatmul.bf16.vlgmr.msra.gmra.mxu0 %v7563_v2 }
 0x800   : > { %2661 = vmatpush.bf16.msrb.mxu0 %v6597_v23 }
 0x804   : > { %2870 = vmatpush.bf16.msra.mxu0 %v2259_v60 }
 0x808   : > { %2871 = vmatpush.bf16.msra.mxu0 %v2258_v46 }
 0x80a   : > { %2316 = vmatmul.bf16.gmra.mxu2 %v2206_v28 }
 0x80c   : > { %2872 = vmatpush.bf16.msra.mxu0 %v2257_v33 }
 0x80f   : > { %2335 = vmatmul.bf16.gmra.mxu0 %v2257_v33 }
 0x810   : > { %2873 = vmatpush.bf16.msra.mxu0 %v7563_v2 }
 0x81f   : > { %2340 = vmatmul.bf16.gmra.mxu0 %v2258_v46 }
 0x82f   : > { %2345 = vmatmul.bf16.gmra.mxu0 %v2259_v60 }
 0x85d   : > { %v2302_v51 = vpop.f32.mrf.mxu2 }
 0x85e   : > { %v2351_v47 = vpack.c.bf16 %v2302_v51, %v2302_v51 }
 0x860   : > { %v2391_v45 = vunpack.c.l.b16 %v2351_v47 }
 0x865   : > { %v2304_v32 = vpop.f32.mrf.mxu2 }
 0x866   : > { %v2352_v11 = vpack.c.bf16 %v2304_v32, %v2304_v32 }
 0x868   : > { %v2392_v7 = vunpack.c.l.b16 %v2352_v11 }
 0x86a   : > { %v2399_v19 = vpack.c.b16 %v2392_v7, %v2391_v45 }
 0x86c   : > { %5767 = vmatmul.msk.bf16.vlgmr.msrb.gmra.mxu1 %vm536_vm2, %v2399_v19 }
 0x86d   : > { %v2307_v55 = vpop.f32.mrf.mxu2 }
 0x86e   : > { %v2353_v36 = vpack.c.bf16 %v2307_v55, %v2307_v55 }
 0x870   : > { %v2393_v29 = vunpack.c.l.b16 %v2353_v36 }
 0x875   : > { %v2309_v59 = vpop.f32.mrf.mxu2 }
 0x876   : > { %v2354_v13 = vpack.c.bf16 %v2309_v59, %v2309_v59 }
 0x878   : > { %v2394_v50 = vunpack.c.l.b16 %v2354_v13 }
 0x87a   : > { %v2400_v28 = vpack.c.b16 %v2394_v50, %v2393_v29 }
 0x87c   : > { %v2331_v2 = vpop.f32.mrf.mxu0  ;;  %5768 = vmatmul.msk.bf16.gmra.mxu1 %vm536_vm2, %v2400_v28 }
 0x87d   : > { %v2312_v33 = vpop.f32.mrf.mxu2  ;;  %v2359_v0 = vpack.c.bf16 %v2331_v2, %v2331_v2  ;;  %v2220_v2 = vpop.f32.mrf.mxu1 }
 0x87e   : > { %v2355_v62 = vpack.c.bf16 %v2312_v33, %v2312_v33 }
 0x87f   : > { %v2456_v46 = vunpack.c.l.b16 %v2359_v0 }
 0x880   : > { %v2395_v37 = vunpack.c.l.b16 %v2355_v62 }
 0x884   : > { %v2333_v41 = vpop.f32.mrf.mxu0 }
 0x885   : > { %v2360_v34 = vpack.c.bf16 %v2333_v41, %v2333_v41  ;;  %v2314_v17 = vpop.f32.mrf.mxu2 }
 0x886   : > { %v2356_v21 = vpack.c.bf16 %v2314_v17, %v2314_v17 }
 0x887   : > { %v2457_v3 = vunpack.c.l.b16 %v2360_v34 }
 0x888   : > { %v2396_v38 = vunpack.c.l.b16 %v2356_v21 }
 0x889   : > { %v2464_v25 = vpack.c.b16 %v2457_v3, %v2456_v46  ;;  %v2222_v46 = vpop.f32.mrf.mxu1 }
 0x88a   : > { %v2401_v52 = vpack.c.b16 %v2396_v38, %v2395_v37 }
 0x88b   : > { %5771 = vmatmul.msk.bf16.vlgmr.msra.gmra.mxu3 %vm536_vm2, %v2464_v25 }
 0x88c   : > { %v2336_v48 = vpop.f32.mrf.mxu0  ;;  %5769 = vmatmul.msk.bf16.gmra.mxu1 %vm536_vm2, %v2401_v52 }
 0x88d   : > { %v2317_v60 = vpop.f32.mrf.mxu2  ;;  %v2361_v51 = vpack.c.bf16 %v2336_v48, %v2336_v48 }
 0x88e   : > { %v2357_v45 = vpack.c.bf16 %v2317_v60, %v2317_v60 }
 0x88f   : > { %v2458_v11 = vunpack.c.l.b16 %v2361_v51  ;;  %v7636_v51 = vpop.f32.mrf.mxu3 }
 0x890   : > { %v2397_v59 = vunpack.c.l.b16 %v2357_v45 }
 0x891   : > { %v2225_v17 = vpop.f32.mrf.mxu1 }
 0x894   : > { %v2338_v47 = vpop.f32.mrf.mxu0 }
 0x895   : > { %v2362_v32 = vpack.c.bf16 %v2338_v47, %v2338_v47  ;;  %v2319_v19 = vpop.f32.mrf.mxu2 }
 0x896   : > { %v2358_v36 = vpack.c.bf16 %v2319_v19, %v2319_v19 }
 0x897   : > { %v2459_v7 = vunpack.c.l.b16 %v2362_v32  ;;  %v7638_v32 = vpop.f32.mrf.mxu3 }
 0x898   : > { %v2398_v13 = vunpack.c.l.b16 %v2358_v36 }
 0x899   : > { %v2465_v55 = vpack.c.b16 %v2459_v7, %v2458_v11  ;;  %v2227_v60 = vpop.f32.mrf.mxu1 }
 0x89a   : > { %v2402_v50 = vpack.c.b16 %v2398_v13, %v2397_v59 }
 0x89b   : > { %5772 = vmatmul.msk.bf16.gmra.mxu3 %vm536_vm2, %v2465_v55 }
 0x89c   : > { %v2341_v29 = vpop.f32.mrf.mxu0  ;;  %5770 = vmatmul.msk.bf16.gmra.mxu1 %vm536_vm2, %v2402_v50 }
 0x89d   : > { %v2363_v28 = vpack.c.bf16 %v2341_v29, %v2341_v29 }
 0x89f   : > { %v2460_v41 = vunpack.c.l.b16 %v2363_v28  ;;  %v7640_v45 = vpop.f32.mrf.mxu3 }
 0x8a1   : > { %v2230_v47 = vpop.f32.mrf.mxu1 }
 0x8a4   : > { %v2343_v33 = vpop.f32.mrf.mxu0 }
 0x8a5   : > { %v2364_v0 = vpack.c.bf16 %v2343_v33, %v2343_v33 }
 0x8a7   : > { %v2461_v34 = vunpack.c.l.b16 %v2364_v0  ;;  %v7644_v19 = vpop.f32.mrf.mxu3  ;;  %v2367_v0 = vmul.f32 %v2220_v2, %v7329_v12 }
 0x8a9   : > { %v2466_v62 = vpack.c.b16 %v2461_v34, %v2460_v41  ;;  %v2232_v11 = vpop.f32.mrf.mxu1  ;;  %v2368_v34 = vmul.f32 %v2222_v46, %v7336_v40 }
 0x8ab   : > { %5773 = vmatmul.msk.bf16.gmra.mxu3 %vm536_vm2, %v2466_v62 }
 0x8ac   : > { %v2346_v3 = vpop.f32.mrf.mxu0 }
 0x8ad   : > { %v2365_v25 = vpack.c.bf16 %v2346_v3, %v2346_v3 }
 0x8af   : > { %v2462_v38 = vunpack.c.l.b16 %v2365_v25  ;;  %v7648_v36 = vpop.f32.mrf.mxu3 }
 0x8b1   : > { %v7642_v7 = vpop.f32.mrf.mxu1 }
 0x8b4   : > { %v2348_v21 = vpop.f32.mrf.mxu0 }
 0x8b5   : > { %v2366_v37 = vpack.c.bf16 %v2348_v21, %v2348_v21 }
 0x8b7   : > { %v2463_v48 = vunpack.c.l.b16 %v2366_v37  ;;  %v7650_v29 = vpop.f32.mrf.mxu3 }
 0x8b9   : > { %v2467_v52 = vpack.c.b16 %v2463_v48, %v2462_v38  ;;  %v7646_v55 = vpop.f32.mrf.mxu1 }
 0x8bb   : > { %5774 = vmatmul.msk.bf16.gmra.mxu3 %vm536_vm2, %v2467_v52 }
 0x8bf   : > { %v7656_v62 = vpop.f32.mrf.mxu3 }
 0x8c7   : > { %v7666_v46 = vpop.f32.mrf.mxu3 }
 0x8e9   : > { %v2428_v59 = vpop.f32.mrf.mxu1 }
 0x8ea   : > { %v2429_v13 = vadd.f32 1e-06, %v2428_v59 }
 0x8ec   : > { %6155 = vrcp.f32 %v2429_v13 }
 0x8f1   : > { %v2430_v50 = vpop.f32.mrf.mxu1 }
 0x8f2   : > { %v2431_v28 = vadd.f32 1e-06, %v2430_v50  ;;  %v6156_v33 = vpop.eup %6155  ;;  %v2369_v50 = vmul.f32 %v2225_v17, %v7347_v4 }
 0x8f3   : > { %v7653_v41 = vmul.f32 %v6156_v33, %v2367_v0  ;;  %v2370_v33 = vmul.f32 %v2227_v60, %v7350_v8 }
 0x8f4   : > { %6157 = vrcp.f32 %v2431_v28 }
 0x8f5   : > { %v2545_v37 = vpack.c.bf16 %v7653_v41, %v7653_v41 }
 0x8f7   : > { %v2569_v52 = vunpack.c.l.b16 %v2545_v37 }
 0x8f9   : > { %v2433_v3 = vpop.f32.mrf.mxu1 }
 0x8fa   : > { %v6158_v25 = vpop.eup %6157  ;;  %v2434_v21 = vadd.f32 1e-06, %v2433_v3 }
 0x8fb   : > { %v7660_v38 = vmul.f32 %v6158_v25, %v2368_v34 }
 0x8fc   : > { %6159 = vrcp.f32 %v2434_v21 }
 0x8fd   : > { %v2546_v48 = vpack.c.bf16 %v7660_v38, %v7660_v38 }
 0x8ff   : > { %v2570_v12 = vunpack.c.l.b16 %v2546_v48 }
 0x901   : > { %v7664_v2 = vpack.c.b16 %v2570_v12, %v2569_v52  ;;  %v2435_v59 = vpop.f32.mrf.mxu1 }
 0x902   : > { %v2436_v40 = vadd.f32 1e-06, %v2435_v59  ;;  %v6160_v13 = vpop.eup %6159 }
 0x903   : > { %5775 = vmatmul.msk.bf16.vlgmr.msrb.gmra.mxu2 %vm227_vm1, %v7664_v2  ;;  %v7671_v28 = vmul.f32 %v6160_v13, %v2369_v50  ;;  %v2371_v50 = vmul.f32 %v2230_v47, %v7363_v15 }
 0x904   : > { %6161 = vrcp.f32 %v2436_v40 }
 0x905   : > { %v2547_v37 = vpack.c.bf16 %v7671_v28, %v7671_v28 }
 0x907   : > { %v2571_v12 = vunpack.c.l.b16 %v2547_v37 }
 0x909   : > { %v2438_v0 = vpop.f32.mrf.mxu1 }
 0x90a   : > { %v6162_v34 = vpop.eup %6161  ;;  %v2439_v3 = vadd.f32 1e-06, %v2438_v0  ;;  %v2375_v0 = vmul.f32 %v7636_v51, %v7366_v43 }
 0x90b   : > { %v7674_v25 = vmul.f32 %v6162_v34, %v2370_v33 }
 0x90c   : > { %6163 = vrcp.f32 %v2439_v3  ;;  %v2372_v3 = vmul.f32 %v2232_v11, %v7370_v30 }
 0x90d   : > { %v2548_v52 = vpack.c.bf16 %v7674_v25, %v7674_v25 }
 0x90e   : > { %v2493_v21 = vpop.f32.mrf.mxu3 }
 0x90f   : > { %v2494_v48 = vadd.f32 1e-06, %v2493_v21  ;;  %v2572_v4 = vunpack.c.l.b16 %v2548_v52 }
 0x911   : > { %6165 = vrcp.f32 %v2494_v48  ;;  %v2440_v17 = vpop.f32.mrf.mxu1  ;;  %v7680_v59 = vpack.c.b16 %v2572_v4, %v2571_v12  ;;  %v2376_v12 = vmul.f32 %v7638_v32, %v7376_v35 }
 0x912   : > { %v2441_v8 = vadd.f32 1e-06, %v2440_v17  ;;  %v6164_v40 = vpop.eup %6163 }
 0x913   : > { %5776 = vmatmul.msk.bf16.gmra.mxu2 %vm227_vm1, %v7680_v59  ;;  %v7687_v34 = vmul.f32 %v6164_v40, %v2371_v50 }
 0x914   : > { %6167 = vrcp.f32 %v2441_v8 }
 0x915   : > { %v2549_v47 = vpack.c.bf16 %v7687_v34, %v7687_v34 }
 0x916   : > { %v2495_v60 = vpop.f32.mrf.mxu3 }
 0x917   : > { %v2496_v13 = vadd.f32 1e-06, %v2495_v60  ;;  %v6166_v33 = vpop.eup %6165  ;;  %v2573_v32 = vunpack.c.l.b16 %v2549_v47 }
 0x918   : > { %v7690_v21 = vmul.f32 %v6166_v33, %v2375_v0 }
 0x919   : > { %6169 = vrcp.f32 %v2496_v13  ;;  %v2443_v37 = vpop.f32.mrf.mxu1 }
 0x91a   : > { %v6168_v48 = vpop.eup %6167  ;;  %v2444_v52 = vadd.f32 1e-06, %v2443_v37  ;;  %v2553_v51 = vpack.c.bf16 %v7690_v21, %v7690_v21 }
 0x91b   : > { %v7694_v4 = vmul.f32 %v6168_v48, %v2372_v3 }
 0x91c   : > { %6171 = vrcp.f32 %v2444_v52  ;;  %v2630_v60 = vunpack.c.l.b16 %v2553_v51  ;;  %v2373_v52 = vmul.f32 %v7642_v7, %v7394_v31 }
 0x91d   : > { %v2550_v11 = vpack.c.bf16 %v7694_v4, %v7694_v4 }
 0x91e   : > { %v2498_v15 = vpop.f32.mrf.mxu3 }
 0x91f   : > { %v6170_v17 = vpop.eup %6169  ;;  %v2499_v43 = vadd.f32 1e-06, %v2498_v15  ;;  %v2574_v8 = vunpack.c.l.b16 %v2550_v11  ;;  %v2377_v15 = vmul.f32 %v7640_v45, %v7398_v39  ;;  %v2378_v11 = vmul.f32 %v7644_v19, %v7406_v54 }
 0x920   : > { %v7700_v30 = vmul.f32 %v6170_v17, %v2376_v12  ;;  %v2374_v17 = vmul.f32 %v7646_v55, %v7402_v42 }
 0x921   : > { %6173 = vrcp.f32 %v2499_v43  ;;  %v2445_v13 = vpop.f32.mrf.mxu1  ;;  %v7706_v50 = vpack.c.b16 %v2574_v8, %v2573_v32 }
 0x922   : > { %v2554_v35 = vpack.c.bf16 %v7700_v30, %v7700_v30  ;;  %v2446_v33 = vadd.f32 1e-06, %v2445_v13  ;;  %v6172_v37 = vpop.eup %6171 }
 0x923   : > { %5777 = vmatmul.msk.bf16.gmra.mxu2 %vm227_vm1, %v7706_v50  ;;  %v7718_v47 = vmul.f32 %v6172_v37, %v2373_v52 }
 0x924   : > { %v2631_v40 = vunpack.c.l.b16 %v2554_v35  ;;  %6175 = vrcp.f32 %v2446_v33 }
 0x925   : > { %v2551_v35 = vpack.c.bf16 %v7718_v47, %v7718_v47 }
 0x926   : > { %v7708_v0 = vpack.c.b16 %v2631_v40, %v2630_v60  ;;  %v2500_v3 = vpop.f32.mrf.mxu3 }
 0x927   : > { %v2501_v48 = vadd.f32 1e-06, %v2500_v3  ;;  %v6174_v12 = vpop.eup %6173  ;;  %v2575_v55 = vunpack.c.l.b16 %v2551_v35 }
 0x928   : > { %5779 = vmatmul.msk.bf16.vlgmr.msrb.gmra.mxu0 %vm227_vm1, %v7708_v0  ;;  %v7722_v43 = vmul.f32 %v6174_v12, %v2377_v15  ;;  %v2379_v12 = vmul.f32 %v7648_v36, %v7426_v9 }
 0x929   : > { %6177 = vrcp.f32 %v2501_v48 }
 0x92a   : > { %v6176_v51 = vpop.eup %6175  ;;  %v2555_v42 = vpack.c.bf16 %v7722_v43, %v7722_v43 }
 0x92b   : > { %v7726_v31 = vmul.f32 %v6176_v51, %v2374_v17  ;;  %v2380_v17 = vmul.f32 %v7650_v29, %v7432_v22  ;;  %v2588_v51 = vsel %vm227_vm1, %v7706_v50, 0  ;;  %v2585_v22 = vsel %vm227_vm1, %v7680_v59, 0 }
 0x92c   : > { %v2632_v40 = vunpack.c.l.b16 %v2555_v42 }
 0x92d   : > { %v2552_v45 = vpack.c.bf16 %v7726_v31, %v7726_v31 }
 0x92e   : > { %v2503_v7 = vpop.f32.mrf.mxu3 }
 0x92f   : > { %v6178_v32 = vpop.eup %6177  ;;  %v2504_v8 = vadd.f32 1e-06, %v2503_v7  ;;  %v2576_v60 = vunpack.c.l.b16 %v2552_v45 }
 0x930   : > { %v7730_v39 = vmul.f32 %v6178_v32, %v2378_v11 }
 0x931   : > { %6179 = vrcp.f32 %v2504_v8  ;;  %v7738_v19 = vpack.c.b16 %v2576_v60, %v2575_v55 }
 0x932   : > { %v2556_v54 = vpack.c.bf16 %v7730_v39, %v7730_v39 }
 0x933   : > { %5778 = vmatmul.msk.bf16.gmra.mxu2 %vm227_vm1, %v7738_v19  ;;  %v2591_v33 = vsel %vm227_vm1, %v7738_v19, 0 }
 0x934   : > { %v2633_v13 = vunpack.c.l.b16 %v2556_v54  ;;  %2687 = vmatpush.bf16.xpose.msra.mxu1 %v2591_v33  ;;  %v2381_v54 = vmul.f32 %v7656_v62, %v7443_v44  ;;  %v2582_v33 = vsel %vm227_vm1, %v7664_v2, 0 }
 0x936   : > { %v2505_v3 = vpop.f32.mrf.mxu3  ;;  %v7744_v37 = vpack.c.b16 %v2633_v13, %v2632_v40  ;;  %v2382_v13 = vmul.f32 %v7666_v46, %v7449_v16 }
 0x937   : > { %v2506_v48 = vadd.f32 1e-06, %v2505_v3  ;;  %v6180_v52 = vpop.eup %6179 }
 0x938   : > { %5780 = vmatmul.msk.bf16.gmra.mxu0 %vm227_vm1, %v7744_v37  ;;  %v7750_v15 = vmul.f32 %v6180_v52, %v2379_v12  ;;  %v7776_v52 = vld [vmem:[%s6584_s19] sm:$0xf] }
 0x939   : > { %6181 = vrcp.f32 %v2506_v48 }
 0x93a   : > { %v2557_v8 = vpack.c.bf16 %v7750_v15, %v7750_v15 }
 0x93c   : > { %2688 = vmatpush.bf16.xpose.msra.mxu1 %v2588_v51  ;;  %v2634_v36 = vunpack.c.l.b16 %v2557_v8 }
 0x93e   : > { %v2508_v11 = vpop.f32.mrf.mxu3 }
 0x93f   : > { %v6182_v7 = vpop.eup %6181  ;;  %v2509_v35 = vadd.f32 1e-06, %v2508_v11  ;;  %v2646_v11 = vsel %vm227_vm1, %v7744_v37, 0 }
 0x940   : > { %v7756_v32 = vmul.f32 %v6182_v7, %v2380_v17  ;;  %v2643_v7 = vsel %vm227_vm1, %v7708_v0, 0 }
 0x941   : > { %6183 = vrcp.f32 %v2509_v35  ;;  %v7799_v35 = vld [vmem:[%s6584_s19 + $0x4] sm:$0xf] }
 0x942   : > { %v2558_v9 = vpack.c.bf16 %v7756_v32, %v7756_v32 }
 0x944   : > { %v2635_v45 = vunpack.c.l.b16 %v2558_v9  ;;  %2689 = vmatpush.bf16.xpose.msra.mxu1 %v2585_v22 }
 0x946   : > { %v2510_v29 = vpop.f32.mrf.mxu3  ;;  %v2640_v42 = vpack.c.b16 %v2635_v45, %v2634_v36 }
 0x947   : > { %v2511_v55 = vadd.f32 1e-06, %v2510_v29  ;;  %v6184_v60 = vpop.eup %6183 }
 0x948   : > { %5781 = vmatmul.msk.bf16.gmra.mxu0 %vm227_vm1, %v2640_v42  ;;  %v7767_v40 = vmul.f32 %v6184_v60, %v2381_v54  ;;  %v2649_v51 = vsel %vm227_vm1, %v2640_v42, 0 }
 0x949   : > { %6185 = vrcp.f32 %v2511_v55 }
 0x94a   : > { %v2559_v12 = vpack.c.bf16 %v7767_v40, %v7767_v40 }
 0x94c   : > { %2690 = vmatpush.bf16.xpose.msra.mxu1 %v2582_v33  ;;  %v2636_v62 = vunpack.c.l.b16 %v2559_v12 }
 0x94f   : > { %v6186_v3 = vpop.eup %6185 }
 0x950   : > { %v7773_v48 = vmul.f32 %v6186_v3, %v2382_v13 }
 0x952   : > { %v2560_v44 = vpack.c.bf16 %v7773_v48, %v7773_v48 }
 0x953   : > { %5783 = vmatmul.msk.bf16.vlgmr.msra.gmra.mxu1 %vm227_vm1, %v7664_v2 }
 0x954   : > { %2974 = vmatpush.bf16.xpose.msrb.mxu1 %v7776_v52  ;;  %v2637_v17 = vunpack.c.l.b16 %v2560_v44 }
 0x956   : > { %v2641_v16 = vpack.c.b16 %v2637_v17, %v2636_v62 }
 0x958   : > { %5782 = vmatmul.msk.bf16.gmra.mxu0 %vm227_vm1, %v2641_v16  ;;  %v2652_v46 = vsel %vm227_vm1, %v2641_v16, 0 }
 0x959   : > { %2716 = vmatpush.bf16.xpose.msrb.mxu3 %v2652_v46 }
 0x95c   : > { %3179 = vmatpush.bf16.msra.mxu1 %v7738_v19 }
 0x960   : > { %3180 = vmatpush.bf16.msra.mxu1 %v7706_v50 }
 0x961   : > { %2717 = vmatpush.bf16.xpose.msrb.mxu3 %v2649_v51 }
 0x963   : > { %5784 = vmatmul.msk.bf16.gmra.mxu1 %vm227_vm1, %v7680_v59 }
 0x964   : > { %3181 = vmatpush.bf16.msra.mxu1 %v7680_v59 }
 0x968   : > { %3182 = vmatpush.bf16.msra.mxu1 %v7664_v2 }
 0x969   : > { %2718 = vmatpush.bf16.xpose.msrb.mxu3 %v2646_v11 }
 0x971   : > { %2719 = vmatpush.bf16.xpose.msrb.mxu3 %v2643_v7 }
 0x973   : > { %5785 = vmatmul.msk.bf16.gmra.mxu1 %vm227_vm1, %v7706_v50 }
 0x978   : > { %5787 = vmatmul.msk.bf16.vlgmr.msrb.gmra.mxu3 %vm227_vm1, %v7708_v0 }
 0x979   : > { %3027 = vmatpush.bf16.xpose.msra.mxu3 %v7799_v35 }
 0x981   : > { %3244 = vmatpush.bf16.msrb.mxu3 %v2641_v16 }
 0x983   : > { %5786 = vmatmul.msk.bf16.gmra.mxu1 %vm227_vm1, %v7738_v19 }
 0x985   : > { %3245 = vmatpush.bf16.msrb.mxu3 %v2640_v42 }
 0x988   : > { %5788 = vmatmul.msk.bf16.gmra.mxu3 %vm227_vm1, %v7744_v37 }
 0x989   : > { %3246 = vmatpush.bf16.msrb.mxu3 %v7744_v37 }
 0x98d   : > { %3247 = vmatpush.bf16.msrb.mxu3 %v7708_v0 }
 0x998   : > { %5789 = vmatmul.msk.bf16.gmra.mxu3 %vm227_vm1, %v2640_v42 }
 0x9a8   : > { %5790 = vmatmul.msk.bf16.gmra.mxu3 %vm227_vm1, %v2641_v16 }
 0x9d0   : > { %v2692_v2 = vpop.f32.mrf.mxu1 }
 0x9d1   : > { %v2741_v59 = vpack.c.bf16 %v2692_v2, %v2692_v2 }
 0x9d3   : > { %v2781_v9 = vunpack.c.l.b16 %v2741_v59 }
 0x9d8   : > { %v2694_v50 = vpop.f32.mrf.mxu1 }
 0x9d9   : > { %v2742_v8 = vpack.c.bf16 %v2694_v50, %v2694_v50 }
 0x9db   : > { %v2782_v36 = vunpack.c.l.b16 %v2742_v8 }
 0x9dd   : > { %v2789_v45 = vpack.c.b16 %v2782_v36, %v2781_v9 }
 0x9df   : > { %5791 = vmatmul.msk.bf16.vlgmr.msra.gmra.mxu2 %vm536_vm2, %v2789_v45 }
 0x9e0   : > { %v2697_v0 = vpop.f32.mrf.mxu1 }
 0x9e1   : > { %v2743_v22 = vpack.c.bf16 %v2697_v0, %v2697_v0 }
 0x9e3   : > { %v2783_v55 = vunpack.c.l.b16 %v2743_v22 }
 0x9e8   : > { %v2699_v29 = vpop.f32.mrf.mxu1 }
 0x9e9   : > { %v2744_v19 = vpack.c.bf16 %v2699_v29, %v2699_v29 }
 0x9eb   : > { %v2784_v60 = vunpack.c.l.b16 %v2744_v19 }
 0x9ed   : > { %v2790_v37 = vpack.c.b16 %v2784_v60, %v2783_v55 }
 0x9ef   : > { %5792 = vmatmul.msk.bf16.gmra.mxu2 %vm536_vm2, %v2790_v37  ;;  %v2602_v37 = vpop.f32.mrf.mxu2 }
 0x9f0   : > { %v2702_v42 = vpop.f32.mrf.mxu1 }
 0x9f1   : > { %v2745_v54 = vpack.c.bf16 %v2702_v42, %v2702_v42 }
 0x9f3   : > { %v2785_v12 = vunpack.c.l.b16 %v2745_v54 }
 0x9f8   : > { %v2704_v13 = vpop.f32.mrf.mxu1 }
 0x9f9   : > { %v2746_v3 = vpack.c.bf16 %v2704_v13, %v2704_v13  ;;  %v2604_v13 = vpop.f32.mrf.mxu2 }
 0x9fb   : > { %v2721_v33 = vpop.f32.mrf.mxu3  ;;  %v2786_v44 = vunpack.c.l.b16 %v2746_v3 }
 0x9fc   : > { %v2749_v17 = vpack.c.bf16 %v2721_v33, %v2721_v33 }
 0x9fd   : > { %v2791_v62 = vpack.c.b16 %v2786_v44, %v2785_v12 }
 0x9fe   : > { %v2842_v11 = vunpack.c.l.b16 %v2749_v17 }
 0x9ff   : > { %5793 = vmatmul.msk.bf16.gmra.mxu2 %vm536_vm2, %v2791_v62 }
 0xa00   : > { %v2707_v16 = vpop.f32.mrf.mxu1 }
 0xa01   : > { %v2747_v59 = vpack.c.bf16 %v2707_v16, %v2707_v16  ;;  %v2607_v16 = vpop.f32.mrf.mxu2 }
 0xa03   : > { %v2723_v46 = vpop.f32.mrf.mxu3  ;;  %v2787_v36 = vunpack.c.l.b16 %v2747_v59 }
 0xa04   : > { %v2750_v51 = vpack.c.bf16 %v2723_v46, %v2723_v46 }
 0xa06   : > { %v2843_v7 = vunpack.c.l.b16 %v2750_v51 }
 0xa08   : > { %v2850_v2 = vpack.c.b16 %v2843_v7, %v2842_v11  ;;  %v2709_v50 = vpop.f32.mrf.mxu1 }
 0xa09   : > { %v2748_v9 = vpack.c.bf16 %v2709_v50, %v2709_v50 }
 0xa0a   : > { %5795 = vmatmul.msk.bf16.vlgmr.msra.gmra.mxu0 %vm536_vm2, %v2850_v2  ;;  %v2609_v2 = vpop.f32.mrf.mxu2 }
 0xa0b   : > { %v2726_v8 = vpop.f32.mrf.mxu3  ;;  %v2788_v45 = vunpack.c.l.b16 %v2748_v9  ;;  %v7821_v9 = vpop.f32.mrf.mxu0 }
 0xa0c   : > { %v2751_v22 = vpack.c.bf16 %v2726_v8, %v2726_v8 }
 0xa0d   : > { %v2792_v0 = vpack.c.b16 %v2788_v45, %v2787_v36 }
 0xa0e   : > { %v2844_v55 = vunpack.c.l.b16 %v2751_v22 }
 0xa0f   : > { %5794 = vmatmul.msk.bf16.gmra.mxu2 %vm536_vm2, %v2792_v0 }
 0xa12   : > { %v2612_v36 = vpop.f32.mrf.mxu2 }
 0xa13   : > { %v2728_v29 = vpop.f32.mrf.mxu3  ;;  %v7824_v45 = vpop.f32.mrf.mxu0 }
 0xa14   : > { %v2752_v19 = vpack.c.bf16 %v2728_v29, %v2728_v29 }
 0xa16   : > { %v2845_v60 = vunpack.c.l.b16 %v2752_v19 }
 0xa18   : > { %v2851_v42 = vpack.c.b16 %v2845_v60, %v2844_v55 }
 0xa1a   : > { %5796 = vmatmul.msk.bf16.gmra.mxu0 %vm536_vm2, %v2851_v42  ;;  %v2614_v0 = vpop.f32.mrf.mxu2 }
 0xa1b   : > { %v2731_v54 = vpop.f32.mrf.mxu3  ;;  %v7826_v22 = vpop.f32.mrf.mxu0 }
 0xa1c   : > { %v2753_v33 = vpack.c.bf16 %v2731_v54, %v2731_v54 }
 0xa1e   : > { %v2846_v44 = vunpack.c.l.b16 %v2753_v33 }
 0xa22   : > { %v7828_v29 = vpop.f32.mrf.mxu2 }
 0xa23   : > { %v2733_v3 = vpop.f32.mrf.mxu3  ;;  %v7830_v19 = vpop.f32.mrf.mxu0 }
 0xa24   : > { %v2754_v12 = vpack.c.bf16 %v2733_v3, %v2733_v3 }
 0xa26   : > { %v2847_v62 = vunpack.c.l.b16 %v2754_v12 }
 0xa28   : > { %v2852_v17 = vpack.c.b16 %v2847_v62, %v2846_v44  ;;  %v2757_v62 = vmul.f32 %v2602_v37, %v7509_v58 }
 0xa2a   : > { %5797 = vmatmul.msk.bf16.gmra.mxu0 %vm536_vm2, %v2852_v17  ;;  %v7832_v55 = vpop.f32.mrf.mxu2 }
 0xa2b   : > { %v2736_v46 = vpop.f32.mrf.mxu3  ;;  %v7834_v60 = vpop.f32.mrf.mxu0 }
 0xa2c   : > { %v2755_v51 = vpack.c.bf16 %v2736_v46, %v2736_v46  ;;  %v2758_v46 = vmul.f32 %v2604_v13, %v7516_v6 }
 0xa2e   : > { %v2848_v59 = vunpack.c.l.b16 %v2755_v51 }
 0xa33   : > { %v2738_v11 = vpop.f32.mrf.mxu3  ;;  %v7836_v33 = vpop.f32.mrf.mxu0 }
 0xa34   : > { %v2756_v7 = vpack.c.bf16 %v2738_v11, %v2738_v11 }
 0xa36   : > { %v2849_v50 = vunpack.c.l.b16 %v2756_v7 }
 0xa38   : > { %v2853_v8 = vpack.c.b16 %v2849_v50, %v2848_v59 }
 0xa3a   : > { %5798 = vmatmul.msk.bf16.gmra.mxu0 %vm536_vm2, %v2853_v8 }
 0xa3b   : > { %v7842_v51 = vpop.f32.mrf.mxu0 }
 0xa43   : > { %v7852_v13 = vpop.f32.mrf.mxu0 }
 0xa62   : > { %v2814_v42 = vpop.f32.mrf.mxu2 }
 0xa63   : > { %v2815_v54 = vadd.f32 1e-06, %v2814_v42 }
 0xa65   : > { %6187 = vrcp.f32 %v2815_v54 }
 0xa6a   : > { %v2816_v3 = vpop.f32.mrf.mxu2 }
 0xa6b   : > { %v2817_v12 = vadd.f32 1e-06, %v2816_v3  ;;  %v6188_v44 = vpop.eup %6187 }
 0xa6c   : > { %v7839_v17 = vmul.f32 %v6188_v44, %v2757_v62  ;;  %v2759_v44 = vmul.f32 %v2607_v16, %v7526_v56 }
 0xa6d   : > { %6189 = vrcp.f32 %v2817_v12 }
 0xa6e   : > { %v2927_v50 = vpack.c.bf16 %v7839_v17, %v7839_v17 }
 0xa70   : > { %v2951_v54 = vunpack.c.l.b16 %v2927_v50 }
 0xa72   : > { %v2819_v11 = vpop.f32.mrf.mxu2 }
 0xa73   : > { %v6190_v7 = vpop.eup %6189  ;;  %v2820_v59 = vadd.f32 1e-06, %v2819_v11 }
 0xa74   : > { %v7846_v8 = vmul.f32 %v6190_v7, %v2758_v46  ;;  %v2760_v46 = vmul.f32 %v2609_v2, %v7529_v27 }
 0xa75   : > { %6191 = vrcp.f32 %v2820_v59 }
 0xa76   : > { %v2928_v42 = vpack.c.bf16 %v7846_v8, %v7846_v8 }
 0xa78   : > { %v2952_v58 = vunpack.c.l.b16 %v2928_v42 }
 0xa7a   : > { %v2821_v37 = vpop.f32.mrf.mxu2  ;;  %v7850_v3 = vpack.c.b16 %v2952_v58, %v2951_v54 }
 0xa7b   : > { %v2822_v6 = vadd.f32 1e-06, %v2821_v37  ;;  %v6192_v12 = vpop.eup %6191 }
 0xa7c   : > { %2975 = vmatmul.bf16.vlgmr.msrb.gmra.mxu1 %v7850_v3  ;;  %v7856_v62 = vmul.f32 %v6192_v12, %v2759_v44 }
 0xa7d   : > { %6193 = vrcp.f32 %v2822_v6 }
 0xa7e   : > { %v2929_v54 = vpack.c.bf16 %v7856_v62, %v7856_v62 }
 0xa80   : > { %v2953_v6 = vunpack.c.l.b16 %v2929_v54  ;;  %v2762_v54 = vmul.f32 %v2614_v0, %v7548_v14 }
 0xa82   : > { %v2824_v11 = vpop.f32.mrf.mxu2 }
 0xa83   : > { %v6194_v7 = vpop.eup %6193  ;;  %v2825_v59 = vadd.f32 1e-06, %v2824_v11  ;;  %v2761_v11 = vmul.f32 %v2612_v36, %v7541_v61 }
 0xa84   : > { %v7859_v50 = vmul.f32 %v6194_v7, %v2760_v46 }
 0xa85   : > { %6195 = vrcp.f32 %v2825_v59  ;;  %v2765_v59 = vmul.f32 %v7821_v9, %v7544_v1 }
 0xa86   : > { %v2930_v37 = vpack.c.bf16 %v7859_v50, %v7859_v50 }
 0xa87   : > { %v2875_v42 = vpop.f32.mrf.mxu0 }
 0xa88   : > { %v2876_v58 = vadd.f32 1e-06, %v2875_v42  ;;  %v2954_v56 = vunpack.c.l.b16 %v2930_v37 }
 0xa8a   : > { %6197 = vrcp.f32 %v2876_v58  ;;  %v2826_v16 = vpop.f32.mrf.mxu2  ;;  %v7865_v12 = vpack.c.b16 %v2954_v56, %v2953_v6 }
 0xa8b   : > { %v2827_v27 = vadd.f32 1e-06, %v2826_v16  ;;  %v6196_v44 = vpop.eup %6195  ;;  %v2766_v16 = vmul.f32 %v7824_v45, %v7554_v53 }
 0xa8c   : > { %2980 = vmatmul.bf16.gmra.mxu1 %v7865_v12  ;;  %v7871_v42 = vmul.f32 %v6196_v44, %v2761_v11 }
 0xa8d   : > { %6199 = vrcp.f32 %v2827_v27 }
 0xa8e   : > { %v2931_v36 = vpack.c.bf16 %v7871_v42, %v7871_v42 }
 0xa8f   : > { %v2877_v2 = vpop.f32.mrf.mxu0 }
 0xa90   : > { %v2878_v46 = vadd.f32 1e-06, %v2877_v2  ;;  %v6198_v7 = vpop.eup %6197  ;;  %v2955_v45 = vunpack.c.l.b16 %v2931_v36 }
 0xa91   : > { %v7874_v58 = vmul.f32 %v6198_v7, %v2765_v59 }
 0xa92   : > { %6201 = vrcp.f32 %v2878_v46  ;;  %v2829_v37 = vpop.f32.mrf.mxu2 }
 0xa93   : > { %v6200_v6 = vpop.eup %6199  ;;  %v2830_v56 = vadd.f32 1e-06, %v2829_v37  ;;  %v2935_v9 = vpack.c.bf16 %v7874_v58, %v7874_v58 }
 0xa94   : > { %v7878_v27 = vmul.f32 %v6200_v6, %v2762_v54 }
 0xa95   : > { %6203 = vrcp.f32 %v2830_v56  ;;  %v3004_v46 = vunpack.c.l.b16 %v2935_v9  ;;  %v2764_v9 = vmul.f32 %v7832_v55, %v7578_v10 }
 0xa96   : > { %v2932_v0 = vpack.c.bf16 %v7878_v27, %v7878_v27 }
 0xa97   : > { %v2880_v61 = vpop.f32.mrf.mxu0 }
 0xa98   : > { %v6202_v2 = vpop.eup %6201  ;;  %v2881_v1 = vadd.f32 1e-06, %v2880_v61  ;;  %v2956_v44 = vunpack.c.l.b16 %v2932_v0  ;;  %v2763_v61 = vmul.f32 %v7828_v29, %v7570_v63 }
 0xa99   : > { %v7884_v14 = vmul.f32 %v6202_v2, %v2766_v16  ;;  %v2767_v2 = vmul.f32 %v7826_v22, %v7574_v5 }
 0xa9a   : > { %6205 = vrcp.f32 %v2881_v1  ;;  %v2831_v7 = vpop.f32.mrf.mxu2  ;;  %v7890_v59 = vpack.c.b16 %v2956_v44, %v2955_v45  ;;  %v2768_v45 = vmul.f32 %v7830_v19, %v7582_v24 }
 0xa9b   : > { %v2936_v53 = vpack.c.bf16 %v7884_v14, %v7884_v14  ;;  %v2832_v54 = vadd.f32 1e-06, %v2831_v7  ;;  %v6204_v16 = vpop.eup %6203 }
 0xa9c   : > { %2985 = vmatmul.bf16.gmra.mxu1 %v7890_v59  ;;  %v7900_v1 = vmul.f32 %v6204_v16, %v2763_v61 }
 0xa9d   : > { %v3005_v11 = vunpack.c.l.b16 %v2936_v53  ;;  %6207 = vrcp.f32 %v2832_v54 }
 0xa9e   : > { %v2933_v29 = vpack.c.bf16 %v7900_v1, %v7900_v1 }
 0xa9f   : > { %v2882_v37 = vpop.f32.mrf.mxu0  ;;  %v7893_v6 = vpack.c.b16 %v3005_v11, %v3004_v46 }
 0xaa0   : > { %v2883_v56 = vadd.f32 1e-06, %v2882_v37  ;;  %v6206_v36 = vpop.eup %6205  ;;  %v2957_v55 = vunpack.c.l.b16 %v2933_v29 }
 0xaa1   : > { %3028 = vmatmul.bf16.vlgmr.msra.gmra.mxu3 %v7893_v6  ;;  %v7904_v0 = vmul.f32 %v6206_v36, %v2767_v2  ;;  %v2769_v2 = vmul.f32 %v7834_v60, %v7592_v49 }
 0xaa2   : > { %6209 = vrcp.f32 %v2883_v56 }
 0xaa3   : > { %v6208_v53 = vpop.eup %6207  ;;  %v2937_v10 = vpack.c.bf16 %v7904_v0, %v7904_v0 }
 0xaa4   : > { %v7908_v44 = vmul.f32 %v6208_v53, %v2764_v9  ;;  %v2770_v53 = vmul.f32 %v7836_v33, %v7597_v26 }
 0xaa5   : > { %v3006_v54 = vunpack.c.l.b16 %v2937_v10 }
 0xaa6   : > { %v2934_v22 = vpack.c.bf16 %v7908_v44, %v7908_v44 }
 0xaa7   : > { %v2885_v63 = vpop.f32.mrf.mxu0 }
 0xaa8   : > { %v6210_v46 = vpop.eup %6209  ;;  %v2886_v11 = vadd.f32 1e-06, %v2885_v63  ;;  %v2958_v7 = vunpack.c.l.b16 %v2934_v22 }
 0xaa9   : > { %v7912_v5 = vmul.f32 %v6210_v46, %v2768_v45 }
 0xaaa   : > { %6211 = vrcp.f32 %v2886_v11  ;;  %v2962_v19 = vpack.c.b16 %v2958_v7, %v2957_v55  ;;  %v2771_v7 = vmul.f32 %v7842_v51, %v7606_v18 }
 0xaab   : > { %v2938_v24 = vpack.c.bf16 %v7912_v5, %v7912_v5 }
 0xaac   : > { %2990 = vmatmul.bf16.gmra.mxu1 %v2962_v19  ;;  %3053 = vmatpush.bf16.xpose.msrb.mxu2 %v2962_v19 }
 0xaad   : > { %v3007_v37 = vunpack.c.l.b16 %v2938_v24 }
 0xaaf   : > { %v2887_v16 = vpop.f32.mrf.mxu0  ;;  %v3013_v56 = vpack.c.b16 %v3007_v37, %v3006_v54  ;;  %v2772_v54 = vmul.f32 %v7852_v13, %v7612_v57 }
 0xab0   : > { %v2888_v61 = vadd.f32 1e-06, %v2887_v16  ;;  %v6212_v36 = vpop.eup %6211 }
 0xab1   : > { %3033 = vmatmul.bf16.gmra.mxu3 %v3013_v56  ;;  %v7922_v9 = vmul.f32 %v6212_v36, %v2769_v2 }
 0xab2   : > { %6213 = vrcp.f32 %v2888_v61 }
 0xab3   : > { %v2939_v11 = vpack.c.bf16 %v7922_v9, %v7922_v9 }
 0xab4   : > { %3054 = vmatpush.bf16.xpose.msrb.mxu2 %v7890_v59 }
 0xab5   : > { %v3008_v49 = vunpack.c.l.b16 %v2939_v11 }
 0xab7   : > { %v2890_v45 = vpop.f32.mrf.mxu0 }
 0xab8   : > { %v6214_v63 = vpop.eup %6213  ;;  %v2891_v29 = vadd.f32 1e-06, %v2890_v45 }
 0xab9   : > { %v7927_v46 = vmul.f32 %v6214_v63, %v2770_v53 }
 0xaba   : > { %6215 = vrcp.f32 %v2891_v29 }
 0xabb   : > { %v2940_v22 = vpack.c.bf16 %v7927_v46, %v7927_v46 }
 0xabc   : > { %3055 = vmatpush.bf16.xpose.msrb.mxu2 %v7865_v12 }
 0xabd   : > { %v3009_v60 = vunpack.c.l.b16 %v2940_v22 }
 0xabf   : > { %v2892_v10 = vpop.f32.mrf.mxu0  ;;  %v3014_v26 = vpack.c.b16 %v3009_v60, %v3008_v49 }
 0xac0   : > { %v2893_v33 = vadd.f32 1e-06, %v2892_v10  ;;  %v6216_v55 = vpop.eup %6215 }
 0xac1   : > { %3038 = vmatmul.bf16.gmra.mxu3 %v3014_v26  ;;  %v7936_v24 = vmul.f32 %v6216_v55, %v2771_v7 }
 0xac2   : > { %6217 = vrcp.f32 %v2893_v33 }
 0xac3   : > { %v2941_v61 = vpack.c.bf16 %v7936_v24, %v7936_v24 }
 0xac4   : > { %3056 = vmatpush.bf16.xpose.msrb.mxu2 %v7850_v3 }
 0xac5   : > { %v3010_v2 = vunpack.c.l.b16 %v2941_v61 }
 0xac8   : > { %v6218_v37 = vpop.eup %6217 }
 0xac9   : > { %v7942_v16 = vmul.f32 %v6218_v37, %v2772_v54 }
 0xacb   : > { %v2942_v36 = vpack.c.bf16 %v7942_v16, %v7942_v16  ;;  %3057 = vmatmul.bf16.vlgmr.msrb.gmra.mxu2 %v7850_v3 }
 0xacc   : > { %3356 = vmatpush.bf16.msra.mxu2 %v6590_v20 }
 0xacd   : > { %v3011_v18 = vunpack.c.l.b16 %v2942_v36 }
 0xacf   : > { %v3015_v51 = vpack.c.b16 %v3011_v18, %v3010_v2 }
 0xad0   : > { %3565 = vmatpush.bf16.msrb.mxu2 %v2962_v19 }
 0xad1   : > { %3043 = vmatmul.bf16.gmra.mxu3 %v3015_v51  ;;  %3082 = vmatpush.bf16.xpose.msrb.mxu0 %v3015_v51 }
 0xad4   : > { %3566 = vmatpush.bf16.msrb.mxu2 %v7890_v59 }
 0xad8   : > { %3567 = vmatpush.bf16.msrb.mxu2 %v7865_v12 }
 0xad9   : > { %3083 = vmatpush.bf16.xpose.msrb.mxu0 %v3014_v26 }
 0xadb   : > { %3062 = vmatmul.bf16.gmra.mxu2 %v7865_v12 }
 0xadc   : > { %3568 = vmatpush.bf16.msrb.mxu2 %v7850_v3 }
 0xae1   : > { %3084 = vmatpush.bf16.xpose.msrb.mxu0 %v3013_v56 }
 0xae9   : > { %3085 = vmatpush.bf16.xpose.msrb.mxu0 %v7893_v6 }
 0xaeb   : > { %3067 = vmatmul.bf16.gmra.mxu2 %v7890_v59 }
 0xaf0   : > { %3086 = vmatmul.bf16.vlgmr.msrb.gmra.mxu0 %v7893_v6 }
 0xaf1   : > { %3417 = vmatpush.bf16.msra.mxu0 %v6597_v23 }
 0xaf5   : > { %3626 = vmatpush.bf16.msrb.mxu0 %v3015_v51 }
 0xaf9   : > { %3627 = vmatpush.bf16.msrb.mxu0 %v3014_v26 }
 0xafb   : > { %3072 = vmatmul.bf16.gmra.mxu2 %v2962_v19 }
 0xafd   : > { %3628 = vmatpush.bf16.msrb.mxu0 %v3013_v56 }
 0xb00   : > { %3091 = vmatmul.bf16.gmra.mxu0 %v3013_v56 }
 0xb01   : > { %3629 = vmatpush.bf16.msrb.mxu0 %v7893_v6 }
 0xb10   : > { %3096 = vmatmul.bf16.gmra.mxu0 %v3014_v26 }
 0xb20   : > { %3101 = vmatmul.bf16.gmra.mxu0 %v3015_v51 }
 0xb4e   : > { %v3058_v57 = vpop.f32.mrf.mxu2 }
 0xb4f   : > { %v3107_v3 = vpack.c.bf16 %v3058_v57, %v3058_v57 }
 0xb51   : > { %v3147_v53 = vunpack.c.l.b16 %v3107_v3 }
 0xb56   : > { %v3060_v13 = vpop.f32.mrf.mxu2 }
 0xb57   : > { %v3108_v12 = vpack.c.bf16 %v3060_v13, %v3060_v13 }
 0xb59   : > { %v3148_v45 = vunpack.c.l.b16 %v3108_v12 }
 0xb5b   : > { %v3155_v63 = vpack.c.b16 %v3148_v45, %v3147_v53 }
 0xb5d   : > { %5799 = vmatmul.msk.bf16.vlgmr.msra.gmra.mxu1 %vm536_vm2, %v3155_v63 }
 0xb5e   : > { %v3063_v59 = vpop.f32.mrf.mxu2 }
 0xb5f   : > { %v3109_v29 = vpack.c.bf16 %v3063_v59, %v3063_v59 }
 0xb61   : > { %v3149_v49 = vunpack.c.l.b16 %v3109_v29 }
 0xb66   : > { %v3065_v11 = vpop.f32.mrf.mxu2 }
 0xb67   : > { %v3110_v22 = vpack.c.bf16 %v3065_v11, %v3065_v11 }
 0xb69   : > { %v3150_v60 = vunpack.c.l.b16 %v3110_v22 }
 0xb6b   : > { %v3156_v19 = vpack.c.b16 %v3150_v60, %v3149_v49 }
 0xb6d   : > { %v3087_v6 = vpop.f32.mrf.mxu0  ;;  %5800 = vmatmul.msk.bf16.gmra.mxu1 %vm536_vm2, %v3156_v19 }
 0xb6e   : > { %v3068_v56 = vpop.f32.mrf.mxu2  ;;  %v3115_v10 = vpack.c.bf16 %v3087_v6, %v3087_v6 }
 0xb6f   : > { %v3111_v7 = vpack.c.bf16 %v3068_v56, %v3068_v56  ;;  %v2976_v56 = vpop.f32.mrf.mxu1 }
 0xb70   : > { %v3212_v55 = vunpack.c.l.b16 %v3115_v10 }
 0xb71   : > { %v3151_v2 = vunpack.c.l.b16 %v3111_v7 }
 0xb75   : > { %v3089_v26 = vpop.f32.mrf.mxu0 }
 0xb76   : > { %v3116_v33 = vpack.c.bf16 %v3089_v26, %v3089_v26  ;;  %v3070_v37 = vpop.f32.mrf.mxu2 }
 0xb77   : > { %v3112_v36 = vpack.c.bf16 %v3070_v37, %v3070_v37 }
 0xb78   : > { %v3213_v54 = vunpack.c.l.b16 %v3116_v33 }
 0xb79   : > { %v3152_v18 = vunpack.c.l.b16 %v3112_v36 }
 0xb7a   : > { %v3220_v61 = vpack.c.b16 %v3213_v54, %v3212_v55  ;;  %v2978_v54 = vpop.f32.mrf.mxu1 }
 0xb7b   : > { %v3157_v57 = vpack.c.b16 %v3152_v18, %v3151_v2 }
 0xb7c   : > { %5803 = vmatmul.msk.bf16.vlgmr.msrb.gmra.mxu3 %vm536_vm2, %v3220_v61 }
 0xb7d   : > { %v3092_v51 = vpop.f32.mrf.mxu0  ;;  %5801 = vmatmul.msk.bf16.gmra.mxu1 %vm536_vm2, %v3157_v57 }
 0xb7e   : > { %v3073_v3 = vpop.f32.mrf.mxu2  ;;  %v3117_v13 = vpack.c.bf16 %v3092_v51, %v3092_v51 }
 0xb7f   : > { %v3113_v63 = vpack.c.bf16 %v3073_v3, %v3073_v3 }
 0xb80   : > { %v3214_v45 = vunpack.c.l.b16 %v3117_v13 }
 0xb81   : > { %v3153_v49 = vunpack.c.l.b16 %v3113_v63 }
 0xb82   : > { %v2981_v36 = vpop.f32.mrf.mxu1 }
 0xb85   : > { %v3094_v12 = vpop.f32.mrf.mxu0 }
 0xb86   : > { %v3118_v53 = vpack.c.bf16 %v3094_v12, %v3094_v12  ;;  %v3075_v29 = vpop.f32.mrf.mxu2 }
 0xb87   : > { %v3114_v22 = vpack.c.bf16 %v3075_v29, %v3075_v29 }
 0xb88   : > { %v3215_v59 = vunpack.c.l.b16 %v3118_v53  ;;  %v7966_v53 = vpop.f32.mrf.mxu3 }
 0xb89   : > { %v3154_v60 = vunpack.c.l.b16 %v3114_v22 }
 0xb8a   : > { %v3221_v11 = vpack.c.b16 %v3215_v59, %v3214_v45  ;;  %v2983_v12 = vpop.f32.mrf.mxu1 }
 0xb8b   : > { %v3158_v19 = vpack.c.b16 %v3154_v60, %v3153_v49 }
 0xb8c   : > { %5804 = vmatmul.msk.bf16.gmra.mxu3 %vm536_vm2, %v3221_v11 }
 0xb8d   : > { %v3097_v6 = vpop.f32.mrf.mxu0  ;;  %5802 = vmatmul.msk.bf16.gmra.mxu1 %vm536_vm2, %v3158_v19 }
 0xb8e   : > { %v3119_v10 = vpack.c.bf16 %v3097_v6, %v3097_v6 }
 0xb90   : > { %v3216_v55 = vunpack.c.l.b16 %v3119_v10  ;;  %v7968_v63 = vpop.f32.mrf.mxu3 }
 0xb92   : > { %v2986_v45 = vpop.f32.mrf.mxu1 }
 0xb95   : > { %v3099_v26 = vpop.f32.mrf.mxu0 }
 0xb96   : > { %v3120_v33 = vpack.c.bf16 %v3099_v26, %v3099_v26 }
 0xb98   : > { %v3217_v7 = vunpack.c.l.b16 %v3120_v33  ;;  %v7970_v29 = vpop.f32.mrf.mxu3 }
 0xb9a   : > { %v3222_v37 = vpack.c.b16 %v3217_v7, %v3216_v55  ;;  %v2988_v59 = vpop.f32.mrf.mxu1  ;;  %v3123_v7 = vmul.f32 %v2976_v56, %v7653_v41 }
 0xb9c   : > { %5805 = vmatmul.msk.bf16.gmra.mxu3 %vm536_vm2, %v3222_v37 }
 0xb9d   : > { %v3102_v61 = vpop.f32.mrf.mxu0 }
 0xb9e   : > { %v3121_v2 = vpack.c.bf16 %v3102_v61, %v3102_v61  ;;  %v3124_v61 = vmul.f32 %v2978_v54, %v7660_v38 }
 0xba0   : > { %v3218_v57 = vunpack.c.l.b16 %v3121_v2  ;;  %v7974_v22 = vpop.f32.mrf.mxu3 }
 0xba2   : > { %v7972_v11 = vpop.f32.mrf.mxu1 }
 0xba5   : > { %v3104_v18 = vpop.f32.mrf.mxu0 }
 0xba6   : > { %v3122_v51 = vpack.c.bf16 %v3104_v18, %v3104_v18 }
 0xba8   : > { %v3219_v3 = vunpack.c.l.b16 %v3122_v51  ;;  %v7978_v60 = vpop.f32.mrf.mxu3 }
 0xbaa   : > { %v3223_v13 = vpack.c.b16 %v3219_v3, %v3218_v57  ;;  %v7976_v49 = vpop.f32.mrf.mxu1 }
 0xbac   : > { %5806 = vmatmul.msk.bf16.gmra.mxu3 %vm536_vm2, %v3223_v13 }
 0xbb0   : > { %v7980_v10 = vpop.f32.mrf.mxu3 }
 0xbb8   : > { %v7986_v2 = vpop.f32.mrf.mxu3 }
 0xbc0   : > { %v7996_v54 = vpop.f32.mrf.mxu3 }
 0xbda   : > { %v3184_v6 = vpop.f32.mrf.mxu1 }
 0xbdb   : > { %v3185_v19 = vadd.f32 1e-06, %v3184_v6 }
 0xbdd   : > { %6219 = vrcp.f32 %v3185_v19 }
 0xbe2   : > { %v3186_v26 = vpop.f32.mrf.mxu1 }
 0xbe3   : > { %v3187_v33 = vadd.f32 1e-06, %v3186_v26  ;;  %v6220_v55 = vpop.eup %6219 }
 0xbe4   : > { %v7983_v37 = vmul.f32 %v6220_v55, %v3123_v7  ;;  %v3125_v55 = vmul.f32 %v2981_v36, %v7671_v28 }
 0xbe5   : > { %6221 = vrcp.f32 %v3187_v33 }
 0xbe6   : > { %v3301_v3 = vpack.c.bf16 %v7983_v37, %v7983_v37 }
 0xbe8   : > { %v3325_v19 = vunpack.c.l.b16 %v3301_v3 }
 0xbea   : > { %v3189_v18 = vpop.f32.mrf.mxu1 }
 0xbeb   : > { %v6222_v51 = vpop.eup %6221  ;;  %v3190_v57 = vadd.f32 1e-06, %v3189_v18 }
 0xbec   : > { %v7990_v13 = vmul.f32 %v6222_v51, %v3124_v61  ;;  %v3126_v61 = vmul.f32 %v2983_v12, %v7674_v25 }
 0xbed   : > { %6223 = vrcp.f32 %v3190_v57 }
 0xbee   : > { %v3302_v6 = vpack.c.bf16 %v7990_v13, %v7990_v13 }
 0xbf0   : > { %v3326_v41 = vunpack.c.l.b16 %v3302_v6 }
 0xbf2   : > { %v7994_v56 = vpack.c.b16 %v3326_v41, %v3325_v19  ;;  %v3191_v26 = vpop.f32.mrf.mxu1 }
 0xbf3   : > { %v3192_v38 = vadd.f32 1e-06, %v3191_v26  ;;  %v6224_v33 = vpop.eup %6223 }
 0xbf4   : > { %5807 = vmatmul.msk.bf16.vlgmr.msra.gmra.mxu2 %vm227_vm1, %v7994_v56  ;;  %v8001_v7 = vmul.f32 %v6224_v33, %v3125_v55 }
 0xbf5   : > { %6225 = vrcp.f32 %v3192_v38 }
 0xbf6   : > { %v3303_v19 = vpack.c.bf16 %v8001_v7, %v8001_v7 }
 0xbf8   : > { %v3327_v38 = vunpack.c.l.b16 %v3303_v19  ;;  %v3128_v19 = vmul.f32 %v2988_v59, %v7694_v4 }
 0xbfa   : > { %v3194_v18 = vpop.f32.mrf.mxu1 }
 0xbfb   : > { %v6226_v51 = vpop.eup %6225  ;;  %v3195_v57 = vadd.f32 1e-06, %v3194_v18  ;;  %v3127_v18 = vmul.f32 %v2986_v45, %v7687_v34 }
 0xbfc   : > { %v8004_v3 = vmul.f32 %v6226_v51, %v3126_v61 }
 0xbfd   : > { %6227 = vrcp.f32 %v3195_v57  ;;  %v3131_v57 = vmul.f32 %v7966_v53, %v7690_v21 }
 0xbfe   : > { %v3304_v26 = vpack.c.bf16 %v8004_v3, %v8004_v3 }
 0xbff   : > { %v3249_v6 = vpop.f32.mrf.mxu3 }
 0xc00   : > { %v3250_v41 = vadd.f32 1e-06, %v3249_v6  ;;  %v3328_v28 = vunpack.c.l.b16 %v3304_v26 }
 0xc02   : > { %6229 = vrcp.f32 %v3250_v41  ;;  %v3196_v36 = vpop.f32.mrf.mxu1  ;;  %v8010_v33 = vpack.c.b16 %v3328_v28, %v3327_v38 }
 0xc03   : > { %v3197_v25 = vadd.f32 1e-06, %v3196_v36  ;;  %v6228_v55 = vpop.eup %6227  ;;  %v3132_v36 = vmul.f32 %v7968_v63, %v7700_v30 }
 0xc04   : > { %5808 = vmatmul.msk.bf16.gmra.mxu2 %vm227_vm1, %v8010_v33  ;;  %v8017_v6 = vmul.f32 %v6228_v55, %v3127_v18 }
 0xc05   : > { %6231 = vrcp.f32 %v3197_v25 }
 0xc06   : > { %v3305_v45 = vpack.c.bf16 %v8017_v6, %v8017_v6 }
 0xc07   : > { %v3251_v12 = vpop.f32.mrf.mxu3 }
 0xc08   : > { %v3252_v61 = vadd.f32 1e-06, %v3251_v12  ;;  %v6230_v51 = vpop.eup %6229  ;;  %v3329_v63 = vunpack.c.l.b16 %v3305_v45 }
 0xc09   : > { %v8020_v41 = vmul.f32 %v6230_v51, %v3131_v57 }
 0xc0a   : > { %6233 = vrcp.f32 %v3252_v61  ;;  %v3199_v26 = vpop.f32.mrf.mxu1 }
 0xc0b   : > { %v6232_v38 = vpop.eup %6231  ;;  %v3200_v28 = vadd.f32 1e-06, %v3199_v26  ;;  %v3309_v53 = vpack.c.bf16 %v8020_v41, %v8020_v41 }
 0xc0c   : > { %v8024_v25 = vmul.f32 %v6232_v38, %v3128_v19 }
 0xc0d   : > { %6235 = vrcp.f32 %v3200_v28  ;;  %v3386_v61 = vunpack.c.l.b16 %v3309_v53  ;;  %v3130_v53 = vmul.f32 %v7976_v49, %v7726_v31 }
 0xc0e   : > { %v3306_v59 = vpack.c.bf16 %v8024_v25, %v8024_v25 }
 0xc0f   : > { %v3254_v34 = vpop.f32.mrf.mxu3 }
 0xc10   : > { %v6234_v12 = vpop.eup %6233  ;;  %v3255_v21 = vadd.f32 1e-06, %v3254_v34  ;;  %v3330_v55 = vunpack.c.l.b16 %v3306_v59  ;;  %v3129_v34 = vmul.f32 %v7972_v11, %v7718_v47 }
 0xc11   : > { %v8030_v4 = vmul.f32 %v6234_v12, %v3132_v36  ;;  %v3133_v12 = vmul.f32 %v7970_v29, %v7722_v43 }
 0xc12   : > { %6237 = vrcp.f32 %v3255_v21  ;;  %v3201_v51 = vpop.f32.mrf.mxu1  ;;  %v8036_v57 = vpack.c.b16 %v3330_v55, %v3329_v63  ;;  %v3134_v63 = vmul.f32 %v7974_v22, %v7730_v39 }
 0xc13   : > { %v3310_v30 = vpack.c.bf16 %v8030_v4, %v8030_v4  ;;  %v3202_v19 = vadd.f32 1e-06, %v3201_v51  ;;  %v6236_v36 = vpop.eup %6235 }
 0xc14   : > { %5809 = vmatmul.msk.bf16.gmra.mxu2 %vm227_vm1, %v8036_v57  ;;  %v8048_v21 = vmul.f32 %v6236_v36, %v3129_v34 }
 0xc15   : > { %v3387_v18 = vunpack.c.l.b16 %v3310_v30  ;;  %6239 = vrcp.f32 %v3202_v19 }
 0xc16   : > { %v3307_v55 = vpack.c.bf16 %v8048_v21, %v8048_v21 }
 0xc17   : > { %v8038_v26 = vpack.c.b16 %v3387_v18, %v3386_v61  ;;  %v3256_v38 = vpop.f32.mrf.mxu3 }
 0xc18   : > { %v3257_v28 = vadd.f32 1e-06, %v3256_v38  ;;  %v6238_v45 = vpop.eup %6237  ;;  %v3331_v49 = vunpack.c.l.b16 %v3307_v55 }
 0xc19   : > { %5811 = vmatmul.msk.bf16.vlgmr.msra.gmra.mxu0 %vm227_vm1, %v8038_v26  ;;  %v8052_v59 = vmul.f32 %v6238_v45, %v3133_v12 }
 0xc1a   : > { %6241 = vrcp.f32 %v3257_v28 }
 0xc1b   : > { %v6240_v30 = vpop.eup %6239  ;;  %v3311_v31 = vpack.c.bf16 %v8052_v59, %v8052_v59 }
 0xc1c   : > { %v8056_v47 = vmul.f32 %v6240_v30, %v3130_v53  ;;  %v3135_v53 = vmul.f32 %v7978_v60, %v7750_v15 }
 0xc1d   : > { %v3388_v19 = vunpack.c.l.b16 %v3311_v31 }
 0xc1e   : > { %v3308_v29 = vpack.c.bf16 %v8056_v47, %v8056_v47 }
 0xc1f   : > { %v3259_v11 = vpop.f32.mrf.mxu3 }
 0xc20   : > { %v6242_v61 = vpop.eup %6241  ;;  %v3260_v18 = vadd.f32 1e-06, %v3259_v11  ;;  %v3332_v51 = vunpack.c.l.b16 %v3308_v29  ;;  %v3344_v11 = vsel %vm227_vm1, %v8036_v57, 0 }
 0xc21   : > { %v8060_v43 = vmul.f32 %v6242_v61, %v3134_v63  ;;  %v3136_v63 = vmul.f32 %v7980_v10, %v7756_v32  ;;  %v3341_v32 = vsel %vm227_vm1, %v8010_v33, 0 }
 0xc22   : > { %6243 = vrcp.f32 %v3260_v18  ;;  %v8068_v22 = vpack.c.b16 %v3332_v51, %v3331_v49 }
 0xc23   : > { %v3312_v39 = vpack.c.bf16 %v8060_v43, %v8060_v43 }
 0xc24   : > { %5810 = vmatmul.msk.bf16.gmra.mxu2 %vm227_vm1, %v8068_v22  ;;  %v3347_v36 = vsel %vm227_vm1, %v8068_v22, 0 }
 0xc25   : > { %v3389_v38 = vunpack.c.l.b16 %v3312_v39  ;;  %3443 = vmatpush.bf16.xpose.msrb.mxu1 %v3347_v36 }
 0xc27   : > { %v3261_v28 = vpop.f32.mrf.mxu3  ;;  %v8074_v34 = vpack.c.b16 %v3389_v38, %v3388_v19  ;;  %v3137_v38 = vmul.f32 %v7986_v2, %v7767_v40 }
 0xc28   : > { %v3262_v45 = vadd.f32 1e-06, %v3261_v28  ;;  %v6244_v12 = vpop.eup %6243  ;;  %v3138_v28 = vmul.f32 %v7996_v54, %v7773_v48 }
 0xc29   : > { %5812 = vmatmul.msk.bf16.gmra.mxu0 %vm227_vm1, %v8074_v34  ;;  %v8080_v30 = vmul.f32 %v6244_v12, %v3135_v53 }
 0xc2a   : > { %6245 = vrcp.f32 %v3262_v45  ;;  %v3338_v45 = vsel %vm227_vm1, %v7994_v56, 0 }
 0xc2b   : > { %v3313_v31 = vpack.c.bf16 %v8080_v30, %v8080_v30 }
 0xc2d   : > { %3444 = vmatpush.bf16.xpose.msrb.mxu1 %v3344_v11  ;;  %v3390_v60 = vunpack.c.l.b16 %v3313_v31 }
 0xc2f   : > { %v3264_v55 = vpop.f32.mrf.mxu3 }
 0xc30   : > { %v6246_v61 = vpop.eup %6245  ;;  %v3265_v18 = vadd.f32 1e-06, %v3264_v55  ;;  %v3402_v55 = vsel %vm227_vm1, %v8074_v34, 0 }
 0xc31   : > { %v8086_v29 = vmul.f32 %v6246_v61, %v3136_v63  ;;  %v3399_v61 = vsel %vm227_vm1, %v8038_v26, 0 }
 0xc32   : > { %6247 = vrcp.f32 %v3265_v18 }
 0xc33   : > { %v3314_v15 = vpack.c.bf16 %v8086_v29, %v8086_v29 }
 0xc35   : > { %v3391_v49 = vunpack.c.l.b16 %v3314_v15  ;;  %3445 = vmatpush.bf16.xpose.msrb.mxu1 %v3341_v32 }
 0xc37   : > { %v3266_v10 = vpop.f32.mrf.mxu3  ;;  %v3396_v51 = vpack.c.b16 %v3391_v49, %v3390_v60 }
 0xc38   : > { %v3267_v39 = vadd.f32 1e-06, %v3266_v10  ;;  %v6248_v19 = vpop.eup %6247 }
 0xc39   : > { %5813 = vmatmul.msk.bf16.gmra.mxu0 %vm227_vm1, %v3396_v51  ;;  %v8097_v36 = vmul.f32 %v6248_v19, %v3137_v38 }
 0xc3a   : > { %6249 = vrcp.f32 %v3267_v39 }
 0xc3b   : > { %v3315_v63 = vpack.c.bf16 %v8097_v36, %v8097_v36 }
 0xc3d   : > { %3446 = vmatpush.bf16.xpose.msrb.mxu1 %v3338_v45  ;;  %v3392_v2 = vunpack.c.l.b16 %v3315_v63 }
 0xc40   : > { %v6250_v12 = vpop.eup %6249 }
 0xc41   : > { %v8103_v53 = vmul.f32 %v6250_v12, %v3138_v28 }
 0xc43   : > { %v3316_v40 = vpack.c.bf16 %v8103_v53, %v8103_v53 }
 0xc44   : > { %5815 = vmatmul.msk.bf16.vlgmr.msrb.gmra.mxu1 %vm227_vm1, %v7994_v56 }
 0xc45   : > { %3730 = vmatpush.bf16.xpose.msra.mxu1 %v7776_v52  ;;  %v3393_v11 = vunpack.c.l.b16 %v3316_v40  ;;  %v3405_v52 = vsel %vm227_vm1, %v3396_v51, 0 }
 0xc47   : > { %v3397_v48 = vpack.c.b16 %v3393_v11, %v3392_v2 }
 0xc49   : > { %5814 = vmatmul.msk.bf16.gmra.mxu0 %vm227_vm1, %v3397_v48  ;;  %v3408_v54 = vsel %vm227_vm1, %v3397_v48, 0 }
 0xc4a   : > { %3472 = vmatpush.bf16.xpose.msra.mxu3 %v3408_v54 }
 0xc4d   : > { %3935 = vmatpush.bf16.msrb.mxu1 %v8068_v22 }
 0xc51   : > { %3936 = vmatpush.bf16.msrb.mxu1 %v8036_v57 }
 0xc52   : > { %3473 = vmatpush.bf16.xpose.msra.mxu3 %v3405_v52 }
 0xc54   : > { %5816 = vmatmul.msk.bf16.gmra.mxu1 %vm227_vm1, %v8010_v33 }
 0xc55   : > { %3937 = vmatpush.bf16.msrb.mxu1 %v8010_v33 }
 0xc59   : > { %3938 = vmatpush.bf16.msrb.mxu1 %v7994_v56 }
 0xc5a   : > { %3474 = vmatpush.bf16.xpose.msra.mxu3 %v3402_v55 }
 0xc62   : > { %3475 = vmatpush.bf16.xpose.msra.mxu3 %v3399_v61 }
 0xc64   : > { %5817 = vmatmul.msk.bf16.gmra.mxu1 %vm227_vm1, %v8036_v57 }
 0xc69   : > { %5819 = vmatmul.msk.bf16.vlgmr.msra.gmra.mxu3 %vm227_vm1, %v8038_v26 }
 0xc6a   : > { %3783 = vmatpush.bf16.xpose.msrb.mxu3 %v7799_v35 }
 0xc72   : > { %4000 = vmatpush.bf16.msra.mxu3 %v3397_v48 }
 0xc74   : > { %5818 = vmatmul.msk.bf16.gmra.mxu1 %vm227_vm1, %v8068_v22 }
 0xc76   : > { %4001 = vmatpush.bf16.msra.mxu3 %v3396_v51 }
 0xc79   : > { %5820 = vmatmul.msk.bf16.gmra.mxu3 %vm227_vm1, %v8074_v34 }
 0xc7a   : > { %4002 = vmatpush.bf16.msra.mxu3 %v8074_v34 }
 0xc7e   : > { %4003 = vmatpush.bf16.msra.mxu3 %v8038_v26 }
 0xc89   : > { %5821 = vmatmul.msk.bf16.gmra.mxu3 %vm227_vm1, %v3396_v51 }
 0xc99   : > { %5822 = vmatmul.msk.bf16.gmra.mxu3 %vm227_vm1, %v3397_v48 }
 0xcc1   : > { %v3448_v35 = vpop.f32.mrf.mxu1 }
 0xcc2   : > { %v3497_v56 = vpack.c.bf16 %v3448_v35, %v3448_v35 }
 0xcc4   : > { %v3537_v18 = vunpack.c.l.b16 %v3497_v56 }
 0xcc9   : > { %v3450_v33 = vpop.f32.mrf.mxu1 }
 0xcca   : > { %v3498_v57 = vpack.c.bf16 %v3450_v33, %v3450_v33 }
 0xccc   : > { %v3538_v31 = vunpack.c.l.b16 %v3498_v57 }
 0xcce   : > { %v3545_v15 = vpack.c.b16 %v3538_v31, %v3537_v18 }
 0xcd0   : > { %5823 = vmatmul.msk.bf16.vlgmr.msrb.gmra.mxu2 %vm536_vm2, %v3545_v15 }
 0xcd1   : > { %v3453_v26 = vpop.f32.mrf.mxu1 }
 0xcd2   : > { %v3499_v60 = vpack.c.bf16 %v3453_v26, %v3453_v26 }
 0xcd4   : > { %v3539_v32 = vunpack.c.l.b16 %v3499_v60 }
 0xcd9   : > { %v3455_v49 = vpop.f32.mrf.mxu1 }
 0xcda   : > { %v3500_v22 = vpack.c.bf16 %v3455_v49, %v3455_v49 }
 0xcdc   : > { %v3540_v10 = vunpack.c.l.b16 %v3500_v22 }
 0xcde   : > { %v3546_v34 = vpack.c.b16 %v3540_v10, %v3539_v32  ;;  %v3358_v32 = vpop.f32.mrf.mxu2 }
 0xce0   : > { %5824 = vmatmul.msk.bf16.gmra.mxu2 %vm536_vm2, %v3546_v34 }
 0xce1   : > { %v3458_v51 = vpop.f32.mrf.mxu1 }
 0xce2   : > { %v3501_v39 = vpack.c.bf16 %v3458_v51, %v3458_v51 }
 0xce4   : > { %v3541_v45 = vunpack.c.l.b16 %v3501_v39 }
 0xce6   : > { %v3360_v51 = vpop.f32.mrf.mxu2 }
 0xce9   : > { %v3460_v19 = vpop.f32.mrf.mxu1 }
 0xcea   : > { %v3502_v28 = vpack.c.bf16 %v3460_v19, %v3460_v19 }
 0xcec   : > { %v3477_v38 = vpop.f32.mrf.mxu3  ;;  %v3542_v12 = vunpack.c.l.b16 %v3502_v28 }
 0xced   : > { %v3505_v40 = vpack.c.bf16 %v3477_v38, %v3477_v38 }
 0xcee   : > { %v3547_v63 = vpack.c.b16 %v3542_v12, %v3541_v45 }
 0xcef   : > { %v3598_v54 = vunpack.c.l.b16 %v3505_v40 }
 0xcf0   : > { %5825 = vmatmul.msk.bf16.gmra.mxu2 %vm536_vm2, %v3547_v63  ;;  %v3363_v63 = vpop.f32.mrf.mxu2 }
 0xcf1   : > { %v3463_v2 = vpop.f32.mrf.mxu1 }
 0xcf2   : > { %v3503_v61 = vpack.c.bf16 %v3463_v2, %v3463_v2 }
 0xcf4   : > { %v3479_v11 = vpop.f32.mrf.mxu3  ;;  %v3543_v57 = vunpack.c.l.b16 %v3503_v61 }
 0xcf5   : > { %v3506_v48 = vpack.c.bf16 %v3479_v11, %v3479_v11 }
 0xcf7   : > { %v3599_v52 = vunpack.c.l.b16 %v3506_v48 }
 0xcf9   : > { %v3606_v55 = vpack.c.b16 %v3599_v52, %v3598_v54  ;;  %v3465_v35 = vpop.f32.mrf.mxu1  ;;  %v3365_v54 = vpop.f32.mrf.mxu2 }
 0xcfa   : > { %v3504_v33 = vpack.c.bf16 %v3465_v35, %v3465_v35  ;;  %v8145_v35 = vpop.f32.mrf.mxu0 }
 0xcfb   : > { %5827 = vmatmul.msk.bf16.vlgmr.msrb.gmra.mxu0 %vm536_vm2, %v3606_v55 }
 0xcfc   : > { %v3482_v56 = vpop.f32.mrf.mxu3  ;;  %v3544_v18 = vunpack.c.l.b16 %v3504_v33 }
 0xcfd   : > { %v3507_v15 = vpack.c.bf16 %v3482_v56, %v3482_v56 }
 0xcfe   : > { %v3548_v31 = vpack.c.b16 %v3544_v18, %v3543_v57 }
 0xcff   : > { %v3600_v49 = vunpack.c.l.b16 %v3507_v15 }
 0xd00   : > { %5826 = vmatmul.msk.bf16.gmra.mxu2 %vm536_vm2, %v3548_v31 }
 0xd01   : > { %v3368_v56 = vpop.f32.mrf.mxu2 }
 0xd02   : > { %v8148_v33 = vpop.f32.mrf.mxu0 }
 0xd04   : > { %v3484_v26 = vpop.f32.mrf.mxu3 }
 0xd05   : > { %v3508_v60 = vpack.c.bf16 %v3484_v26, %v3484_v26 }
 0xd07   : > { %v3601_v22 = vunpack.c.l.b16 %v3508_v60 }
 0xd09   : > { %v3607_v10 = vpack.c.b16 %v3601_v22, %v3600_v49  ;;  %v3370_v57 = vpop.f32.mrf.mxu2 }
 0xd0a   : > { %v8150_v18 = vpop.f32.mrf.mxu0 }
 0xd0b   : > { %5828 = vmatmul.msk.bf16.gmra.mxu0 %vm536_vm2, %v3607_v10 }
 0xd0c   : > { %v3487_v34 = vpop.f32.mrf.mxu3 }
 0xd0d   : > { %v3509_v39 = vpack.c.bf16 %v3487_v34, %v3487_v34 }
 0xd0f   : > { %v3602_v28 = vunpack.c.l.b16 %v3509_v39 }
 0xd11   : > { %v8152_v31 = vpop.f32.mrf.mxu2 }
 0xd12   : > { %v8154_v15 = vpop.f32.mrf.mxu0 }
 0xd14   : > { %v3489_v19 = vpop.f32.mrf.mxu3 }
 0xd15   : > { %v3510_v38 = vpack.c.bf16 %v3489_v19, %v3489_v19 }
 0xd17   : > { %v3603_v45 = vunpack.c.l.b16 %v3510_v38  ;;  %v3513_v38 = vmul.f32 %v3358_v32, %v7839_v17 }
 0xd19   : > { %v3608_v12 = vpack.c.b16 %v3603_v45, %v3602_v28  ;;  %v8156_v26 = vpop.f32.mrf.mxu2  ;;  %v3514_v45 = vmul.f32 %v3360_v51, %v7846_v8 }
 0xd1a   : > { %v8158_v60 = vpop.f32.mrf.mxu0 }
 0xd1b   : > { %5829 = vmatmul.msk.bf16.gmra.mxu0 %vm536_vm2, %v3608_v12 }
 0xd1c   : > { %v3492_v40 = vpop.f32.mrf.mxu3 }
 0xd1d   : > { %v3511_v2 = vpack.c.bf16 %v3492_v40, %v3492_v40 }
 0xd1f   : > { %v3604_v52 = vunpack.c.l.b16 %v3511_v2 }
 0xd22   : > { %v8160_v10 = vpop.f32.mrf.mxu0 }
 0xd24   : > { %v3494_v11 = vpop.f32.mrf.mxu3 }
 0xd25   : > { %v3512_v48 = vpack.c.bf16 %v3494_v11, %v3494_v11 }
 0xd27   : > { %v3605_v55 = vunpack.c.l.b16 %v3512_v48 }
 0xd29   : > { %v3609_v61 = vpack.c.b16 %v3605_v55, %v3604_v52 }
 0xd2a   : > { %v8166_v12 = vpop.f32.mrf.mxu0 }
 0xd2b   : > { %5830 = vmatmul.msk.bf16.gmra.mxu0 %vm536_vm2, %v3609_v61 }
 0xd32   : > { %v8176_v51 = vpop.f32.mrf.mxu0 }
 0xd53   : > { %v3570_v49 = vpop.f32.mrf.mxu2 }
 0xd54   : > { %v3571_v22 = vadd.f32 1e-06, %v3570_v49 }
 0xd56   : > { %6251 = vrcp.f32 %v3571_v22 }
 0xd5b   : > { %v3572_v34 = vpop.f32.mrf.mxu2 }
 0xd5c   : > { %v3573_v39 = vadd.f32 1e-06, %v3572_v34  ;;  %v6252_v19 = vpop.eup %6251  ;;  %v3515_v34 = vmul.f32 %v3363_v63, %v7856_v62 }
 0xd5d   : > { %v8163_v28 = vmul.f32 %v6252_v19, %v3513_v38  ;;  %v3516_v19 = vmul.f32 %v3365_v54, %v7859_v50 }
 0xd5e   : > { %6253 = vrcp.f32 %v3573_v39 }
 0xd5f   : > { %v3683_v48 = vpack.c.bf16 %v8163_v28, %v8163_v28 }
 0xd61   : > { %v3707_v61 = vunpack.c.l.b16 %v3683_v48 }
 0xd63   : > { %v3575_v40 = vpop.f32.mrf.mxu2 }
 0xd64   : > { %v6254_v2 = vpop.eup %6253  ;;  %v3576_v11 = vadd.f32 1e-06, %v3575_v40 }
 0xd65   : > { %v8170_v52 = vmul.f32 %v6254_v2, %v3514_v45 }
 0xd66   : > { %6255 = vrcp.f32 %v3576_v11 }
 0xd67   : > { %v3684_v55 = vpack.c.bf16 %v8170_v52, %v8170_v52 }
 0xd69   : > { %v3708_v17 = vunpack.c.l.b16 %v3684_v55 }
 0xd6b   : > { %v3577_v32 = vpop.f32.mrf.mxu2  ;;  %v8174_v49 = vpack.c.b16 %v3708_v17, %v3707_v61 }
 0xd6c   : > { %v3578_v8 = vadd.f32 1e-06, %v3577_v32  ;;  %v6256_v22 = vpop.eup %6255 }
 0xd6d   : > { %3731 = vmatmul.bf16.vlgmr.msra.gmra.mxu1 %v8174_v49  ;;  %v8180_v39 = vmul.f32 %v6256_v22, %v3515_v34  ;;  %v3517_v34 = vmul.f32 %v3368_v56, %v7871_v42 }
 0xd6e   : > { %6257 = vrcp.f32 %v3578_v8 }
 0xd6f   : > { %v3685_v48 = vpack.c.bf16 %v8180_v39, %v8180_v39 }
 0xd71   : > { %v3709_v17 = vunpack.c.l.b16 %v3685_v48 }
 0xd73   : > { %v3580_v38 = vpop.f32.mrf.mxu2 }
 0xd74   : > { %v6258_v45 = vpop.eup %6257  ;;  %v3581_v40 = vadd.f32 1e-06, %v3580_v38  ;;  %v3521_v38 = vmul.f32 %v8145_v35, %v7874_v58 }
 0xd75   : > { %v8183_v2 = vmul.f32 %v6258_v45, %v3516_v19 }
 0xd76   : > { %6259 = vrcp.f32 %v3581_v40  ;;  %v3518_v40 = vmul.f32 %v3370_v57, %v7878_v27 }
 0xd77   : > { %v3686_v61 = vpack.c.bf16 %v8183_v2, %v8183_v2 }
 0xd78   : > { %v3631_v11 = vpop.f32.mrf.mxu0 }
 0xd79   : > { %v3632_v55 = vadd.f32 1e-06, %v3631_v11  ;;  %v3710_v62 = vunpack.c.l.b16 %v3686_v61 }
 0xd7b   : > { %6261 = vrcp.f32 %v3632_v55  ;;  %v3582_v63 = vpop.f32.mrf.mxu2  ;;  %v8189_v32 = vpack.c.b16 %v3710_v62, %v3709_v17  ;;  %v3522_v17 = vmul.f32 %v8148_v33, %v7884_v14 }
 0xd7c   : > { %v3583_v50 = vadd.f32 1e-06, %v3582_v63  ;;  %v6260_v8 = vpop.eup %6259 }
 0xd7d   : > { %3736 = vmatmul.bf16.gmra.mxu1 %v8189_v32  ;;  %v8195_v45 = vmul.f32 %v6260_v8, %v3517_v34 }
 0xd7e   : > { %6263 = vrcp.f32 %v3583_v50 }
 0xd7f   : > { %v3687_v56 = vpack.c.bf16 %v8195_v45, %v8195_v45 }
 0xd80   : > { %v3633_v54 = vpop.f32.mrf.mxu0 }
 0xd81   : > { %v3634_v22 = vadd.f32 1e-06, %v3633_v54  ;;  %v6262_v19 = vpop.eup %6261  ;;  %v3711_v33 = vunpack.c.l.b16 %v3687_v56 }
 0xd82   : > { %v8198_v11 = vmul.f32 %v6262_v19, %v3521_v38 }
 0xd83   : > { %6265 = vrcp.f32 %v3634_v22  ;;  %v3585_v48 = vpop.f32.mrf.mxu2 }
 0xd84   : > { %v6264_v55 = vpop.eup %6263  ;;  %v3586_v61 = vadd.f32 1e-06, %v3585_v48  ;;  %v3691_v35 = vpack.c.bf16 %v8198_v11, %v8198_v11 }
 0xd85   : > { %v8202_v62 = vmul.f32 %v6264_v55, %v3518_v40 }
 0xd86   : > { %6267 = vrcp.f32 %v3586_v61  ;;  %v3760_v54 = vunpack.c.l.b16 %v3691_v35  ;;  %v3519_v61 = vmul.f32 %v8152_v31, %v7900_v1 }
 0xd87   : > { %v3688_v57 = vpack.c.bf16 %v8202_v62, %v8202_v62 }
 0xd88   : > { %v3636_v42 = vpop.f32.mrf.mxu0 }
 0xd89   : > { %v6266_v63 = vpop.eup %6265  ;;  %v3637_v58 = vadd.f32 1e-06, %v3636_v42  ;;  %v3712_v50 = vunpack.c.l.b16 %v3688_v57  ;;  %v3523_v42 = vmul.f32 %v8150_v18, %v7904_v0  ;;  %v3524_v57 = vmul.f32 %v8154_v15, %v7912_v5 }
 0xd8a   : > { %v8208_v27 = vmul.f32 %v6266_v63, %v3522_v17  ;;  %v3520_v63 = vmul.f32 %v8156_v26, %v7908_v44 }
 0xd8b   : > { %6269 = vrcp.f32 %v3637_v58  ;;  %v3587_v22 = vpop.f32.mrf.mxu2  ;;  %v8214_v34 = vpack.c.b16 %v3712_v50, %v3711_v33 }
 0xd8c   : > { %v3692_v14 = vpack.c.bf16 %v8208_v27, %v8208_v27  ;;  %v3588_v19 = vadd.f32 1e-06, %v3587_v22  ;;  %v6268_v48 = vpop.eup %6267 }
 0xd8d   : > { %3741 = vmatmul.bf16.gmra.mxu1 %v8214_v34  ;;  %v8224_v56 = vmul.f32 %v6268_v48, %v3519_v61  ;;  %v3525_v61 = vmul.f32 %v8158_v60, %v7922_v9 }
 0xd8e   : > { %v3761_v8 = vunpack.c.l.b16 %v3692_v14  ;;  %6271 = vrcp.f32 %v3588_v19 }
 0xd8f   : > { %v3689_v31 = vpack.c.bf16 %v8224_v56, %v8224_v56 }
 0xd90   : > { %v3638_v38 = vpop.f32.mrf.mxu0  ;;  %v8217_v40 = vpack.c.b16 %v3761_v8, %v3760_v54 }
 0xd91   : > { %v3639_v55 = vadd.f32 1e-06, %v3638_v38  ;;  %v6270_v17 = vpop.eup %6269  ;;  %v3713_v26 = vunpack.c.l.b16 %v3689_v31 }
 0xd92   : > { %3784 = vmatmul.bf16.vlgmr.msrb.gmra.mxu3 %v8217_v40  ;;  %v8228_v58 = vmul.f32 %v6270_v17, %v3523_v42  ;;  %v3526_v42 = vmul.f32 %v8160_v10, %v7927_v46 }
 0xd93   : > { %6273 = vrcp.f32 %v3639_v55 }
 0xd94   : > { %v6272_v35 = vpop.eup %6271  ;;  %v3693_v44 = vpack.c.bf16 %v8228_v58, %v8228_v58 }
 0xd95   : > { %v8232_v14 = vmul.f32 %v6272_v35, %v3520_v63 }
 0xd96   : > { %v3762_v8 = vunpack.c.l.b16 %v3693_v44  ;;  %v3527_v44 = vmul.f32 %v8166_v12, %v7936_v24 }
 0xd97   : > { %v3690_v18 = vpack.c.bf16 %v8232_v14, %v8232_v14 }
 0xd98   : > { %v3641_v1 = vpop.f32.mrf.mxu0 }
 0xd99   : > { %v6274_v33 = vpop.eup %6273  ;;  %v3642_v50 = vadd.f32 1e-06, %v3641_v1  ;;  %v3714_v54 = vunpack.c.l.b16 %v3690_v18 }
 0xd9a   : > { %v8236_v0 = vmul.f32 %v6274_v33, %v3524_v57 }
 0xd9b   : > { %6275 = vrcp.f32 %v3642_v50  ;;  %v3718_v15 = vpack.c.b16 %v3714_v54, %v3713_v26  ;;  %v3528_v54 = vmul.f32 %v8176_v51, %v7942_v16 }
 0xd9c   : > { %v3694_v5 = vpack.c.bf16 %v8236_v0, %v8236_v0 }
 0xd9d   : > { %3746 = vmatmul.bf16.gmra.mxu1 %v3718_v15  ;;  %3809 = vmatpush.bf16.xpose.msra.mxu2 %v3718_v15 }
 0xd9e   : > { %v3763_v22 = vunpack.c.l.b16 %v3694_v5 }
 0xda0   : > { %v3643_v19 = vpop.f32.mrf.mxu0  ;;  %v3769_v38 = vpack.c.b16 %v3763_v22, %v3762_v8 }
 0xda1   : > { %v3644_v48 = vadd.f32 1e-06, %v3643_v19  ;;  %v6276_v55 = vpop.eup %6275 }
 0xda2   : > { %3789 = vmatmul.bf16.gmra.mxu3 %v3769_v38  ;;  %v8246_v17 = vmul.f32 %v6276_v55, %v3525_v61 }
 0xda3   : > { %6277 = vrcp.f32 %v3644_v48 }
 0xda4   : > { %v3695_v31 = vpack.c.bf16 %v8246_v17, %v8246_v17 }
 0xda5   : > { %3810 = vmatpush.bf16.xpose.msra.mxu2 %v8214_v34 }
 0xda6   : > { %v3764_v9 = vunpack.c.l.b16 %v3695_v31 }
 0xda8   : > { %v3646_v63 = vpop.f32.mrf.mxu0 }
 0xda9   : > { %v6278_v35 = vpop.eup %6277  ;;  %v3647_v57 = vadd.f32 1e-06, %v3646_v63 }
 0xdaa   : > { %v8251_v1 = vmul.f32 %v6278_v35, %v3526_v42 }
 0xdab   : > { %6279 = vrcp.f32 %v3647_v57 }
 0xdac   : > { %v3696_v33 = vpack.c.bf16 %v8251_v1, %v8251_v1 }
 0xdad   : > { %3811 = vmatpush.bf16.xpose.msra.mxu2 %v8189_v32 }
 0xdae   : > { %v3765_v60 = vunpack.c.l.b16 %v3696_v33 }
 0xdb0   : > { %v3648_v50 = vpop.f32.mrf.mxu0  ;;  %v3770_v46 = vpack.c.b16 %v3765_v60, %v3764_v9 }
 0xdb1   : > { %v3649_v10 = vadd.f32 1e-06, %v3648_v50  ;;  %v6280_v18 = vpop.eup %6279 }
 0xdb2   : > { %3794 = vmatmul.bf16.gmra.mxu3 %v3770_v46  ;;  %v8260_v26 = vmul.f32 %v6280_v18, %v3527_v44 }
 0xdb3   : > { %6281 = vrcp.f32 %v3649_v10 }
 0xdb4   : > { %v3697_v22 = vpack.c.bf16 %v8260_v26, %v8260_v26 }
 0xdb5   : > { %3812 = vmatpush.bf16.xpose.msra.mxu2 %v8174_v49 }
 0xdb6   : > { %v3766_v48 = vunpack.c.l.b16 %v3697_v22 }
 0xdb9   : > { %v6282_v5 = vpop.eup %6281 }
 0xdba   : > { %v8266_v8 = vmul.f32 %v6282_v5, %v3528_v54 }
 0xdbc   : > { %v3698_v19 = vpack.c.bf16 %v8266_v8, %v8266_v8  ;;  %3813 = vmatmul.bf16.vlgmr.msra.gmra.mxu2 %v8174_v49 }
 0xdbd   : > { %4112 = vmatpush.bf16.msrb.mxu2 %v6590_v20 }
 0xdbe   : > { %v3767_v24 = vunpack.c.l.b16 %v3698_v19 }
 0xdc0   : > { %v3771_v12 = vpack.c.b16 %v3767_v24, %v3766_v48 }
 0xdc1   : > { %4321 = vmatpush.bf16.msra.mxu2 %v3718_v15 }
 0xdc2   : > { %3799 = vmatmul.bf16.gmra.mxu3 %v3771_v12  ;;  %3838 = vmatpush.bf16.xpose.msra.mxu0 %v3771_v12 }
 0xdc5   : > { %4322 = vmatpush.bf16.msra.mxu2 %v8214_v34 }
 0xdc9   : > { %4323 = vmatpush.bf16.msra.mxu2 %v8189_v32 }
 0xdca   : > { %3839 = vmatpush.bf16.xpose.msra.mxu0 %v3770_v46 }
 0xdcc   : > { %3818 = vmatmul.bf16.gmra.mxu2 %v8189_v32 }
 0xdcd   : > { %4324 = vmatpush.bf16.msra.mxu2 %v8174_v49 }
 0xdd2   : > { %3840 = vmatpush.bf16.xpose.msra.mxu0 %v3769_v38 }
 0xdda   : > { %3841 = vmatpush.bf16.xpose.msra.mxu0 %v8217_v40 }
 0xddc   : > { %3823 = vmatmul.bf16.gmra.mxu2 %v8214_v34 }
 0xde1   : > { %3842 = vmatmul.bf16.vlgmr.msra.gmra.mxu0 %v8217_v40 }
 0xde2   : > { %4173 = vmatpush.bf16.msrb.mxu0 %v6597_v23 }
 0xde6   : > { %4382 = vmatpush.bf16.msra.mxu0 %v3771_v12 }
 0xdea   : > { %4383 = vmatpush.bf16.msra.mxu0 %v3770_v46 }
 0xdec   : > { %3828 = vmatmul.bf16.gmra.mxu2 %v3718_v15 }
 0xdee   : > { %4384 = vmatpush.bf16.msra.mxu0 %v3769_v38 }
 0xdf1   : > { %3847 = vmatmul.bf16.gmra.mxu0 %v3769_v38 }
 0xdf2   : > { %4385 = vmatpush.bf16.msra.mxu0 %v8217_v40 }
 0xe01   : > { %3852 = vmatmul.bf16.gmra.mxu0 %v3770_v46 }
 0xe11   : > { %3857 = vmatmul.bf16.gmra.mxu0 %v3771_v12 }
 0xe3f   : > { %v3814_v16 = vpop.f32.mrf.mxu2 }
 0xe40   : > { %v3863_v49 = vpack.c.bf16 %v3814_v16, %v3814_v16 }
 0xe42   : > { %v3903_v55 = vunpack.c.l.b16 %v3863_v49 }
 0xe47   : > { %v3816_v51 = vpop.f32.mrf.mxu2 }
 0xe48   : > { %v3864_v32 = vpack.c.bf16 %v3816_v51, %v3816_v51 }
 0xe4a   : > { %v3904_v61 = vunpack.c.l.b16 %v3864_v32 }
 0xe4c   : > { %v3911_v42 = vpack.c.b16 %v3904_v61, %v3903_v55 }
 0xe4e   : > { %5831 = vmatmul.msk.bf16.vlgmr.msrb.gmra.mxu1 %vm536_vm2, %v3911_v42 }
 0xe4f   : > { %v3819_v34 = vpop.f32.mrf.mxu2 }
 0xe50   : > { %v3865_v63 = vpack.c.bf16 %v3819_v34, %v3819_v34 }
 0xe52   : > { %v3905_v31 = vunpack.c.l.b16 %v3865_v63 }
 0xe57   : > { %v3821_v35 = vpop.f32.mrf.mxu2 }
 0xe58   : > { %v3866_v57 = vpack.c.bf16 %v3821_v35, %v3821_v35 }
 0xe5a   : > { %v3906_v33 = vunpack.c.l.b16 %v3866_v57 }
 0xe5c   : > { %v3912_v15 = vpack.c.b16 %v3906_v33, %v3905_v31 }
 0xe5e   : > { %v3843_v40 = vpop.f32.mrf.mxu0  ;;  %5832 = vmatmul.msk.bf16.gmra.mxu1 %vm536_vm2, %v3912_v15 }
 0xe5f   : > { %v3824_v38 = vpop.f32.mrf.mxu2  ;;  %v3871_v9 = vpack.c.bf16 %v3843_v40, %v3843_v40  ;;  %v3732_v40 = vpop.f32.mrf.mxu1 }
 0xe60   : > { %v3867_v10 = vpack.c.bf16 %v3824_v38, %v3824_v38 }
 0xe61   : > { %v3968_v46 = vunpack.c.l.b16 %v3871_v9 }
 0xe62   : > { %v3907_v22 = vunpack.c.l.b16 %v3867_v10 }
 0xe66   : > { %v3845_v60 = vpop.f32.mrf.mxu0 }
 0xe67   : > { %v3872_v50 = vpack.c.bf16 %v3845_v60, %v3845_v60  ;;  %v3826_v44 = vpop.f32.mrf.mxu2 }
 0xe68   : > { %v3868_v5 = vpack.c.bf16 %v3826_v44, %v3826_v44 }
 0xe69   : > { %v3969_v18 = vunpack.c.l.b16 %v3872_v50 }
 0xe6a   : > { %v3908_v19 = vunpack.c.l.b16 %v3868_v5 }
 0xe6b   : > { %v3976_v54 = vpack.c.b16 %v3969_v18, %v3968_v46  ;;  %v3734_v46 = vpop.f32.mrf.mxu1 }
 0xe6c   : > { %v3913_v24 = vpack.c.b16 %v3908_v19, %v3907_v22 }
 0xe6d   : > { %5835 = vmatmul.msk.bf16.vlgmr.msra.gmra.mxu3 %vm536_vm2, %v3976_v54 }
 0xe6e   : > { %v3848_v48 = vpop.f32.mrf.mxu0  ;;  %5833 = vmatmul.msk.bf16.gmra.mxu1 %vm536_vm2, %v3913_v24 }
 0xe6f   : > { %v3829_v12 = vpop.f32.mrf.mxu2  ;;  %v3873_v16 = vpack.c.bf16 %v3848_v48, %v3848_v48 }
 0xe70   : > { %v3869_v55 = vpack.c.bf16 %v3829_v12, %v3829_v12 }
 0xe71   : > { %v3970_v32 = vunpack.c.l.b16 %v3873_v16  ;;  %v8290_v16 = vpop.f32.mrf.mxu3 }
 0xe72   : > { %v3909_v35 = vunpack.c.l.b16 %v3869_v55 }
 0xe73   : > { %v3737_v44 = vpop.f32.mrf.mxu1 }
 0xe76   : > { %v3850_v49 = vpop.f32.mrf.mxu0 }
 0xe77   : > { %v3874_v51 = vpack.c.bf16 %v3850_v49, %v3850_v49  ;;  %v3831_v42 = vpop.f32.mrf.mxu2 }
 0xe78   : > { %v3870_v63 = vpack.c.bf16 %v3831_v42, %v3831_v42 }
 0xe79   : > { %v3971_v61 = vunpack.c.l.b16 %v3874_v51  ;;  %v8292_v51 = vpop.f32.mrf.mxu3 }
 0xe7a   : > { %v3910_v57 = vunpack.c.l.b16 %v3870_v63 }
 0xe7b   : > { %v3977_v34 = vpack.c.b16 %v3971_v61, %v3970_v32  ;;  %v3739_v12 = vpop.f32.mrf.mxu1 }
 0xe7c   : > { %v3914_v33 = vpack.c.b16 %v3910_v57, %v3909_v35 }
 0xe7d   : > { %5836 = vmatmul.msk.bf16.gmra.mxu3 %vm536_vm2, %v3977_v34 }
 0xe7e   : > { %v3853_v31 = vpop.f32.mrf.mxu0  ;;  %5834 = vmatmul.msk.bf16.gmra.mxu1 %vm536_vm2, %v3914_v33 }
 0xe7f   : > { %v3875_v15 = vpack.c.bf16 %v3853_v31, %v3853_v31 }
 0xe81   : > { %v3972_v60 = vunpack.c.l.b16 %v3875_v15  ;;  %v8294_v55 = vpop.f32.mrf.mxu3 }
 0xe83   : > { %v3742_v49 = vpop.f32.mrf.mxu1 }
 0xe86   : > { %v3855_v38 = vpop.f32.mrf.mxu0 }
 0xe87   : > { %v3876_v9 = vpack.c.bf16 %v3855_v38, %v3855_v38 }
 0xe89   : > { %v3973_v50 = vunpack.c.l.b16 %v3876_v9  ;;  %v8298_v42 = vpop.f32.mrf.mxu3  ;;  %v3879_v9 = vmul.f32 %v3732_v40, %v7983_v37 }
 0xe8b   : > { %v3978_v10 = vpack.c.b16 %v3973_v50, %v3972_v60  ;;  %v3744_v32 = vpop.f32.mrf.mxu1  ;;  %v3880_v50 = vmul.f32 %v3734_v46, %v7990_v13 }
 0xe8d   : > { %5837 = vmatmul.msk.bf16.gmra.mxu3 %vm536_vm2, %v3978_v10 }
 0xe8e   : > { %v3858_v18 = vpop.f32.mrf.mxu0 }
 0xe8f   : > { %v3877_v54 = vpack.c.bf16 %v3858_v18, %v3858_v18 }
 0xe91   : > { %v3974_v19 = vunpack.c.l.b16 %v3877_v54  ;;  %v8302_v63 = vpop.f32.mrf.mxu3 }
 0xe93   : > { %v8296_v61 = vpop.f32.mrf.mxu1 }
 0xe96   : > { %v3860_v5 = vpop.f32.mrf.mxu0 }
 0xe97   : > { %v3878_v22 = vpack.c.bf16 %v3860_v5, %v3860_v5 }
 0xe99   : > { %v3975_v48 = vunpack.c.l.b16 %v3878_v22  ;;  %v8304_v31 = vpop.f32.mrf.mxu3 }
 0xe9b   : > { %v3979_v24 = vpack.c.b16 %v3975_v48, %v3974_v19  ;;  %v8300_v34 = vpop.f32.mrf.mxu1 }
 0xe9d   : > { %5838 = vmatmul.msk.bf16.gmra.mxu3 %vm536_vm2, %v3979_v24 }
 0xea1   : > { %v8310_v10 = vpop.f32.mrf.mxu3 }
 0xea9   : > { %v8320_v46 = vpop.f32.mrf.mxu3 }
 0xecb   : > { %v3940_v35 = vpop.f32.mrf.mxu1 }
 0xecc   : > { %v3941_v57 = vadd.f32 1e-06, %v3940_v35 }
 0xece   : > { %6283 = vrcp.f32 %v3941_v57 }
 0xed3   : > { %v3942_v33 = vpop.f32.mrf.mxu1 }
 0xed4   : > { %v3943_v15 = vadd.f32 1e-06, %v3942_v33  ;;  %v6284_v38 = vpop.eup %6283  ;;  %v3881_v33 = vmul.f32 %v3737_v44, %v8001_v7 }
 0xed5   : > { %v8307_v60 = vmul.f32 %v6284_v38, %v3879_v9  ;;  %v3882_v38 = vmul.f32 %v3739_v12, %v8004_v3 }
 0xed6   : > { %6285 = vrcp.f32 %v3943_v15 }
 0xed7   : > { %v4057_v22 = vpack.c.bf16 %v8307_v60, %v8307_v60 }
 0xed9   : > { %v4081_v24 = vunpack.c.l.b16 %v4057_v22 }
 0xedb   : > { %v3945_v18 = vpop.f32.mrf.mxu1 }
 0xedc   : > { %v6286_v54 = vpop.eup %6285  ;;  %v3946_v5 = vadd.f32 1e-06, %v3945_v18 }
 0xedd   : > { %v8314_v19 = vmul.f32 %v6286_v54, %v3880_v50 }
 0xede   : > { %6287 = vrcp.f32 %v3946_v5 }
 0xedf   : > { %v4058_v48 = vpack.c.bf16 %v8314_v19, %v8314_v19 }
 0xee1   : > { %v4082_v37 = vunpack.c.l.b16 %v4058_v48 }
 0xee3   : > { %v8318_v40 = vpack.c.b16 %v4082_v37, %v4081_v24  ;;  %v3947_v35 = vpop.f32.mrf.mxu1 }
 0xee4   : > { %v3948_v13 = vadd.f32 1e-06, %v3947_v35  ;;  %v6288_v57 = vpop.eup %6287 }
 0xee5   : > { %5839 = vmatmul.msk.bf16.vlgmr.msrb.gmra.mxu2 %vm227_vm1, %v8318_v40  ;;  %v8325_v15 = vmul.f32 %v6288_v57, %v3881_v33  ;;  %v3883_v33 = vmul.f32 %v3742_v49, %v8017_v6 }
 0xee6   : > { %6289 = vrcp.f32 %v3948_v13 }
 0xee7   : > { %v4059_v22 = vpack.c.bf16 %v8325_v15, %v8325_v15 }
 0xee9   : > { %v4083_v37 = vunpack.c.l.b16 %v4059_v22 }
 0xeeb   : > { %v3950_v9 = vpop.f32.mrf.mxu1 }
 0xeec   : > { %v6290_v50 = vpop.eup %6289  ;;  %v3951_v18 = vadd.f32 1e-06, %v3950_v9  ;;  %v3887_v9 = vmul.f32 %v8290_v16, %v8020_v41 }
 0xeed   : > { %v8328_v54 = vmul.f32 %v6290_v50, %v3882_v38 }
 0xeee   : > { %6291 = vrcp.f32 %v3951_v18  ;;  %v3884_v18 = vmul.f32 %v3744_v32, %v8024_v25 }
 0xeef   : > { %v4060_v24 = vpack.c.bf16 %v8328_v54, %v8328_v54 }
 0xef0   : > { %v4005_v5 = vpop.f32.mrf.mxu3 }
 0xef1   : > { %v4006_v48 = vadd.f32 1e-06, %v4005_v5  ;;  %v4084_v7 = vunpack.c.l.b16 %v4060_v24 }
 0xef3   : > { %6293 = vrcp.f32 %v4006_v48  ;;  %v3952_v44 = vpop.f32.mrf.mxu1  ;;  %v8334_v35 = vpack.c.b16 %v4084_v7, %v4083_v37  ;;  %v3888_v37 = vmul.f32 %v8292_v51, %v8030_v4 }
 0xef4   : > { %v3953_v3 = vadd.f32 1e-06, %v3952_v44  ;;  %v6292_v13 = vpop.eup %6291 }
 0xef5   : > { %5840 = vmatmul.msk.bf16.gmra.mxu2 %vm227_vm1, %v8334_v35  ;;  %v8341_v50 = vmul.f32 %v6292_v13, %v3883_v33 }
 0xef6   : > { %6295 = vrcp.f32 %v3953_v3 }
 0xef7   : > { %v4061_v49 = vpack.c.bf16 %v8341_v50, %v8341_v50 }
 0xef8   : > { %v4007_v12 = vpop.f32.mrf.mxu3 }
 0xef9   : > { %v4008_v57 = vadd.f32 1e-06, %v4007_v12  ;;  %v6294_v38 = vpop.eup %6293  ;;  %v4085_v51 = vunpack.c.l.b16 %v4061_v49 }
 0xefa   : > { %v8344_v5 = vmul.f32 %v6294_v38, %v3887_v9 }
 0xefb   : > { %6297 = vrcp.f32 %v4008_v57  ;;  %v3955_v22 = vpop.f32.mrf.mxu1 }
 0xefc   : > { %v6296_v48 = vpop.eup %6295  ;;  %v3956_v24 = vadd.f32 1e-06, %v3955_v22  ;;  %v4065_v16 = vpack.c.bf16 %v8344_v5, %v8344_v5 }
 0xefd   : > { %v8348_v7 = vmul.f32 %v6296_v48, %v3884_v18 }
 0xefe   : > { %6299 = vrcp.f32 %v3956_v24  ;;  %v4142_v12 = vunpack.c.l.b16 %v4065_v16  ;;  %v3885_v24 = vmul.f32 %v8296_v61, %v8048_v21 }
 0xeff   : > { %v4062_v32 = vpack.c.bf16 %v8348_v7, %v8348_v7 }
 0xf00   : > { %v4010_v6 = vpop.f32.mrf.mxu3 }
 0xf01   : > { %v6298_v44 = vpop.eup %6297  ;;  %v4011_v41 = vadd.f32 1e-06, %v4010_v6  ;;  %v4086_v3 = vunpack.c.l.b16 %v4062_v32  ;;  %v3889_v6 = vmul.f32 %v8294_v55, %v8052_v59  ;;  %v3890_v32 = vmul.f32 %v8298_v42, %v8060_v43 }
 0xf02   : > { %v8354_v25 = vmul.f32 %v6298_v44, %v3888_v37  ;;  %v3886_v44 = vmul.f32 %v8300_v34, %v8056_v47 }
 0xf03   : > { %6301 = vrcp.f32 %v4011_v41  ;;  %v3957_v57 = vpop.f32.mrf.mxu1  ;;  %v8360_v33 = vpack.c.b16 %v4086_v3, %v4085_v51 }
 0xf04   : > { %v4066_v4 = vpack.c.bf16 %v8354_v25, %v8354_v25  ;;  %v3958_v38 = vadd.f32 1e-06, %v3957_v57  ;;  %v6300_v22 = vpop.eup %6299 }
 0xf05   : > { %5841 = vmatmul.msk.bf16.gmra.mxu2 %vm227_vm1, %v8360_v33  ;;  %v8372_v49 = vmul.f32 %v6300_v22, %v3885_v24 }
 0xf06   : > { %v4143_v13 = vunpack.c.l.b16 %v4066_v4  ;;  %6303 = vrcp.f32 %v3958_v38 }
 0xf07   : > { %v4063_v4 = vpack.c.bf16 %v8372_v49, %v8372_v49 }
 0xf08   : > { %v8362_v9 = vpack.c.b16 %v4143_v13, %v4142_v12  ;;  %v4012_v18 = vpop.f32.mrf.mxu3 }
 0xf09   : > { %v4013_v48 = vadd.f32 1e-06, %v4012_v18  ;;  %v6302_v37 = vpop.eup %6301  ;;  %v4087_v34 = vunpack.c.l.b16 %v4063_v4 }
 0xf0a   : > { %5843 = vmatmul.msk.bf16.vlgmr.msrb.gmra.mxu0 %vm227_vm1, %v8362_v9  ;;  %v8376_v41 = vmul.f32 %v6302_v37, %v3889_v6  ;;  %v3891_v37 = vmul.f32 %v8302_v63, %v8080_v30 }
 0xf0b   : > { %6305 = vrcp.f32 %v4013_v48 }
 0xf0c   : > { %v6304_v16 = vpop.eup %6303  ;;  %v4067_v47 = vpack.c.bf16 %v8376_v41, %v8376_v41 }
 0xf0d   : > { %v8380_v21 = vmul.f32 %v6304_v16, %v3886_v44  ;;  %v3892_v44 = vmul.f32 %v8304_v31, %v8086_v29  ;;  %v4100_v16 = vsel %vm227_vm1, %v8360_v33, 0  ;;  %v4097_v29 = vsel %vm227_vm1, %v8334_v35, 0 }
 0xf0e   : > { %v4144_v13 = vunpack.c.l.b16 %v4067_v47 }
 0xf0f   : > { %v4064_v55 = vpack.c.bf16 %v8380_v21, %v8380_v21 }
 0xf10   : > { %v4015_v61 = vpop.f32.mrf.mxu3 }
 0xf11   : > { %v6306_v51 = vpop.eup %6305  ;;  %v4016_v3 = vadd.f32 1e-06, %v4015_v61  ;;  %v4088_v12 = vunpack.c.l.b16 %v4064_v55 }
 0xf12   : > { %v8384_v59 = vmul.f32 %v6306_v51, %v3890_v32 }
 0xf13   : > { %6307 = vrcp.f32 %v4016_v3  ;;  %v8392_v42 = vpack.c.b16 %v4088_v12, %v4087_v34 }
 0xf14   : > { %v4068_v43 = vpack.c.bf16 %v8384_v59, %v8384_v59 }
 0xf15   : > { %5842 = vmatmul.msk.bf16.gmra.mxu2 %vm227_vm1, %v8392_v42  ;;  %v4103_v38 = vsel %vm227_vm1, %v8392_v42, 0 }
 0xf16   : > { %v4145_v57 = vunpack.c.l.b16 %v4068_v43  ;;  %4199 = vmatpush.bf16.xpose.msra.mxu1 %v4103_v38  ;;  %v3893_v43 = vmul.f32 %v8310_v10, %v8097_v36  ;;  %v4094_v38 = vsel %vm227_vm1, %v8318_v40, 0 }
 0xf18   : > { %v4017_v18 = vpop.f32.mrf.mxu3  ;;  %v8398_v22 = vpack.c.b16 %v4145_v57, %v4144_v13  ;;  %v3894_v57 = vmul.f32 %v8320_v46, %v8103_v53 }
 0xf19   : > { %v4018_v48 = vadd.f32 1e-06, %v4017_v18  ;;  %v6308_v24 = vpop.eup %6307 }
 0xf1a   : > { %5844 = vmatmul.msk.bf16.gmra.mxu0 %vm227_vm1, %v8398_v22  ;;  %v8404_v6 = vmul.f32 %v6308_v24, %v3891_v37  ;;  %v6423_v24 = vld [vmem:[%s6584_s19] sm:$0xf] }
 0xf1b   : > { %6309 = vrcp.f32 %v4018_v48 }
 0xf1c   : > { %v4069_v3 = vpack.c.bf16 %v8404_v6, %v8404_v6 }
 0xf1e   : > { %4200 = vmatpush.bf16.xpose.msra.mxu1 %v4100_v16  ;;  %v4146_v63 = vunpack.c.l.b16 %v4069_v3 }
 0xf20   : > { %v4020_v32 = vpop.f32.mrf.mxu3 }
 0xf21   : > { %v6310_v61 = vpop.eup %6309  ;;  %v4021_v4 = vadd.f32 1e-06, %v4020_v32  ;;  %v4158_v32 = vsel %vm227_vm1, %v8398_v22, 0 }
 0xf22   : > { %v8410_v51 = vmul.f32 %v6310_v61, %v3892_v44  ;;  %v4155_v61 = vsel %vm227_vm1, %v8362_v9, 0 }
 0xf23   : > { %6311 = vrcp.f32 %v4021_v4  ;;  %v6424_v4 = vld [vmem:[%s6584_s19 + $0x4] sm:$0xf]  ;;  %s5902_s19 = sshll.u32 %s9129_s24, 6  ;;  %s163_s24 = sand.u32 1, %s6479_s13  }
 0xf24   : > { %v4070_v30 = vpack.c.bf16 %v8410_v51, %v8410_v51  ;;  %s8637_s30 = scalar_lea.vmem %s9095_s3, %s5902_s19  ;;  %s5677_s5 = sshll.u32 %s163_s24, 3 }
 0xf25   : > { %s165_s9 = scalar_lea.vmem [#allocation2], %s5677_s5  ;;  %s5560_s17 = scalar_lea.sflag [#allocation3], %s163_s24 }
 0xf26   : > { %v4147_v55 = vunpack.c.l.b16 %v4070_v30  ;;  %4201 = vmatpush.bf16.xpose.msra.mxu1 %v4097_v29  ;;  %s5578_s10 = sshll.u32 %s165_s9, 4  ;;  %s5579_s10 = int_to_ptr.vmem [resolvable:$true] %s5578_s10 }
 0xf28   : > { %v4022_v31 = vpop.f32.mrf.mxu3  ;;  %v4152_v47 = vpack.c.b16 %v4147_v55, %v4146_v63 }
 0xf29   : > { %v4023_v34 = vadd.f32 1e-06, %v4022_v31  ;;  %v6312_v12 = vpop.eup %6311 }
 0xf2a   : > { %5845 = vmatmul.msk.bf16.gmra.mxu0 %vm227_vm1, %v4152_v47  ;;  %v8421_v13 = vmul.f32 %v6312_v12, %v3893_v43  ;;  %v4161_v16 = vsel %vm227_vm1, %v4152_v47, 0 }
 0xf2b   : > { %6313 = vrcp.f32 %v4023_v34 }
 0xf2c   : > { %v4071_v37 = vpack.c.bf16 %v8421_v13, %v8421_v13 }
 0xf2e   : > { %4202 = vmatpush.bf16.xpose.msra.mxu1 %v4094_v38  ;;  %v4148_v10 = vunpack.c.l.b16 %v4071_v37 }
 0xf31   : > { %v6314_v18 = vpop.eup %6313 }
 0xf32   : > { %v8427_v48 = vmul.f32 %v6314_v18, %v3894_v57 }
 0xf34   : > { %v4072_v36 = vpack.c.bf16 %v8427_v48, %v8427_v48 }
 0xf35   : > { %5847 = vmatmul.msk.bf16.vlgmr.msra.gmra.mxu1 %vm227_vm1, %v8318_v40 }
 0xf36   : > { %4486 = vmatpush.bf16.xpose.msrb.mxu1 %v6423_v24  ;;  %v4149_v44 = vunpack.c.l.b16 %v4072_v36 }
 0xf38   : > { %v4153_v53 = vpack.c.b16 %v4149_v44, %v4148_v10 }
 0xf3a   : > { %5846 = vmatmul.msk.bf16.gmra.mxu0 %vm227_vm1, %v4153_v53  ;;  %v4164_v46 = vsel %vm227_vm1, %v4153_v53, 0 }
 0xf3b   : > { %4228 = vmatpush.bf16.xpose.msrb.mxu3 %v4164_v46 }
 0xf3e   : > { %4691 = vmatpush.bf16.msra.mxu1 %v8392_v42 }
 0xf42   : > { %4692 = vmatpush.bf16.msra.mxu1 %v8360_v33 }
 0xf43   : > { %4229 = vmatpush.bf16.xpose.msrb.mxu3 %v4161_v16 }
 0xf45   : > { %5848 = vmatmul.msk.bf16.gmra.mxu1 %vm227_vm1, %v8334_v35 }
 0xf46   : > { %4693 = vmatpush.bf16.msra.mxu1 %v8334_v35 }
 0xf4a   : > { %4694 = vmatpush.bf16.msra.mxu1 %v8318_v40 }
 0xf4b   : > { %4230 = vmatpush.bf16.xpose.msrb.mxu3 %v4158_v32 }
 0xf53   : > { %4231 = vmatpush.bf16.xpose.msrb.mxu3 %v4155_v61 }
 0xf55   : > { %5849 = vmatmul.msk.bf16.gmra.mxu1 %vm227_vm1, %v8360_v33 }
 0xf5a   : > { %5851 = vmatmul.msk.bf16.vlgmr.msrb.gmra.mxu3 %vm227_vm1, %v8362_v9 }
 0xf5b   : > { %4539 = vmatpush.bf16.xpose.msra.mxu3 %v6424_v4 }
 0xf63   : > { %4756 = vmatpush.bf16.msrb.mxu3 %v4153_v53 }
 0xf65   : > { %5850 = vmatmul.msk.bf16.gmra.mxu1 %vm227_vm1, %v8392_v42 }
 0xf67   : > { %4757 = vmatpush.bf16.msrb.mxu3 %v4152_v47 }
 0xf6a   : > { %5852 = vmatmul.msk.bf16.gmra.mxu3 %vm227_vm1, %v8398_v22 }
 0xf6b   : > { %4758 = vmatpush.bf16.msrb.mxu3 %v8398_v22 }
 0xf6f   : > { %4759 = vmatpush.bf16.msrb.mxu3 %v8362_v9 }
 0xf7a   : > { %5853 = vmatmul.msk.bf16.gmra.mxu3 %vm227_vm1, %v4152_v47 }
 0xf8a   : > { %5854 = vmatmul.msk.bf16.gmra.mxu3 %vm227_vm1, %v4153_v53 }
 0xfb2   : > { %v4204_v40 = vpop.f32.mrf.mxu1 }
 0xfb3   : > { %v4253_v35 = vpack.c.bf16 %v4204_v40, %v4204_v40 }
 0xfb5   : > { %v4293_v30 = vunpack.c.l.b16 %v4253_v35 }
 0xfba   : > { %v4206_v33 = vpop.f32.mrf.mxu1 }
 0xfbb   : > { %v4254_v3 = vpack.c.bf16 %v4206_v33, %v4206_v33 }
 0xfbd   : > { %v4294_v63 = vunpack.c.l.b16 %v4254_v3 }
 0xfbf   : > { %v4301_v55 = vpack.c.b16 %v4294_v63, %v4293_v30 }
 0xfc1   : > { %5855 = vmatmul.msk.bf16.vlgmr.msra.gmra.mxu2 %vm536_vm2, %v4301_v55 }
 0xfc2   : > { %v4209_v9 = vpop.f32.mrf.mxu1 }
 0xfc3   : > { %v4255_v29 = vpack.c.bf16 %v4209_v9, %v4209_v9 }
 0xfc5   : > { %v4295_v34 = vunpack.c.l.b16 %v4255_v29 }
 0xfca   : > { %v4211_v31 = vpop.f32.mrf.mxu1 }
 0xfcb   : > { %v4256_v42 = vpack.c.bf16 %v4211_v31, %v4211_v31 }
 0xfcd   : > { %v4296_v12 = vunpack.c.l.b16 %v4256_v42 }
 0xfcf   : > { %v4302_v22 = vpack.c.b16 %v4296_v12, %v4295_v34  ;;  %v4114_v34 = vpop.f32.mrf.mxu2 }
 0xfd1   : > { %5856 = vmatmul.msk.bf16.gmra.mxu2 %vm536_vm2, %v4302_v22 }
 0xfd2   : > { %v4214_v47 = vpop.f32.mrf.mxu1 }
 0xfd3   : > { %v4257_v43 = vpack.c.bf16 %v4214_v47, %v4214_v47 }
 0xfd5   : > { %v4297_v24 = vunpack.c.l.b16 %v4257_v43 }
 0xfd7   : > { %v4116_v47 = vpop.f32.mrf.mxu2 }
 0xfda   : > { %v4216_v57 = vpop.f32.mrf.mxu1 }
 0xfdb   : > { %v4258_v18 = vpack.c.bf16 %v4216_v57, %v4216_v57 }
 0xfdd   : > { %v4233_v38 = vpop.f32.mrf.mxu3  ;;  %v4298_v37 = vunpack.c.l.b16 %v4258_v18 }
 0xfde   : > { %v4261_v10 = vpack.c.bf16 %v4233_v38, %v4233_v38 }
 0xfdf   : > { %v4303_v36 = vpack.c.b16 %v4298_v37, %v4297_v24 }
 0xfe0   : > { %v4354_v16 = vunpack.c.l.b16 %v4261_v10 }
 0xfe1   : > { %5857 = vmatmul.msk.bf16.gmra.mxu2 %vm536_vm2, %v4303_v36  ;;  %v4119_v36 = vpop.f32.mrf.mxu2 }
 0xfe2   : > { %v4219_v44 = vpop.f32.mrf.mxu1 }
 0xfe3   : > { %v4259_v4 = vpack.c.bf16 %v4219_v44, %v4219_v44 }
 0xfe5   : > { %v4235_v53 = vpop.f32.mrf.mxu3  ;;  %v4299_v3 = vunpack.c.l.b16 %v4259_v4 }
 0xfe6   : > { %v4262_v46 = vpack.c.bf16 %v4235_v53, %v4235_v53 }
 0xfe8   : > { %v4355_v32 = vunpack.c.l.b16 %v4262_v46 }
 0xfea   : > { %v4362_v61 = vpack.c.b16 %v4355_v32, %v4354_v16  ;;  %v4221_v40 = vpop.f32.mrf.mxu1  ;;  %v4121_v16 = vpop.f32.mrf.mxu2 }
 0xfeb   : > { %v4260_v33 = vpack.c.bf16 %v4221_v40, %v4221_v40  ;;  %v8469_v40 = vpop.f32.mrf.mxu0 }
 0xfec   : > { %5859 = vmatmul.msk.bf16.vlgmr.msra.gmra.mxu0 %vm536_vm2, %v4362_v61 }
 0xfed   : > { %v4238_v35 = vpop.f32.mrf.mxu3  ;;  %v4300_v30 = vunpack.c.l.b16 %v4260_v33 }
 0xfee   : > { %v4263_v55 = vpack.c.bf16 %v4238_v35, %v4238_v35 }
 0xfef   : > { %v4304_v63 = vpack.c.b16 %v4300_v30, %v4299_v3 }
 0xff0   : > { %v4356_v31 = vunpack.c.l.b16 %v4263_v55 }
 0xff1   : > { %5858 = vmatmul.msk.bf16.gmra.mxu2 %vm536_vm2, %v4304_v63 }
 0xff2   : > { %v4124_v35 = vpop.f32.mrf.mxu2 }
 0xff3   : > { %v8472_v33 = vpop.f32.mrf.mxu0 }
 0xff5   : > { %v4240_v9 = vpop.f32.mrf.mxu3 }
 0xff6   : > { %v4264_v29 = vpack.c.bf16 %v4240_v9, %v4240_v9 }
 0xff8   : > { %v4357_v42 = vunpack.c.l.b16 %v4264_v29 }
 0xffa   : > { %v4363_v12 = vpack.c.b16 %v4357_v42, %v4356_v31  ;;  %v4126_v3 = vpop.f32.mrf.mxu2 }
 0xffb   : > { %v8474_v30 = vpop.f32.mrf.mxu0 }
 0xffc   : > { %5860 = vmatmul.msk.bf16.gmra.mxu0 %vm536_vm2, %v4363_v12 }
 0xffd   : > { %v4243_v22 = vpop.f32.mrf.mxu3 }
 0xffe   : > { %v4265_v43 = vpack.c.bf16 %v4243_v22, %v4243_v22 }
0x1000   : > { %v4358_v18 = vunpack.c.l.b16 %v4265_v43 }
0x1002   : > { %v8476_v63 = vpop.f32.mrf.mxu2 }
0x1003   : > { %v8478_v55 = vpop.f32.mrf.mxu0 }
0x1005   : > { %v4245_v57 = vpop.f32.mrf.mxu3 }
0x1006   : > { %v4266_v38 = vpack.c.bf16 %v4245_v57, %v4245_v57 }
0x1008   : > { %v4359_v24 = vunpack.c.l.b16 %v4266_v38  ;;  %v4269_v38 = vmul.f32 %v4114_v34, %v8163_v28 }
0x100a   : > { %v4364_v37 = vpack.c.b16 %v4359_v24, %v4358_v18  ;;  %v8480_v9 = vpop.f32.mrf.mxu2  ;;  %v4270_v24 = vmul.f32 %v4116_v47, %v8170_v52 }
0x100b   : > { %v8482_v29 = vpop.f32.mrf.mxu0 }
0x100c   : > { %5861 = vmatmul.msk.bf16.gmra.mxu0 %vm536_vm2, %v4364_v37 }
0x100d   : > { %v4248_v10 = vpop.f32.mrf.mxu3 }
0x100e   : > { %v4267_v44 = vpack.c.bf16 %v4248_v10, %v4248_v10 }
0x1010   : > { %v4360_v32 = vunpack.c.l.b16 %v4267_v44 }
0x1013   : > { %v8484_v12 = vpop.f32.mrf.mxu0 }
0x1015   : > { %v4250_v53 = vpop.f32.mrf.mxu3 }
0x1016   : > { %v4268_v46 = vpack.c.bf16 %v4250_v53, %v4250_v53 }
0x1018   : > { %v4361_v61 = vunpack.c.l.b16 %v4268_v46 }
0x101a   : > { %v4365_v4 = vpack.c.b16 %v4361_v61, %v4360_v32 }
0x101b   : > { %v8490_v37 = vpop.f32.mrf.mxu0 }
0x101c   : > { %5862 = vmatmul.msk.bf16.gmra.mxu0 %vm536_vm2, %v4365_v4 }
0x1023   : > { %v8500_v47 = vpop.f32.mrf.mxu0 }
0x1044   : > { %v4326_v31 = vpop.f32.mrf.mxu2 }
0x1045   : > { %v4327_v42 = vadd.f32 1e-06, %v4326_v31 }
0x1047   : > { %6315 = vrcp.f32 %v4327_v42 }
0x104c   : > { %v4328_v22 = vpop.f32.mrf.mxu2 }
0x104d   : > { %v4329_v43 = vadd.f32 1e-06, %v4328_v22  ;;  %v6316_v57 = vpop.eup %6315  ;;  %v4271_v22 = vmul.f32 %v4119_v36, %v8180_v39 }
0x104e   : > { %v8487_v18 = vmul.f32 %v6316_v57, %v4269_v38  ;;  %v4272_v57 = vmul.f32 %v4121_v16, %v8183_v2 }
0x104f   : > { %6317 = vrcp.f32 %v4329_v43 }
0x1050   : > { %v4439_v46 = vpack.c.bf16 %v8487_v18, %v8487_v18 }
0x1052   : > { %v4463_v4 = vunpack.c.l.b16 %v4439_v46 }
0x1054   : > { %v4331_v10 = vpop.f32.mrf.mxu2 }
0x1055   : > { %v6318_v44 = vpop.eup %6317  ;;  %v4332_v53 = vadd.f32 1e-06, %v4331_v10 }
0x1056   : > { %v8494_v32 = vmul.f32 %v6318_v44, %v4270_v24 }
0x1057   : > { %6319 = vrcp.f32 %v4332_v53 }
0x1058   : > { %v4440_v61 = vpack.c.bf16 %v8494_v32, %v8494_v32 }
0x105a   : > { %v4464_v28 = vunpack.c.l.b16 %v4440_v61 }
0x105c   : > { %v4333_v34 = vpop.f32.mrf.mxu2  ;;  %v8498_v31 = vpack.c.b16 %v4464_v28, %v4463_v4 }
0x105d   : > { %v4334_v52 = vadd.f32 1e-06, %v4333_v34  ;;  %v6320_v42 = vpop.eup %6319 }
0x105e   : > { %4487 = vmatmul.bf16.vlgmr.msrb.gmra.mxu1 %v8498_v31  ;;  %v8504_v43 = vmul.f32 %v6320_v42, %v4271_v22  ;;  %v4273_v22 = vmul.f32 %v4124_v35, %v8195_v45 }
0x105f   : > { %6321 = vrcp.f32 %v4334_v52 }
0x1060   : > { %v4441_v46 = vpack.c.bf16 %v8504_v43, %v8504_v43 }
0x1062   : > { %v4465_v28 = vunpack.c.l.b16 %v4441_v46 }
0x1064   : > { %v4336_v38 = vpop.f32.mrf.mxu2 }
0x1065   : > { %v6322_v24 = vpop.eup %6321  ;;  %v4337_v10 = vadd.f32 1e-06, %v4336_v38  ;;  %v4277_v38 = vmul.f32 %v8469_v40, %v8198_v11 }
0x1066   : > { %v8507_v44 = vmul.f32 %v6322_v24, %v4272_v57 }
0x1067   : > { %6323 = vrcp.f32 %v4337_v10  ;;  %v4274_v10 = vmul.f32 %v4126_v3, %v8202_v62 }
0x1068   : > { %v4442_v4 = vpack.c.bf16 %v8507_v44, %v8507_v44 }
0x1069   : > { %v4387_v53 = vpop.f32.mrf.mxu0 }
0x106a   : > { %v4388_v61 = vadd.f32 1e-06, %v4387_v53  ;;  %v4466_v39 = vunpack.c.l.b16 %v4442_v4 }
0x106c   : > { %6325 = vrcp.f32 %v4388_v61  ;;  %v4338_v36 = vpop.f32.mrf.mxu2  ;;  %v8513_v34 = vpack.c.b16 %v4466_v39, %v4465_v28  ;;  %v4278_v28 = vmul.f32 %v8472_v33, %v8208_v27 }
0x106d   : > { %v4339_v2 = vadd.f32 1e-06, %v4338_v36  ;;  %v6324_v52 = vpop.eup %6323 }
0x106e   : > { %4492 = vmatmul.bf16.gmra.mxu1 %v8513_v34  ;;  %v8519_v24 = vmul.f32 %v6324_v52, %v4273_v22 }
0x106f   : > { %6327 = vrcp.f32 %v4339_v2 }
0x1070   : > { %v4443_v35 = vpack.c.bf16 %v8519_v24, %v8519_v24 }
0x1071   : > { %v4389_v16 = vpop.f32.mrf.mxu0 }
0x1072   : > { %v4390_v42 = vadd.f32 1e-06, %v4389_v16  ;;  %v6326_v57 = vpop.eup %6325  ;;  %v4467_v33 = vunpack.c.l.b16 %v4443_v35 }
0x1073   : > { %v8522_v53 = vmul.f32 %v6326_v57, %v4277_v38 }
0x1074   : > { %6329 = vrcp.f32 %v4390_v42  ;;  %v4341_v46 = vpop.f32.mrf.mxu2 }
0x1075   : > { %v6328_v61 = vpop.eup %6327  ;;  %v4342_v4 = vadd.f32 1e-06, %v4341_v46  ;;  %v4447_v40 = vpack.c.bf16 %v8522_v53, %v8522_v53 }
0x1076   : > { %v8526_v39 = vmul.f32 %v6328_v61, %v4274_v10 }
0x1077   : > { %6331 = vrcp.f32 %v4342_v4  ;;  %v4516_v16 = vunpack.c.l.b16 %v4447_v40  ;;  %v4275_v4 = vmul.f32 %v8476_v63, %v8224_v56 }
0x1078   : > { %v4444_v3 = vpack.c.bf16 %v8526_v39, %v8526_v39 }
0x1079   : > { %v4392_v45 = vpop.f32.mrf.mxu0 }
0x107a   : > { %v6330_v36 = vpop.eup %6329  ;;  %v4393_v11 = vadd.f32 1e-06, %v4392_v45  ;;  %v4468_v2 = vunpack.c.l.b16 %v4444_v3  ;;  %v4279_v45 = vmul.f32 %v8474_v30, %v8228_v58  ;;  %v4280_v3 = vmul.f32 %v8478_v55, %v8236_v0 }
0x107b   : > { %v8532_v62 = vmul.f32 %v6330_v36, %v4278_v28  ;;  %v4276_v36 = vmul.f32 %v8480_v9, %v8232_v14 }
0x107c   : > { %6333 = vrcp.f32 %v4393_v11  ;;  %v4343_v42 = vpop.f32.mrf.mxu2  ;;  %v8538_v22 = vpack.c.b16 %v4468_v2, %v4467_v33 }
0x107d   : > { %v4448_v27 = vpack.c.bf16 %v8532_v62, %v8532_v62  ;;  %v4344_v57 = vadd.f32 1e-06, %v4343_v42  ;;  %v6332_v46 = vpop.eup %6331 }
0x107e   : > { %4497 = vmatmul.bf16.gmra.mxu1 %v8538_v22  ;;  %v8548_v35 = vmul.f32 %v6332_v46, %v4275_v4  ;;  %v4281_v4 = vmul.f32 %v8482_v29, %v8246_v17 }
0x107f   : > { %v4517_v52 = vunpack.c.l.b16 %v4448_v27  ;;  %6335 = vrcp.f32 %v4344_v57 }
0x1080   : > { %v4445_v63 = vpack.c.bf16 %v8548_v35, %v8548_v35 }
0x1081   : > { %v4394_v38 = vpop.f32.mrf.mxu0  ;;  %v8541_v10 = vpack.c.b16 %v4517_v52, %v4516_v16 }
0x1082   : > { %v4395_v61 = vadd.f32 1e-06, %v4394_v38  ;;  %v6334_v28 = vpop.eup %6333  ;;  %v4469_v9 = vunpack.c.l.b16 %v4445_v63 }
0x1083   : > { %4540 = vmatmul.bf16.vlgmr.msra.gmra.mxu3 %v8541_v10  ;;  %v8552_v11 = vmul.f32 %v6334_v28, %v4279_v45  ;;  %v4282_v45 = vmul.f32 %v8484_v12, %v8251_v1 }
0x1084   : > { %6337 = vrcp.f32 %v4395_v61 }
0x1085   : > { %v6336_v40 = vpop.eup %6335  ;;  %v4449_v14 = vpack.c.bf16 %v8552_v11, %v8552_v11 }
0x1086   : > { %v8556_v27 = vmul.f32 %v6336_v40, %v4276_v36 }
0x1087   : > { %v4518_v52 = vunpack.c.l.b16 %v4449_v14  ;;  %v4283_v14 = vmul.f32 %v8490_v37, %v8260_v26 }
0x1088   : > { %v4446_v30 = vpack.c.bf16 %v8556_v27, %v8556_v27 }
0x1089   : > { %v4397_v56 = vpop.f32.mrf.mxu0 }
0x108a   : > { %v6338_v33 = vpop.eup %6337  ;;  %v4398_v2 = vadd.f32 1e-06, %v4397_v56  ;;  %v4470_v16 = vunpack.c.l.b16 %v4446_v30 }
0x108b   : > { %v8560_v58 = vmul.f32 %v6338_v33, %v4280_v3 }
0x108c   : > { %6339 = vrcp.f32 %v4398_v2  ;;  %v4474_v55 = vpack.c.b16 %v4470_v16, %v4469_v9  ;;  %v4284_v16 = vmul.f32 %v8500_v47, %v8266_v8 }
0x108d   : > { %v4450_v0 = vpack.c.bf16 %v8560_v58, %v8560_v58 }
0x108e   : > { %4502 = vmatmul.bf16.gmra.mxu1 %v4474_v55  ;;  %4565 = vmatpush.bf16.xpose.msrb.mxu2 %v4474_v55 }
0x108f   : > { %v4519_v42 = vunpack.c.l.b16 %v4450_v0 }
0x1091   : > { %v4399_v57 = vpop.f32.mrf.mxu0  ;;  %v4525_v38 = vpack.c.b16 %v4519_v42, %v4518_v52 }
0x1092   : > { %v4400_v46 = vadd.f32 1e-06, %v4399_v57  ;;  %v6340_v61 = vpop.eup %6339 }
0x1093   : > { %4545 = vmatmul.bf16.gmra.mxu3 %v4525_v38  ;;  %v8570_v28 = vmul.f32 %v6340_v61, %v4281_v4 }
0x1094   : > { %6341 = vrcp.f32 %v4400_v46 }
0x1095   : > { %v4451_v63 = vpack.c.bf16 %v8570_v28, %v8570_v28 }
0x1096   : > { %4566 = vmatpush.bf16.xpose.msrb.mxu2 %v8538_v22 }
0x1097   : > { %v4520_v17 = vunpack.c.l.b16 %v4451_v63 }
0x1099   : > { %v4402_v36 = vpop.f32.mrf.mxu0 }
0x109a   : > { %v6342_v40 = vpop.eup %6341  ;;  %v4403_v3 = vadd.f32 1e-06, %v4402_v36 }
0x109b   : > { %v8575_v56 = vmul.f32 %v6342_v40, %v4282_v45 }
0x109c   : > { %6343 = vrcp.f32 %v4403_v3 }
0x109d   : > { %v4452_v33 = vpack.c.bf16 %v8575_v56, %v8575_v56 }
0x109e   : > { %4567 = vmatpush.bf16.xpose.msrb.mxu2 %v8513_v34 }
0x109f   : > { %v4521_v29 = vunpack.c.l.b16 %v4452_v33 }
0x10a1   : > { %v4404_v2 = vpop.f32.mrf.mxu0  ;;  %v4526_v1 = vpack.c.b16 %v4521_v29, %v4520_v17 }
0x10a2   : > { %v4405_v12 = vadd.f32 1e-06, %v4404_v2  ;;  %v6344_v30 = vpop.eup %6343 }
0x10a3   : > { %4550 = vmatmul.bf16.gmra.mxu3 %v4526_v1  ;;  %v8584_v9 = vmul.f32 %v6344_v30, %v4283_v14 }
0x10a4   : > { %6345 = vrcp.f32 %v4405_v12 }
0x10a5   : > { %v4453_v42 = vpack.c.bf16 %v8584_v9, %v8584_v9 }
0x10a6   : > { %4568 = vmatpush.bf16.xpose.msrb.mxu2 %v8498_v31 }
0x10a7   : > { %v4522_v46 = vunpack.c.l.b16 %v4453_v42 }
0x10aa   : > { %v6346_v0 = vpop.eup %6345 }
0x10ab   : > { %v8590_v52 = vmul.f32 %v6346_v0, %v4284_v16 }
0x10ad   : > { %v4454_v57 = vpack.c.bf16 %v8590_v52, %v8590_v52  ;;  %4569 = vmatmul.bf16.vlgmr.msrb.gmra.mxu2 %v8498_v31 }
0x10ae   : > { %4868 = vmatpush.bf16.msra.mxu2 %v6590_v20 }
0x10af   : > { %v4523_v26 = vunpack.c.l.b16 %v4454_v57 }
0x10b1   : > { %v4527_v37 = vpack.c.b16 %v4523_v26, %v4522_v46 }
0x10b2   : > { %5077 = vmatpush.bf16.msrb.mxu2 %v4474_v55 }
0x10b3   : > { %4555 = vmatmul.bf16.gmra.mxu3 %v4527_v37  ;;  %4594 = vmatpush.bf16.xpose.msrb.mxu0 %v4527_v37 }
0x10b6   : > { %5078 = vmatpush.bf16.msrb.mxu2 %v8538_v22 }
0x10ba   : > { %5079 = vmatpush.bf16.msrb.mxu2 %v8513_v34 }
0x10bb   : > { %4595 = vmatpush.bf16.xpose.msrb.mxu0 %v4526_v1 }
0x10bd   : > { %4574 = vmatmul.bf16.gmra.mxu2 %v8513_v34 }
0x10be   : > { %5080 = vmatpush.bf16.msrb.mxu2 %v8498_v31 }
0x10c3   : > { %4596 = vmatpush.bf16.xpose.msrb.mxu0 %v4525_v38 }
0x10cb   : > { %4597 = vmatpush.bf16.xpose.msrb.mxu0 %v8541_v10 }
0x10cd   : > { %4579 = vmatmul.bf16.gmra.mxu2 %v8538_v22 }
0x10d2   : > { %4598 = vmatmul.bf16.vlgmr.msrb.gmra.mxu0 %v8541_v10 }
0x10d3   : > { %4929 = vmatpush.bf16.msra.mxu0 %v6597_v23 }
0x10d7   : > { %5138 = vmatpush.bf16.msrb.mxu0 %v4527_v37 }
0x10db   : > { %5139 = vmatpush.bf16.msrb.mxu0 %v4526_v1 }
0x10dd   : > { %4584 = vmatmul.bf16.gmra.mxu2 %v4474_v55 }
0x10df   : > { %5140 = vmatpush.bf16.msrb.mxu0 %v4525_v38 }
0x10e2   : > { %4603 = vmatmul.bf16.gmra.mxu0 %v4525_v38 }
0x10e3   : > { %5141 = vmatpush.bf16.msrb.mxu0 %v8541_v10 }
0x10f2   : > { %4608 = vmatmul.bf16.gmra.mxu0 %v4526_v1 }
0x1102   : > { %4613 = vmatmul.bf16.gmra.mxu0 %v4527_v37 }
0x1130   : > { %v4570_v20 = vpop.f32.mrf.mxu2 }
0x1131   : > { %v4619_v8 = vpack.c.bf16 %v4570_v20, %v4570_v20 }
0x1133   : > { %v4659_v34 = vunpack.c.l.b16 %v4619_v8 }
0x1138   : > { %v4572_v31 = vpop.f32.mrf.mxu2 }
0x1139   : > { %v4620_v47 = vpack.c.bf16 %v4572_v31, %v4572_v31 }
0x113b   : > { %v4660_v61 = vunpack.c.l.b16 %v4620_v47 }
0x113d   : > { %v4667_v23 = vpack.c.b16 %v4660_v61, %v4659_v34 }
0x113f   : > { %5863 = vmatmul.msk.bf16.vlgmr.msra.gmra.mxu1 %vm536_vm2, %v4667_v23 }
0x1140   : > { %v4575_v22 = vpop.f32.mrf.mxu2 }
0x1141   : > { %v4621_v4 = vpack.c.bf16 %v4575_v22, %v4575_v22 }
0x1143   : > { %v4661_v40 = vunpack.c.l.b16 %v4621_v4 }
0x1148   : > { %v4577_v45 = vpop.f32.mrf.mxu2 }
0x1149   : > { %v4622_v36 = vpack.c.bf16 %v4577_v45, %v4577_v45 }
0x114b   : > { %v4662_v3 = vunpack.c.l.b16 %v4622_v36 }
0x114d   : > { %v4668_v55 = vpack.c.b16 %v4662_v3, %v4661_v40  ;;  %v4488_v40 = vpop.f32.mrf.mxu1 }
0x114f   : > { %v4599_v10 = vpop.f32.mrf.mxu0  ;;  %5864 = vmatmul.msk.bf16.gmra.mxu1 %vm536_vm2, %v4668_v55 }
0x1150   : > { %v4580_v38 = vpop.f32.mrf.mxu2  ;;  %v4627_v63 = vpack.c.bf16 %v4599_v10, %v4599_v10 }
0x1151   : > { %v4623_v2 = vpack.c.bf16 %v4580_v38, %v4580_v38 }
0x1152   : > { %v4724_v29 = vunpack.c.l.b16 %v4627_v63 }
0x1153   : > { %v4663_v16 = vunpack.c.l.b16 %v4623_v2 }
0x1157   : > { %v4601_v33 = vpop.f32.mrf.mxu0 }
0x1158   : > { %v4628_v17 = vpack.c.bf16 %v4601_v33, %v4601_v33  ;;  %v4582_v12 = vpop.f32.mrf.mxu2  ;;  %v4490_v33 = vpop.f32.mrf.mxu1 }
0x1159   : > { %v4624_v14 = vpack.c.bf16 %v4582_v12, %v4582_v12 }
0x115a   : > { %v4725_v1 = vunpack.c.l.b16 %v4628_v17 }
0x115b   : > { %v4664_v0 = vunpack.c.l.b16 %v4624_v14 }
0x115c   : > { %v4732_v30 = vpack.c.b16 %v4725_v1, %v4724_v29 }
0x115d   : > { %v4669_v57 = vpack.c.b16 %v4664_v0, %v4663_v16 }
0x115e   : > { %5867 = vmatmul.msk.bf16.vlgmr.msrb.gmra.mxu3 %vm536_vm2, %v4732_v30 }
0x115f   : > { %v4604_v42 = vpop.f32.mrf.mxu0  ;;  %5865 = vmatmul.msk.bf16.gmra.mxu1 %vm536_vm2, %v4669_v57  ;;  %v8614_v57 = vpop.f32.mrf.mxu3 }
0x1160   : > { %v4585_v46 = vpop.f32.mrf.mxu2  ;;  %v4629_v26 = vpack.c.bf16 %v4604_v42, %v4604_v42  ;;  %v4493_v2 = vpop.f32.mrf.mxu1 }
0x1161   : > { %v4625_v31 = vpack.c.bf16 %v4585_v46, %v4585_v46 }
0x1162   : > { %v4726_v8 = vunpack.c.l.b16 %v4629_v26 }
0x1163   : > { %v4665_v22 = vunpack.c.l.b16 %v4625_v31 }
0x1167   : > { %v4606_v37 = vpop.f32.mrf.mxu0  ;;  %v8616_v26 = vpop.f32.mrf.mxu3 }
0x1168   : > { %v4630_v20 = vpack.c.bf16 %v4606_v37, %v4606_v37  ;;  %v4587_v34 = vpop.f32.mrf.mxu2  ;;  %v4495_v42 = vpop.f32.mrf.mxu1 }
0x1169   : > { %v4626_v23 = vpack.c.bf16 %v4587_v34, %v4587_v34 }
0x116a   : > { %v4727_v47 = vunpack.c.l.b16 %v4630_v20 }
0x116b   : > { %v4666_v4 = vunpack.c.l.b16 %v4626_v23 }
0x116c   : > { %v4733_v61 = vpack.c.b16 %v4727_v47, %v4726_v8 }
0x116d   : > { %v4670_v36 = vpack.c.b16 %v4666_v4, %v4665_v22  ;;  %v4635_v4 = vmul.f32 %v4488_v40, %v8307_v60 }
0x116e   : > { %5868 = vmatmul.msk.bf16.gmra.mxu3 %vm536_vm2, %v4733_v61 }
0x116f   : > { %v4609_v45 = vpop.f32.mrf.mxu0  ;;  %5866 = vmatmul.msk.bf16.gmra.mxu1 %vm536_vm2, %v4670_v36  ;;  %v8620_v20 = vpop.f32.mrf.mxu3 }
0x1170   : > { %v4631_v3 = vpack.c.bf16 %v4609_v45, %v4609_v45  ;;  %v4498_v46 = vpop.f32.mrf.mxu1 }
0x1172   : > { %v4728_v38 = vunpack.c.l.b16 %v4631_v3 }
0x1177   : > { %v4611_v10 = vpop.f32.mrf.mxu0  ;;  %v8624_v31 = vpop.f32.mrf.mxu3 }
0x1178   : > { %v4632_v55 = vpack.c.bf16 %v4611_v10, %v4611_v10  ;;  %v8618_v37 = vpop.f32.mrf.mxu1 }
0x117a   : > { %v4729_v63 = vunpack.c.l.b16 %v4632_v55  ;;  %v4636_v55 = vmul.f32 %v4490_v33, %v8314_v19 }
0x117c   : > { %v4734_v17 = vpack.c.b16 %v4729_v63, %v4728_v38 }
0x117e   : > { %5869 = vmatmul.msk.bf16.gmra.mxu3 %vm536_vm2, %v4734_v17 }
0x117f   : > { %v4614_v29 = vpop.f32.mrf.mxu0  ;;  %v8628_v34 = vpop.f32.mrf.mxu3 }
0x1180   : > { %v4633_v1 = vpack.c.bf16 %v4614_v29, %v4614_v29  ;;  %v8622_v8 = vpop.f32.mrf.mxu1 }
0x1182   : > { %v4730_v14 = vunpack.c.l.b16 %v4633_v1 }
0x1187   : > { %v4616_v12 = vpop.f32.mrf.mxu0  ;;  %v8631_v22 = vpop.f32.mrf.mxu3 }
0x1188   : > { %v4634_v30 = vpack.c.bf16 %v4616_v12, %v4616_v12  ;;  %v8626_v47 = vpop.f32.mrf.mxu1 }
0x118a   : > { %v4731_v16 = vunpack.c.l.b16 %v4634_v30 }
0x118c   : > { %v4735_v0 = vpack.c.b16 %v4731_v16, %v4730_v14  ;;  %v4637_v14 = vmul.f32 %v4493_v2, %v8325_v15 }
0x118e   : > { %5870 = vmatmul.msk.bf16.gmra.mxu3 %vm536_vm2, %v4735_v0 }
0x118f   : > { %v8642_v38 = vpop.f32.mrf.mxu3 }
0x11bc   : > { %v4696_v61 = vpop.f32.mrf.mxu1 }
0x11bd   : > { %v4697_v23 = vadd.f32 1e-06, %v4696_v61  ;;  %v8649_v61 = vpop.f32.mrf.mxu3 }
0x11bf   : > { %6347 = vrcp.f32 %v4697_v23 }
0x11c4   : > { %v4698_v45 = vpop.f32.mrf.mxu1 }
0x11c5   : > { %v6348_v36 = vpop.eup %6347  ;;  %v4699_v3 = vadd.f32 1e-06, %v4698_v45 }
0x11c6   : > { %v4797_v10 = vmul.f32 %v6348_v36, %v4635_v4  ;;  %v4638_v4 = vmul.f32 %v4495_v42, %v8328_v54 }
0x11c7   : > { %6349 = vrcp.f32 %v4699_v3 }
0x11c8   : > { %5543 = vst.msk [vmem:[%s8637_s30] sm:$0xff] %vm227_vm1, %v4797_v10  ;;  %v4813_v17 = vpack.c.bf16 %v4797_v10, %v4797_v10 }
0x11ca   : > { %v4837_v12 = vunpack.c.l.b16 %v4813_v17  ;;  %v4639_v17 = vmul.f32 %v4498_v46, %v8341_v50  ;;  %v4640_v46 = vmul.f32 %v8618_v37, %v8348_v7 }
0x11cc   : > { %v4701_v63 = vpop.f32.mrf.mxu1 }
0x11cd   : > { %v6350_v60 = vpop.eup %6349  ;;  %v4702_v40 = vadd.f32 1e-06, %v4701_v63 }
0x11ce   : > { %v4798_v29 = vmul.f32 %v6350_v60, %v4636_v55 }
0x11cf   : > { %6351 = vrcp.f32 %v4702_v40 }
0x11d0   : > { %v4814_v1 = vpack.c.bf16 %v4798_v29, %v4798_v29  ;;  %5544 = vst.msk [vmem:[%s8637_s30 + $0x8] sm:$0xff] %vm227_vm1, %v4798_v29 }
0x11d2   : > { %v4838_v30 = vunpack.c.l.b16 %v4814_v1 }
0x11d4   : > { %v8647_v16 = vpack.c.b16 %v4838_v30, %v4837_v12  ;;  %v4703_v0 = vpop.f32.mrf.mxu1  ;;  %v4643_v12 = vmul.f32 %v8614_v57, %v8344_v5 }
0x11d5   : > { %v6352_v19 = vpop.eup %6351  ;;  %v4704_v33 = vadd.f32 1e-06, %v4703_v0 }
0x11d6   : > { %v4799_v23 = vmul.f32 %v6352_v19, %v4637_v14  ;;  %5871 = vmatmul.msk.bf16.vlgmr.msra.gmra.mxu2 %vm227_vm1, %v8647_v16 }
0x11d7   : > { %6353 = vrcp.f32 %v4704_v33 }
0x11d8   : > { %5545 = vst.msk [vmem:[%s8637_s30 + $0x10] sm:$0xff] %vm227_vm1, %v4799_v23  ;;  %v4815_v10 = vpack.c.bf16 %v4799_v23, %v4799_v23  ;;  %v4644_v23 = vmul.f32 %v8616_v26, %v8354_v25  ;;  %v4641_v25 = vmul.f32 %v8622_v8, %v8372_v49 }
0x11da   : > { %v4839_v60 = vunpack.c.l.b16 %v4815_v10 }
0x11dc   : > { %v4706_v45 = vpop.f32.mrf.mxu1 }
0x11dd   : > { %v6354_v36 = vpop.eup %6353  ;;  %v4707_v15 = vadd.f32 1e-06, %v4706_v45 }
0x11de   : > { %v4800_v2 = vmul.f32 %v6354_v36, %v4638_v4 }
0x11df   : > { %6355 = vrcp.f32 %v4707_v15 }
0x11e0   : > { %5546 = vst.msk [vmem:[%s8637_s30 + $0x18] sm:$0xff] %vm227_vm1, %v4800_v2  ;;  %v4816_v63 = vpack.c.bf16 %v4800_v2, %v4800_v2 }
0x11e1   : > { %v4761_v3 = vpop.f32.mrf.mxu3 }
0x11e2   : > { %v4762_v55 = vadd.f32 1e-06, %v4761_v3  ;;  %v4840_v40 = vunpack.c.l.b16 %v4816_v63 }
0x11e4   : > { %6357 = vrcp.f32 %v4762_v55  ;;  %v4708_v29 = vpop.f32.mrf.mxu1  ;;  %v8659_v54 = vpack.c.b16 %v4840_v40, %v4839_v60 }
0x11e5   : > { %v6356_v42 = vpop.eup %6355  ;;  %v4709_v1 = vadd.f32 1e-06, %v4708_v29 }
0x11e6   : > { %v4801_v30 = vmul.f32 %v6356_v42, %v4639_v17  ;;  %5872 = vmatmul.msk.bf16.gmra.mxu2 %vm227_vm1, %v8659_v54 }
0x11e7   : > { %6359 = vrcp.f32 %v4709_v1  ;;  %v4645_v1 = vmul.f32 %v8620_v20, %v8376_v41  ;;  %v4642_v41 = vmul.f32 %v8626_v47, %v8380_v21 }
0x11e8   : > { %5547 = vst.msk [vmem:[%s8637_s30 + $0x20] sm:$0xff] %vm227_vm1, %v4801_v30  ;;  %v4817_v36 = vpack.c.bf16 %v4801_v30, %v4801_v30 }
0x11e9   : > { %v4763_v14 = vpop.f32.mrf.mxu3 }
0x11ea   : > { %v6358_v0 = vpop.eup %6357  ;;  %v4764_v19 = vadd.f32 1e-06, %v4763_v14  ;;  %v4841_v37 = vunpack.c.l.b16 %v4817_v36 }
0x11eb   : > { %v4805_v50 = vmul.f32 %v6358_v0, %v4643_v12 }
0x11ec   : > { %6361 = vrcp.f32 %v4764_v19  ;;  %v4711_v33 = vpop.f32.mrf.mxu1  ;;  %v4646_v19 = vmul.f32 %v8624_v31, %v8384_v59 }
0x11ed   : > { %5551 = vst.msk [vmem:[%s8637_s30 + $0x40] sm:$0xff] %vm227_vm1, %v4805_v50  ;;  %v6360_v5 = vpop.eup %6359  ;;  %v4712_v57 = vadd.f32 1e-06, %v4711_v33  ;;  %v4821_v3 = vpack.c.bf16 %v4805_v50, %v4805_v50 }
0x11ee   : > { %v4802_v4 = vmul.f32 %v6360_v5, %v4640_v46 }
0x11ef   : > { %6363 = vrcp.f32 %v4712_v57  ;;  %v4898_v26 = vunpack.c.l.b16 %v4821_v3 }
0x11f0   : > { %5548 = vst.msk [vmem:[%s8637_s30 + $0x28] sm:$0xff] %vm227_vm1, %v4802_v4  ;;  %v4818_v55 = vpack.c.bf16 %v4802_v4, %v4802_v4 }
0x11f1   : > { %v4766_v45 = vpop.f32.mrf.mxu3 }
0x11f2   : > { %v6362_v15 = vpop.eup %6361  ;;  %v4767_v2 = vadd.f32 1e-06, %v4766_v45  ;;  %v4842_v63 = vunpack.c.l.b16 %v4818_v55 }
0x11f3   : > { %v4806_v10 = vmul.f32 %v6362_v15, %v4644_v23 }
0x11f4   : > { %6365 = vrcp.f32 %v4767_v2  ;;  %v4713_v40 = vpop.f32.mrf.mxu1  ;;  %v8679_v17 = vpack.c.b16 %v4842_v63, %v4841_v37  ;;  %v4647_v2 = vmul.f32 %v8628_v34, %v8404_v6  ;;  %v4648_v6 = vmul.f32 %v8631_v22, %v8410_v51 }
0x11f5   : > { %v4822_v7 = vpack.c.bf16 %v4806_v10, %v4806_v10  ;;  %5552 = vst.msk [vmem:[%s8637_s30 + $0x48] sm:$0xff] %vm227_vm1, %v4806_v10  ;;  %v6364_v29 = vpop.eup %6363  ;;  %v4714_v42 = vadd.f32 1e-06, %v4713_v40  ;;  %v4853_v51 = vsel %vm227_vm1, %v8659_v54, 0 }
0x11f6   : > { %v4803_v30 = vmul.f32 %v6364_v29, %v4641_v25  ;;  %5873 = vmatmul.msk.bf16.gmra.mxu2 %vm227_vm1, %v8679_v17  ;;  %v4856_v34 = vsel %vm227_vm1, %v8679_v17, 0 }
0x11f7   : > { %v4899_v60 = vunpack.c.l.b16 %v4822_v7  ;;  %6367 = vrcp.f32 %v4714_v42 }
0x11f8   : > { %5549 = vst.msk [vmem:[%s8637_s30 + $0x30] sm:$0xff] %vm227_vm1, %v4803_v30  ;;  %v4819_v33 = vpack.c.bf16 %v4803_v30, %v4803_v30 }
0x11f9   : > { %v8683_v12 = vpack.c.b16 %v4899_v60, %v4898_v26  ;;  %v4768_v14 = vpop.f32.mrf.mxu3 }
0x11fa   : > { %v6366_v0 = vpop.eup %6365  ;;  %v4769_v49 = vadd.f32 1e-06, %v4768_v14  ;;  %v4843_v36 = vunpack.c.l.b16 %v4819_v33  ;;  %v4649_v14 = vmul.f32 %v8642_v38, %v8421_v13  ;;  %v4650_v13 = vmul.f32 %v8649_v61, %v8427_v48 }
0x11fb   : > { %v4807_v8 = vmul.f32 %v6366_v0, %v4645_v1  ;;  %5875 = vmatmul.msk.bf16.vlgmr.msra.gmra.mxu0 %vm227_vm1, %v8683_v12  ;;  %v4850_v38 = vsel %vm227_vm1, %v8647_v16, 0 }
0x11fc   : > { %6369 = vrcp.f32 %v4769_v49  ;;  %5953 = vxpose.binary.xlu0.c.b16.start [1/8] (short) (narrow) %v8647_v16, %v8683_v12, 16 }
0x11fd   : > { %5553 = vst.msk [vmem:[%s8637_s30 + $0x50] sm:$0xff] %vm227_vm1, %v4807_v8  ;;  %v6368_v20 = vpop.eup %6367  ;;  %v4823_v45 = vpack.c.bf16 %v4807_v8, %v4807_v8 }
0x11fe   : > { %v4804_v50 = vmul.f32 %v6368_v20, %v4642_v41 }
0x11ff   : > { %v4900_v59 = vunpack.c.l.b16 %v4823_v45 }
0x1200   : > { %5550 = vst.msk [vmem:[%s8637_s30 + $0x38] sm:$0xff] %vm227_vm1, %v4804_v50  ;;  %v4820_v4 = vpack.c.bf16 %v4804_v50, %v4804_v50 }
0x1201   : > { %v4771_v46 = vpop.f32.mrf.mxu3 }
0x1202   : > { %v6370_v5 = vpop.eup %6369  ;;  %v4772_v57 = vadd.f32 1e-06, %v4771_v46  ;;  %v4844_v15 = vunpack.c.l.b16 %v4820_v4 }
0x1203   : > { %v4808_v23 = vmul.f32 %v6370_v5, %v4646_v19 }
0x1204   : > { %6371 = vrcp.f32 %v4772_v57  ;;  %v8703_v47 = vpack.c.b16 %v4844_v15, %v4843_v36 }
0x1205   : > { %5554 = vst.msk [vmem:[%s8637_s30 + $0x58] sm:$0xff] %vm227_vm1, %v4808_v23  ;;  %v4824_v21 = vpack.c.bf16 %v4808_v23, %v4808_v23 }
0x1206   : > { %5874 = vmatmul.msk.bf16.gmra.mxu2 %vm227_vm1, %v8703_v47  ;;  %v4859_v3 = vsel %vm227_vm1, %v8703_v47, 0 }
0x1207   : > { %v4901_v31 = vunpack.c.l.b16 %v4824_v21  ;;  %4955 = vmatpush.bf16.xpose.msrb.mxu1 %v4859_v3 }
0x1209   : > { %v4773_v10 = vpop.f32.mrf.mxu3  ;;  %v4907_v55 = vpack.c.b16 %v4901_v31, %v4900_v59 }
0x120a   : > { %v6372_v7 = vpop.eup %6371  ;;  %v4774_v37 = vadd.f32 1e-06, %v4773_v10 }
0x120b   : > { %v4809_v63 = vmul.f32 %v6372_v7, %v4647_v2  ;;  %5876 = vmatmul.msk.bf16.gmra.mxu0 %vm227_vm1, %v4907_v55  ;;  %v4914_v23 = vsel %vm227_vm1, %v4907_v55, 0 }
0x120c   : > { %6373 = vrcp.f32 %v4774_v37  ;;  %5954 = vxpose.binary.xlu0.c.b16.cont [2/8] (short) (narrow) %v8659_v54, %v4907_v55, 16 }
0x120d   : > { %5555 = vst.msk [vmem:[%s8637_s30 + $0x60] sm:$0xff] %vm227_vm1, %v4809_v63  ;;  %v4825_v29 = vpack.c.bf16 %v4809_v63, %v4809_v63 }
0x120f   : > { %4956 = vmatpush.bf16.xpose.msrb.mxu1 %v4856_v34  ;;  %v4902_v1 = vunpack.c.l.b16 %v4825_v29 }
0x1211   : > { %v4776_v25 = vpop.f32.mrf.mxu3 }
0x1212   : > { %v6374_v26 = vpop.eup %6373  ;;  %v4777_v60 = vadd.f32 1e-06, %v4776_v25 }
0x1213   : > { %v4810_v40 = vmul.f32 %v6374_v26, %v4648_v6 }
0x1214   : > { %6375 = vrcp.f32 %v4777_v60 }
0x1215   : > { %5556 = vst.msk [vmem:[%s8637_s30 + $0x68] sm:$0xff] %vm227_vm1, %v4810_v40  ;;  %v4826_v42 = vpack.c.bf16 %v4810_v40, %v4810_v40 }
0x1217   : > { %v4903_v30 = vunpack.c.l.b16 %v4826_v42  ;;  %4957 = vmatpush.bf16.xpose.msrb.mxu1 %v4853_v51 }
0x1219   : > { %v4778_v22 = vpop.f32.mrf.mxu3  ;;  %v4908_v0 = vpack.c.b16 %v4903_v30, %v4902_v1 }
0x121a   : > { %v6376_v49 = vpop.eup %6375  ;;  %v4779_v8 = vadd.f32 1e-06, %v4778_v22 }
0x121b   : > { %v4811_v41 = vmul.f32 %v6376_v49, %v4649_v14  ;;  %5877 = vmatmul.msk.bf16.gmra.mxu0 %vm227_vm1, %v4908_v0  ;;  %v4917_v61 = vsel %vm227_vm1, %v4908_v0, 0 }
0x121c   : > { %6377 = vrcp.f32 %v4779_v8  ;;  %5955 = vxpose.binary.xlu0.c.b16.cont [3/8] (short) (narrow) %v8679_v17, %v4908_v0, 16 }
0x121d   : > { %5557 = vst.msk [vmem:[%s8637_s30 + $0x70] sm:$0xff] %vm227_vm1, %v4811_v41  ;;  %v4827_v50 = vpack.c.bf16 %v4811_v41, %v4811_v41 }
0x121f   : > { %4958 = vmatpush.bf16.xpose.msrb.mxu1 %v4850_v38  ;;  %v4904_v33 = vunpack.c.l.b16 %v4827_v50 }
0x1222   : > { %v6378_v20 = vpop.eup %6377 }
0x1223   : > { %v4812_v19 = vmul.f32 %v6378_v20, %v4650_v13 }
0x1225   : > { %5558 = vst.msk [vmem:[%s8637_s30 + $0x78] sm:$0xff] %vm227_vm1, %v4812_v19  ;;  %v4828_v46 = vpack.c.bf16 %v4812_v19, %v4812_v19 }
0x1226   : > { %5879 = vmatmul.msk.bf16.vlgmr.msrb.gmra.mxu1 %vm227_vm1, %v8647_v16  ;;  %v4911_v16 = vsel %vm227_vm1, %v8683_v12, 0 }
0x1227   : > { %v4905_v5 = vunpack.c.l.b16 %v4828_v46 }
0x1229   : > { %v4909_v57 = vpack.c.b16 %v4905_v5, %v4904_v33 }
0x122b   : > { %5878 = vmatmul.msk.bf16.gmra.mxu0 %vm227_vm1, %v4909_v57  ;;  %v4920_v48 = vsel %vm227_vm1, %v4909_v57, 0 }
0x122c   : > { %5956 = vxpose.binary.xlu0.c.b16.end [4/8] (short) (narrow) %v8703_v47, %v4909_v57, 16 }
0x122d   : > { %4984 = vmatpush.bf16.xpose.msra.mxu3 %v4920_v48 }
0x1235   : > { %4985 = vmatpush.bf16.xpose.msra.mxu3 %v4917_v61 }
0x1236   : > { %5880 = vmatmul.msk.bf16.gmra.mxu1 %vm227_vm1, %v8659_v54 }
0x123d   : > { %4986 = vmatpush.bf16.xpose.msra.mxu3 %v4914_v23 }
0x1245   : > { %4987 = vmatpush.bf16.xpose.msra.mxu3 %v4911_v16 }
0x1246   : > { %5881 = vmatmul.msk.bf16.gmra.mxu1 %vm227_vm1, %v8679_v17 }
0x124c   : > { %5883 = vmatmul.msk.bf16.vlgmr.msra.gmra.mxu3 %vm227_vm1, %v8683_v12 }
0x1256   : > { %5882 = vmatmul.msk.bf16.gmra.mxu1 %vm227_vm1, %v8703_v47 }
0x1259   : > { %v4870_v50 = vpop.f32.mrf.mxu2 }
0x125c   : > { %5884 = vmatmul.msk.bf16.gmra.mxu3 %vm227_vm1, %v4907_v55 }
0x1261   : > { %v8761_v48 = vpop.f32.mrf.mxu2 }
0x126c   : > { %5885 = vmatmul.msk.bf16.gmra.mxu3 %vm227_vm1, %v4908_v0 }
0x127c   : > { %5886 = vmatmul.msk.bf16.gmra.mxu3 %vm227_vm1, %v4909_v57 }
0x12a3   : > { %v4960_v54 = vpop.f32.mrf.mxu1 }
0x12a4   : > { %v5009_v4 = vpack.c.bf16 %v4960_v54, %v4960_v54 }
0x12a6   : > { %v5049_v15 = vunpack.c.l.b16 %v5009_v4 }
0x12ab   : > { %v4962_v45 = vpop.f32.mrf.mxu1 }
0x12ac   : > { %v5010_v36 = vpack.c.bf16 %v4962_v45, %v4962_v45 }
0x12ae   : > { %v5050_v21 = vunpack.c.l.b16 %v5010_v36  ;;  %v8763_v36 = vpop.f32.mrf.mxu2 }
0x12b0   : > { %v5057_v59 = vpack.c.b16 %v5050_v21, %v5049_v15 }
0x12b2   : > { %5887 = vmatmul.msk.bf16.vlgmr.msrb.gmra.mxu2 %vm536_vm2, %v5057_v59 }
0x12b3   : > { %v4965_v17 = vpop.f32.mrf.mxu1 }
0x12b4   : > { %v5011_v12 = vpack.c.bf16 %v4965_v17, %v4965_v17 }
0x12b6   : > { %v5051_v47 = vunpack.c.l.b16 %v5011_v12  ;;  %v8766_v17 = vpop.f32.mrf.mxu2 }
0x12bb   : > { %v4967_v31 = vpop.f32.mrf.mxu1 }
0x12bc   : > { %v5012_v2 = vpack.c.bf16 %v4967_v31, %v4967_v31 }
0x12be   : > { %v5052_v3 = vunpack.c.l.b16 %v5012_v2 }
0x12c0   : > { %v5058_v10 = vpack.c.b16 %v5052_v3, %v5051_v47  ;;  %v8768_v3 = vpop.f32.mrf.mxu0 }
0x12c2   : > { %5888 = vmatmul.msk.bf16.gmra.mxu2 %vm536_vm2, %v5058_v10  ;;  %v8771_v10 = vpop.f32.mrf.mxu2 }
0x12c3   : > { %v4970_v55 = vpop.f32.mrf.mxu1 }
0x12c4   : > { %v5013_v7 = vpack.c.bf16 %v4970_v55, %v4970_v55 }
0x12c6   : > { %v5053_v34 = vunpack.c.l.b16 %v5013_v7 }
0x12c8   : > { %v8773_v55 = vpop.f32.mrf.mxu0 }
0x12ca   : > { %v8775_v7 = vpop.f32.mrf.mxu2 }
0x12cb   : > { %v4972_v37 = vpop.f32.mrf.mxu1 }
0x12cc   : > { %v5014_v63 = vpack.c.bf16 %v4972_v37, %v4972_v37 }
0x12ce   : > { %v5054_v25 = vunpack.c.l.b16 %v5014_v63 }
0x12cf   : > { %v4989_v6 = vpop.f32.mrf.mxu3 }
0x12d0   : > { %v5059_v26 = vpack.c.b16 %v5054_v25, %v5053_v34  ;;  %v5017_v60 = vpack.c.bf16 %v4989_v6, %v4989_v6  ;;  %v8777_v37 = vpop.f32.mrf.mxu0 }
0x12d2   : > { %5889 = vmatmul.msk.bf16.gmra.mxu2 %vm536_vm2, %v5059_v26  ;;  %v5110_v1 = vunpack.c.l.b16 %v5017_v60  ;;  %v8779_v63 = vpop.f32.mrf.mxu2 }
0x12d3   : > { %v4975_v40 = vpop.f32.mrf.mxu1 }
0x12d4   : > { %v5015_v51 = vpack.c.bf16 %v4975_v40, %v4975_v40 }
0x12d6   : > { %v5055_v8 = vunpack.c.l.b16 %v5015_v51 }
0x12d7   : > { %v4991_v29 = vpop.f32.mrf.mxu3 }
0x12d8   : > { %v5018_v42 = vpack.c.bf16 %v4991_v29, %v4991_v29  ;;  %v8781_v6 = vpop.f32.mrf.mxu0 }
0x12da   : > { %v5111_v30 = vunpack.c.l.b16 %v5018_v42  ;;  %v8783_v34 = vpop.f32.mrf.mxu2 }
0x12db   : > { %v4977_v22 = vpop.f32.mrf.mxu1 }
0x12dc   : > { %v5118_v14 = vpack.c.b16 %v5111_v30, %v5110_v1  ;;  %v5016_v0 = vpack.c.bf16 %v4977_v22, %v4977_v22 }
0x12de   : > { %5891 = vmatmul.msk.bf16.vlgmr.msrb.gmra.mxu0 %vm536_vm2, %v5118_v14  ;;  %v5056_v41 = vunpack.c.l.b16 %v5016_v0 }
0x12df   : > { %v4994_v49 = vpop.f32.mrf.mxu3 }
0x12e0   : > { %v5060_v13 = vpack.c.b16 %v5056_v41, %v5055_v8  ;;  %v5019_v38 = vpack.c.bf16 %v4994_v49, %v4994_v49  ;;  %v8785_v25 = vpop.f32.mrf.mxu0 }
0x12e2   : > { %5890 = vmatmul.msk.bf16.gmra.mxu2 %vm536_vm2, %v5060_v13  ;;  %v5112_v46 = vunpack.c.l.b16 %v5019_v38 }
0x12e7   : > { %v4996_v20 = vpop.f32.mrf.mxu3 }
0x12e8   : > { %v5020_v19 = vpack.c.bf16 %v4996_v20, %v4996_v20  ;;  %v8787_v40 = vpop.f32.mrf.mxu0 }
0x12ea   : > { %v5113_v33 = vunpack.c.l.b16 %v5020_v19 }
0x12ec   : > { %v5119_v5 = vpack.c.b16 %v5113_v33, %v5112_v46  ;;  %v5025_v33 = vmul.f32 %v4870_v50, %v8487_v18  ;;  %v5026_v18 = vmul.f32 %v8761_v48, %v8494_v32 }
0x12ee   : > { %5892 = vmatmul.msk.bf16.gmra.mxu0 %vm536_vm2, %v5119_v5 }
0x12ef   : > { %v4999_v57 = vpop.f32.mrf.mxu3 }
0x12f0   : > { %v5021_v61 = vpack.c.bf16 %v4999_v57, %v4999_v57  ;;  %v8789_v13 = vpop.f32.mrf.mxu0 }
0x12f2   : > { %v5114_v54 = vunpack.c.l.b16 %v5021_v61 }
0x12f7   : > { %v5001_v23 = vpop.f32.mrf.mxu3 }
0x12f8   : > { %v5022_v16 = vpack.c.bf16 %v5001_v23, %v5001_v23  ;;  %v8794_v50 = vpop.f32.mrf.mxu0 }
0x12fa   : > { %v5115_v4 = vunpack.c.l.b16 %v5022_v16 }
0x12fc   : > { %v5120_v45 = vpack.c.b16 %v5115_v4, %v5114_v54 }
0x12fe   : > { %5893 = vmatmul.msk.bf16.gmra.mxu0 %vm536_vm2, %v5120_v45 }
0x12ff   : > { %v5004_v15 = vpop.f32.mrf.mxu3 }
0x1300   : > { %v5023_v21 = vpack.c.bf16 %v5004_v15, %v5004_v15 }
0x1302   : > { %v5116_v31 = vunpack.c.l.b16 %v5023_v21 }
0x1307   : > { %v5006_v59 = vpop.f32.mrf.mxu3 }
0x1308   : > { %v5024_v12 = vpack.c.bf16 %v5006_v59, %v5006_v59 }
0x130a   : > { %v5117_v2 = vunpack.c.l.b16 %v5024_v12 }
0x130c   : > { %v5121_v47 = vpack.c.b16 %v5117_v2, %v5116_v31 }
0x130e   : > { %5894 = vmatmul.msk.bf16.gmra.mxu0 %vm536_vm2, %v5121_v47 }
0x1335   : > { %v5082_v26 = vpop.f32.mrf.mxu2 }
0x1336   : > { %v5083_v60 = vadd.f32 1e-06, %v5082_v26 }
0x1338   : > { %6379 = vrcp.f32 %v5083_v60  ;;  %v5174_v22 = vand.u32 2147483648, %v5083_v60  ;;  %v5172_v0 = vand.u32 2147483647, %v5083_v60  ;;  %vm5168_vm4 = vweird.f32 %v5083_v60 }
0x133a   : > { %v5175_v46 = vor.u32 1.1754944e-38, %v5174_v22  ;;  %vm5173_vm6 = vcmp.eq.f32.partialorder %v5172_v0, 8.507059e+37 }
0x133d   : > { %v5084_v29 = vpop.f32.mrf.mxu2 }
0x133e   : > { %v6380_v42 = vpop.eup %6379  ;;  %v5085_v1 = vadd.f32 1e-06, %v5084_v29 }
0x133f   : > { %v5164_v30 = vmul.f32 %v6380_v42, %v5083_v60  ;;  %vm5169_vm3 = vweird.f32 %v6380_v42 }
0x1340   : > { %6381 = vrcp.f32 %v5085_v1  ;;  %vm5170_vm5 = vmor %vm5168_vm4, %vm5169_vm3  ;;  %v5189_v16 = vand.u32 2147483648, %v5085_v1  ;;  %v5187_v54 = vand.u32 2147483647, %v5085_v1  ;;  %vm5183_vm8 = vweird.f32 %v5085_v1 }
0x1341   : > { %v5165_v14 = vsub.f32 1.0, %v5164_v30 }
0x1342   : > { %v5190_v31 = vor.u32 1.1754944e-38, %v5189_v16  ;;  %vm5188_vm10 = vcmp.eq.f32.partialorder %v5187_v54, 8.507059e+37 }
0x1343   : > { %v5166_v51 = vmul.f32 %v6380_v42, %v5165_v14 }
0x1345   : > { %v5087_v49 = vpop.f32.mrf.mxu2  ;;  %v5167_v8 = vadd.f32 %v6380_v42, %v5166_v51 }
0x1346   : > { %v6382_v41 = vpop.eup %6381  ;;  %v5088_v38 = vadd.f32 1e-06, %v5087_v49 }
0x1347   : > { %v5179_v20 = vmul.f32 %v6382_v41, %v5085_v1  ;;  %v5171_v19 = vsel %vm5170_vm5, %v6380_v42, %v5167_v8  ;;  %vm5184_vm7 = vweird.f32 %v6382_v41 }
0x1348   : > { %6383 = vrcp.f32 %v5088_v38  ;;  %v5176_v57 = vsel %vm5173_vm6, %v5175_v46, %v5171_v19  ;;  %vm5185_vm9 = vmor %vm5183_vm8, %vm5184_vm7  ;;  %v5202_v22 = vand.u32 2147483647, %v5088_v38  ;;  %v5204_v0 = vand.u32 2147483648, %v5088_v38 }
0x1349   : > { %v5180_v5 = vsub.f32 1.0, %v5179_v20  ;;  %v5177_v61 = vmul.f32 %v5176_v57, %v5025_v33  ;;  %vm5198_vm12 = vweird.f32 %v5088_v38 }
0x134a   : > { %vm5203_vm14 = vcmp.eq.f32.partialorder %v5202_v22, 8.507059e+37  ;;  %v5205_v33 = vor.u32 1.1754944e-38, %v5204_v0 }
0x134b   : > { %v5181_v23 = vmul.f32 %v6382_v41, %v5180_v5  ;;  %v5443_v29 = vpack.c.bf16 %v5177_v61, %v5177_v61 }
0x134d   : > { %v5089_v4 = vpop.f32.mrf.mxu2  ;;  %v5182_v45 = vadd.f32 %v6382_v41, %v5181_v23  ;;  %v8800_v48 = vunpack.c.l.b16 %v5443_v29  ;;  %v5027_v23 = vmul.f32 %v8763_v36, %v8504_v43  ;;  %v5029_v43 = vmul.f32 %v8771_v10, %v8519_v24 }
0x134e   : > { %v6384_v15 = vpop.eup %6383  ;;  %v5090_v21 = vadd.f32 1e-06, %v5089_v4 }
0x134f   : > { %v5194_v59 = vmul.f32 %v6384_v15, %v5088_v38  ;;  %v5186_v12 = vsel %vm5185_vm9, %v6382_v41, %v5182_v45  ;;  %vm5199_vm11 = vweird.f32 %v6384_v15  ;;  %v5028_v45 = vmul.f32 %v8766_v17, %v8507_v44 }
0x1350   : > { %6385 = vrcp.f32 %v5090_v21  ;;  %v5191_v47 = vsel %vm5188_vm10, %v5190_v31, %v5186_v12  ;;  %vm5200_vm13 = vmor %vm5198_vm12, %vm5199_vm11  ;;  %v5219_v38 = vand.u32 2147483648, %v5090_v21  ;;  %v5217_v61 = vand.u32 2147483647, %v5090_v21 }
0x1351   : > { %v5195_v2 = vsub.f32 1.0, %v5194_v59  ;;  %v5192_v26 = vmul.f32 %v5191_v47, %v5026_v18  ;;  %vm5213_vm0 = vweird.f32 %v5090_v21 }
0x1352   : > { %v5220_v18 = vor.u32 1.1754944e-38, %v5219_v38  ;;  %vm5218_vm3 = vcmp.eq.f32.partialorder %v5217_v61, 8.507059e+37 }
0x1353   : > { %v5196_v60 = vmul.f32 %v6384_v15, %v5195_v2  ;;  %v5444_v42 = vpack.c.bf16 %v5192_v26, %v5192_v26  ;;  %v8817_v2 = vmul.f32 %v8768_v3, %v8522_v53 }
0x1355   : > { %v5092_v1 = vpop.f32.mrf.mxu2  ;;  %v5197_v30 = vadd.f32 %v6384_v15, %v5196_v60  ;;  %v8798_v49 = vunpack.c.l.b16 %v5444_v42  ;;  %v8829_v60 = vmul.f32 %v8773_v55, %v8532_v62  ;;  %v8837_v42 = vmul.f32 %v8775_v7, %v8526_v39 }
0x1356   : > { %v6386_v14 = vpop.eup %6385  ;;  %v8796_v51 = vadd.f32 1e-06, %v5092_v1  ;;  %v8841_v1 = vmul.f32 %v8779_v63, %v8548_v35 }
0x1357   : > { %v5209_v32 = vmul.f32 %v6386_v14, %v5090_v21  ;;  %v5201_v19 = vsel %vm5200_vm13, %v6384_v15, %v5197_v30  ;;  %v5475_v46 = vpack.c.b16 %v8798_v49, %v8800_v48  ;;  %vm5214_vm15 = vweird.f32 %v6386_v14 }
0x1358   : > { %6387 = vrcp.f32 %v8796_v51  ;;  %v5206_v57 = vsel %vm5203_vm14, %v5205_v33, %v5201_v19  ;;  %vm5215_vm1 = vmor %vm5213_vm0, %vm5214_vm15  ;;  %v5232_v47 = vand.u32 2147483647, %v8796_v51  ;;  %v5234_v24 = vand.u32 2147483648, %v8796_v51 }
0x1359   : > { %v5210_v41 = vsub.f32 1.0, %v5209_v32  ;;  %v5207_v12 = vmul.f32 %v5206_v57, %v5027_v23  ;;  %v8845_v30 = vmul.f32 %v8783_v34, %v8556_v27  ;;  %vm5228_vm5 = vweird.f32 %v8796_v51 }
0x135a   : > { %vm8848_vm6 = vcmp.eq.f32.partialorder %v5232_v47, 8.507059e+37  ;;  %v5235_v63 = vor.u32 1.1754944e-38, %v5234_v24 }
0x135b   : > { %v5143_v8 = vpop.f32.mrf.mxu0  ;;  %v5211_v5 = vmul.f32 %v6386_v14, %v5210_v41  ;;  %v5445_v29 = vpack.c.bf16 %v5207_v12, %v5207_v12 }
0x135c   : > { %v8803_v20 = vadd.f32 1e-06, %v5143_v8 }
0x135d   : > { %v5094_v16 = vpop.f32.mrf.mxu2  ;;  %v5212_v54 = vadd.f32 %v6386_v14, %v5211_v5  ;;  %v8864_v32 = vunpack.c.l.b16 %v5445_v29 }
0x135e   : > { %6389 = vrcp.f32 %v8803_v20  ;;  %v6388_v4 = vpop.eup %6387  ;;  %v8812_v15 = vadd.f32 1e-06, %v5094_v16  ;;  %vm5288_vm7 = vweird.f32 %v8803_v20  ;;  %v5292_v8 = vand.u32 2147483647, %v8803_v20 }
0x135f   : > { %v5224_v59 = vmul.f32 %v6388_v4, %v8796_v51  ;;  %v5216_v31 = vsel %vm5215_vm1, %v6386_v14, %v5212_v54  ;;  %vm5229_vm4 = vweird.f32 %v6388_v4  ;;  %v5294_v5 = vand.u32 2147483648, %v8803_v20 }
0x1360   : > { %6391 = vrcp.f32 %v8812_v15  ;;  %v5221_v26 = vsel %vm5218_vm3, %v5220_v18, %v5216_v31  ;;  %vm8855_vm8 = vmor %vm5228_vm5, %vm5229_vm4  ;;  %v5247_v33 = vand.u32 2147483647, %v8812_v15  ;;  %vm8887_vm11 = vcmp.eq.f32.partialorder %v5292_v8, 8.507059e+37 }
0x1361   : > { %v5225_v17 = vsub.f32 1.0, %v5224_v59  ;;  %v5222_v3 = vmul.f32 %v5221_v26, %v5028_v45  ;;  %vm5243_vm12 = vweird.f32 %v8812_v15 }
0x1362   : > { %vm8892_vm13 = vcmp.eq.f32.partialorder %v5247_v33, 8.507059e+37 }
0x1363   : > { %v5145_v36 = vpop.f32.mrf.mxu0  ;;  %v5226_v10 = vmul.f32 %v6388_v4, %v5225_v17  ;;  %v5446_v55 = vpack.c.bf16 %v5222_v3, %v5222_v3  ;;  %v5295_v17 = vor.u32 1.1754944e-38, %v5294_v5 }
0x1364   : > { %v8822_v44 = vpop.eup %6389  ;;  %v8824_v21 = vadd.f32 1e-06, %v5145_v36 }
0x1365   : > { %v5284_v53 = vmul.f32 %v8822_v44, %v8803_v20  ;;  %v5097_v14 = vpop.f32.mrf.mxu2  ;;  %v5227_v22 = vadd.f32 %v6388_v4, %v5226_v10  ;;  %v8859_v27 = vunpack.c.l.b16 %v5446_v55  ;;  %vm5289_vm9 = vweird.f32 %v8822_v44 }
0x1366   : > { %6393 = vrcp.f32 %v8824_v21  ;;  %v6392_v39 = vpop.eup %6391  ;;  %v8853_v7 = vadd.f32 1e-06, %v5097_v14  ;;  %v5309_v45 = vand.u32 2147483648, %v8824_v21  ;;  %v5307_v12 = vand.u32 2147483647, %v8824_v21  ;;  %vm8900_vm14 = vmor %vm5288_vm7, %vm5289_vm9 }
0x1367   : > { %v5285_v62 = vsub.f32 1.0, %v5284_v53  ;;  %v5239_v34 = vmul.f32 %v6392_v39, %v8812_v15  ;;  %v5231_v51 = vsel %vm8855_vm8, %v6388_v4, %v5227_v22  ;;  %v5476_v16 = vpack.c.b16 %v8859_v27, %v8864_v32 }
0x1368   : > { %6395 = vrcp.f32 %v8853_v7  ;;  %v5236_v23 = vsel %vm8848_vm6, %v5235_v63, %v5231_v51  ;;  %v5249_v4 = vand.u32 2147483648, %v8812_v15  ;;  %vm5244_vm10 = vweird.f32 %v6392_v39 }
0x1369   : > { %v5286_v41 = vmul.f32 %v8822_v44, %v5285_v62  ;;  %v5240_v57 = vsub.f32 1.0, %v5239_v34  ;;  %v5237_v31 = vmul.f32 %v5236_v23, %v5029_v43  ;;  %vm5303_vm15 = vweird.f32 %v8824_v21  ;;  %vm8908_vm0 = vmor %vm5243_vm12, %vm5244_vm10 }
0x136a   : > { %v5250_v29 = vor.u32 1.1754944e-38, %v5249_v4  ;;  %v5310_v62 = vor.u32 1.1754944e-38, %v5309_v45  ;;  %v5262_v20 = vand.u32 2147483647, %v8853_v7  ;;  %vm8919_vm1 = vcmp.eq.f32.partialorder %v5307_v12, 8.507059e+37 }
0x136b   : > { %v5148_v19 = vpop.f32.mrf.mxu0  ;;  %v5241_v59 = vmul.f32 %v6392_v39, %v5240_v57  ;;  %v5287_v18 = vadd.f32 %v8822_v44, %v5286_v41  ;;  %vm5258_vm3 = vweird.f32 %v8853_v7  ;;  %v5264_v35 = vand.u32 2147483648, %v8853_v7 }
0x136c   : > { %v8871_v38 = vpop.eup %6393  ;;  %v8873_v61 = vadd.f32 1e-06, %v5148_v19  ;;  %v5447_v34 = vpack.c.bf16 %v5237_v31, %v5237_v31  ;;  %vm8939_vm6 = vcmp.eq.f32.partialorder %v5262_v20, 8.507059e+37 }
0x136d   : > { %v5299_v54 = vmul.f32 %v8871_v38, %v8824_v21  ;;  %v5099_v26 = vpop.f32.mrf.mxu2  ;;  %v5242_v53 = vadd.f32 %v6392_v39, %v5241_v59  ;;  %v5291_v22 = vsel %vm8900_vm14, %v8822_v44, %v5287_v18  ;;  %vm5304_vm4 = vweird.f32 %v8871_v38 }
0x136e   : > { %6397 = vrcp.f32 %v8873_v61  ;;  %v6396_v3 = vpop.eup %6395  ;;  %v8905_v10 = vadd.f32 1e-06, %v5099_v26  ;;  %v5296_v5 = vsel %vm8887_vm11, %v5295_v17, %v5291_v22  ;;  %vm5318_vm7 = vweird.f32 %v8873_v61  ;;  %vm8950_vm8 = vmor %vm5303_vm15, %vm5304_vm4 }
0x136f   : > { %v5300_v47 = vsub.f32 1.0, %v5299_v54  ;;  %v5254_v55 = vmul.f32 %v6396_v3, %v8853_v7  ;;  %v5246_v14 = vsel %vm8908_vm0, %v6392_v39, %v5242_v53  ;;  %vm5259_vm5 = vweird.f32 %v6396_v3 }
0x1370   : > { %6399 = vrcp.f32 %v8905_v10  ;;  %v5251_v44 = vsel %vm8892_vm13, %v5250_v29, %v5246_v14  ;;  %v5265_v54 = vor.u32 1.1754944e-38, %v5264_v35  ;;  %v5297_v12 = vmul.f32 %v5296_v5, %v8817_v2  ;;  %vm8956_vm9 = vmor %vm5258_vm3, %vm5259_vm5 }
0x1371   : > { %v5301_v39 = vmul.f32 %v8871_v38, %v5300_v47  ;;  %v5255_v8 = vsub.f32 1.0, %v5254_v55  ;;  %v5252_v33 = vmul.f32 %v5251_v44, %v8837_v42  ;;  %v5322_v42 = vand.u32 2147483647, %v8873_v61 }
0x1372   : > { %v8961_v26 = vunpack.c.l.b16 %v5447_v34  ;;  %v5324_v53 = vand.u32 2147483648, %v8873_v61  ;;  %v5277_v24 = vand.u32 2147483647, %v8905_v10  ;;  %v5279_v35 = vand.u32 2147483648, %v8905_v10 }
0x1373   : > { %v5150_v63 = vpop.f32.mrf.mxu0  ;;  %v5256_v57 = vmul.f32 %v6396_v3, %v5255_v8  ;;  %v5448_v45 = vpack.c.bf16 %v5252_v33, %v5252_v33  ;;  %v5302_v31 = vadd.f32 %v8871_v38, %v5301_v39  ;;  %vm8986_vm11 = vcmp.eq.f32.partialorder %v5322_v42, 8.507059e+37 }
0x1374   : > { %v8926_v51 = vpop.eup %6397  ;;  %v8929_v41 = vadd.f32 1e-06, %v5150_v63  ;;  %v5325_v8 = vor.u32 1.1754944e-38, %v5324_v53  ;;  %vm5273_vm14 = vweird.f32 %v8905_v10  ;;  %vm8998_vm15 = vcmp.eq.f32.partialorder %v5277_v24, 8.507059e+37 }
0x1375   : > { %v5314_v19 = vmul.f32 %v8926_v51, %v8873_v61  ;;  %v5257_v59 = vadd.f32 %v6396_v3, %v5256_v57  ;;  %v8963_v2 = vunpack.c.l.b16 %v5448_v45  ;;  %v5306_v7 = vsel %vm8950_vm8, %v8871_v38, %v5302_v31 }
0x1376   : > { %6401 = vrcp.f32 %v8929_v41  ;;  %v6400_v36 = vpop.eup %6399  ;;  %vm5319_vm10 = vweird.f32 %v8926_v51  ;;  %v5311_v20 = vsel %vm8919_vm1, %v5310_v62, %v5306_v7  ;;  %v5280_v57 = vor.u32 1.1754944e-38, %v5279_v35 }
0x1377   : > { %v5315_v4 = vsub.f32 1.0, %v5314_v19  ;;  %v5269_v21 = vmul.f32 %v6400_v36, %v8905_v10  ;;  %v5261_v43 = vsel %vm8956_vm9, %v6396_v3, %v5257_v59  ;;  %v5477_v29 = vpack.c.b16 %v8963_v2, %v8961_v26  ;;  %vm8993_vm13 = vmor %vm5318_vm7, %vm5319_vm10 }
0x1378   : > { %v5312_v63 = vmul.f32 %v5311_v20, %v8829_v60  ;;  %v5266_v34 = vsel %vm8939_vm6, %v5265_v54, %v5261_v43  ;;  %vm5274_vm12 = vweird.f32 %v6400_v36  ;;  %v5451_v60 = vpack.c.bf16 %v5297_v12, %v5297_v12 }
0x1379   : > { %v5316_v47 = vmul.f32 %v8926_v51, %v5315_v4  ;;  %v5270_v22 = vsub.f32 1.0, %v5269_v21  ;;  %v5267_v61 = vmul.f32 %v5266_v34, %v8841_v1  ;;  %vm5275_vm0 = vmor %vm5273_vm14, %vm5274_vm12  ;;  %v5337_v4 = vand.u32 2147483647, %v8929_v41 }
0x137a   : > { %v5452_v23 = vpack.c.bf16 %v5312_v63, %v5312_v63  ;;  %v5339_v10 = vand.u32 2147483648, %v8929_v41  ;;  %v9010_v42 = vunpack.c.l.b16 %v5451_v60  ;;  %vm5333_vm3 = vweird.f32 %v8929_v41 }
0x137b   : > { %v5153_v15 = vpop.f32.mrf.mxu0  ;;  %v5317_v55 = vadd.f32 %v8926_v51, %v5316_v47  ;;  %v5271_v0 = vmul.f32 %v6400_v36, %v5270_v22  ;;  %v5449_v53 = vpack.c.bf16 %v5267_v61, %v5267_v61  ;;  %v5036_v43 = vmul.f32 %v8781_v6, %v8560_v58 }
0x137c   : > { %v6402_v14 = vpop.eup %6401  ;;  %v8980_v3 = vadd.f32 1e-06, %v5153_v15  ;;  %v9012_v12 = vunpack.c.l.b16 %v5452_v23  ;;  %vm5338_vm5 = vcmp.eq.f32.partialorder %v5337_v4, 8.507059e+37 }
0x137d   : > { %v5329_v38 = vmul.f32 %v6402_v14, %v8929_v41  ;;  %v5321_v33 = vsel %vm8993_vm13, %v8926_v51, %v5317_v55  ;;  %v5272_v5 = vadd.f32 %v6400_v36, %v5271_v0  ;;  %vm5334_vm1 = vweird.f32 %v6402_v14 }
0x137e   : > { %6403 = vrcp.f32 %v8980_v3  ;;  %v5326_v59 = vsel %vm8986_vm11, %v5325_v8, %v5321_v33  ;;  %v5035_v51 = vmul.f32 %v8777_v37, %v8552_v11  ;;  %vm5335_vm4 = vmor %vm5333_vm3, %vm5334_vm1  ;;  %v5515_v21 = vpack.c.b16 %v9012_v12, %v9010_v42 }
0x137f   : > { %v5330_v19 = vsub.f32 1.0, %v5329_v38  ;;  %v5276_v45 = vsel %vm5275_vm0, %v6400_v36, %v5272_v5  ;;  %v5340_v41 = vor.u32 1.1754944e-38, %v5339_v10  ;;  %vm5348_vm7 = vweird.f32 %v8980_v3 }
0x1380   : > { %v5281_v31 = vsel %vm8998_vm15, %v5280_v57, %v5276_v45  ;;  %v5327_v11 = vmul.f32 %v5326_v59, %v5035_v51  ;;  %v5352_v6 = vand.u32 2147483647, %v8980_v3 }
0x1381   : > { %v5331_v54 = vmul.f32 %v6402_v14, %v5330_v19  ;;  %v5282_v36 = vmul.f32 %v5281_v31, %v8845_v30  ;;  %v5473_v30 = vunpack.c.l.b16 %v5449_v53  ;;  %v5038_v31 = vmul.f32 %v8787_v40, %v8575_v56  ;;  %v5957_v53 = vpop.trf.xlu0 }
0x1382   : > { %v5453_v63 = vpack.c.bf16 %v5327_v11, %v5327_v11  ;;  %vm5353_vm9 = vcmp.eq.f32.partialorder %v5352_v6, 8.507059e+37 }
0x1383   : > { %v5155_v1 = vpop.f32.mrf.mxu0  ;;  %v5332_v18 = vadd.f32 %v6402_v14, %v5331_v54  ;;  %v5450_v7 = vpack.c.bf16 %v5282_v36, %v5282_v36  ;;  %v5037_v54 = vmul.f32 %v8785_v25, %v8570_v28 }
0x1384   : > { %v6404_v17 = vpop.eup %6403  ;;  %v5156_v47 = vadd.f32 1e-06, %v5155_v1  ;;  %v9031_v44 = vunpack.c.l.b16 %v5453_v63  ;;  %v5040_v63 = vmul.f32 %v8794_v50, %v8590_v52 }
0x1385   : > { %v5344_v24 = vmul.f32 %v6404_v17, %v8980_v3  ;;  %v5336_v37 = vsel %vm5335_vm4, %v6402_v14, %v5332_v18  ;;  %v5474_v20 = vunpack.c.l.b16 %v5450_v7  ;;  %vm5349_vm6 = vweird.f32 %v6404_v17 }
0x1386   : > { %6405 = vrcp.f32 %v5156_v47  ;;  %v5341_v55 = vsel %vm5338_vm5, %v5340_v41, %v5336_v37  ;;  %v5354_v14 = vand.u32 2147483648, %v8980_v3  ;;  %vm5350_vm8 = vmor %vm5348_vm7, %vm5349_vm6  ;;  %v5369_v23 = vand.u32 2147483648, %v5156_v47 }
0x1387   : > { %v5345_v15 = vsub.f32 1.0, %v5344_v24  ;;  %v5342_v22 = vmul.f32 %v5341_v55, %v5036_v43  ;;  %v5478_v38 = vpack.c.b16 %v5474_v20, %v5473_v30  ;;  %v5367_v4 = vand.u32 2147483647, %v5156_v47 }
0x1388   : > { %v5355_v5 = vor.u32 1.1754944e-38, %v5354_v14  ;;  %vm5363_vm11 = vweird.f32 %v5156_v47  ;;  %v5370_v1 = vor.u32 1.1754944e-38, %v5369_v23  ;;  %v5039_v7 = vmul.f32 %v8789_v13, %v8584_v9 }
0x1389   : > { %v5346_v35 = vmul.f32 %v6404_v17, %v5345_v15  ;;  %v5454_v34 = vpack.c.bf16 %v5342_v22, %v5342_v22  ;;  %5490 = vmatpush.bf16.msra.mxu1 %v5478_v38  ;;  %vm5368_vm13 = vcmp.eq.f32.partialorder %v5367_v4, 8.507059e+37  ;;  %v5958_v22 = vpop.trf.xlu0 }
0x138b   : > { %v5158_v39 = vpop.f32.mrf.mxu0  ;;  %v5347_v8 = vadd.f32 %v6404_v17, %v5346_v35  ;;  %v9029_v62 = vunpack.c.l.b16 %v5454_v34 }
0x138c   : > { %v6406_v0 = vpop.eup %6405  ;;  %v5159_v58 = vadd.f32 1e-06, %v5158_v39 }
0x138d   : > { %v5359_v60 = vmul.f32 %v6406_v0, %v5156_v47  ;;  %v5351_v19 = vsel %vm5350_vm8, %v6404_v17, %v5347_v8  ;;  %v5516_v57 = vpack.c.b16 %v9029_v62, %v9031_v44  ;;  %5491 = vmatpush.bf16.msra.mxu1 %v5477_v29  ;;  %vm5364_vm10 = vweird.f32 %v6406_v0 }
0x138e   : > { %6407 = vrcp.f32 %v5159_v58  ;;  %v5356_v3 = vsel %vm5353_vm9, %v5355_v5, %v5351_v19  ;;  %vm5365_vm12 = vmor %vm5363_vm11, %vm5364_vm10  ;;  %v5384_v32 = vand.u32 2147483648, %v5159_v58  ;;  %vm5378_vm15 = vweird.f32 %v5159_v58 }
0x138f   : > { %v5360_v33 = vsub.f32 1.0, %v5359_v60  ;;  %v5357_v26 = vmul.f32 %v5356_v3, %v5037_v54  ;;  %v5382_v36 = vand.u32 2147483647, %v5159_v58 }
0x1390   : > { %v5385_v41 = vor.u32 1.1754944e-38, %v5384_v32 }
0x1391   : > { %v5361_v61 = vmul.f32 %v6406_v0, %v5360_v33  ;;  %5492 = vmatpush.bf16.msra.mxu1 %v5476_v16  ;;  %v5455_v17 = vpack.c.bf16 %v5357_v26, %v5357_v26  ;;  %vm5383_vm1 = vcmp.eq.f32.partialorder %v5382_v36, 8.507059e+37 }
0x1393   : > { %v5160_v10 = vpop.f32.mrf.mxu0  ;;  %v5362_v45 = vadd.f32 %v6406_v0, %v5361_v61  ;;  %v5511_v56 = vunpack.c.l.b16 %v5455_v17 }
0x1394   : > { %v6408_v59 = vpop.eup %6407  ;;  %v5161_v51 = vadd.f32 1e-06, %v5160_v10 }
0x1395   : > { %v5374_v2 = vmul.f32 %v6408_v59, %v5159_v58  ;;  %v5366_v29 = vsel %vm5365_vm12, %v6406_v0, %v5362_v45  ;;  %5493 = vmatpush.bf16.msra.mxu1 %v5475_v46  ;;  %vm5379_vm14 = vweird.f32 %v6408_v59 }
0x1396   : > { %6409 = vrcp.f32 %v5161_v51  ;;  %v5371_v25 = vsel %vm5368_vm13, %v5370_v1, %v5366_v29  ;;  %vm5380_vm0 = vmor %vm5378_vm15, %vm5379_vm14  ;;  %v5399_v48 = vand.u32 2147483648, %v5161_v51  ;;  %v5397_v55 = vand.u32 2147483647, %v5161_v51 }
0x1397   : > { %v5375_v28 = vsub.f32 1.0, %v5374_v2  ;;  %v5372_v18 = vmul.f32 %v5371_v25, %v5038_v31  ;;  %vm5393_vm4 = vweird.f32 %v5161_v51 }
0x1398   : > { %v5400_v35 = vor.u32 1.1754944e-38, %v5399_v48  ;;  %5895 = vmatmul.msk.bf16.vlgmr.msra.gmra.mxu1 %vm536_vm2, %v5958_v22  ;;  %vm5398_vm6 = vcmp.eq.f32.partialorder %v5397_v55, 8.507059e+37 }
0x1399   : > { %v5376_v27 = vmul.f32 %v6408_v59, %v5375_v28  ;;  %v5456_v16 = vpack.c.bf16 %v5372_v18, %v5372_v18 }
0x139b   : > { %v5377_v47 = vadd.f32 %v6408_v59, %v5376_v27  ;;  %v5512_v40 = vunpack.c.l.b16 %v5456_v16 }
0x139c   : > { %v6410_v24 = vpop.eup %6409 }
0x139d   : > { %v5389_v11 = vmul.f32 %v6410_v24, %v5161_v51  ;;  %v5381_v37 = vsel %vm5380_vm0, %v6408_v59, %v5377_v47  ;;  %v5517_v43 = vpack.c.b16 %v5512_v40, %v5511_v56  ;;  %vm5394_vm3 = vweird.f32 %v6410_v24 }
0x139e   : > { %v5386_v46 = vsel %vm5383_vm1, %v5385_v41, %v5381_v37  ;;  %vm5395_vm5 = vmor %vm5393_vm4, %vm5394_vm3 }
0x139f   : > { %v5390_v49 = vsub.f32 1.0, %v5389_v11  ;;  %v5387_v20 = vmul.f32 %v5386_v46, %v5039_v7 }
0x13a1   : > { %v5391_v15 = vmul.f32 %v6410_v24, %v5390_v49  ;;  %v5457_v13 = vpack.c.bf16 %v5387_v20, %v5387_v20 }
0x13a3   : > { %v5392_v30 = vadd.f32 %v6410_v24, %v5391_v15  ;;  %v5513_v8 = vunpack.c.l.b16 %v5457_v13 }
0x13a5   : > { %v5396_v38 = vsel %vm5395_vm5, %v6410_v24, %v5392_v30 }
0x13a6   : > { %v5401_v34 = vsel %vm5398_vm6, %v5400_v35, %v5396_v38 }
0x13a7   : > { %v5402_v9 = vmul.f32 %v5401_v34, %v5040_v63 }
0x13a9   : > { %v5458_v39 = vpack.c.bf16 %v5402_v9, %v5402_v9 }
0x13ab   : > { %v5514_v14 = vunpack.c.l.b16 %v5458_v39 }
0x13ad   : > { %v5518_v0 = vpack.c.b16 %v5514_v14, %v5513_v8 }
0x13af   : > { %5530 = vmatpush.bf16.msrb.mxu3 %v5518_v0 }
0x13b3   : > { %5531 = vmatpush.bf16.msrb.mxu3 %v5517_v43 }
0x13b7   : > { %5532 = vmatpush.bf16.msrb.mxu3 %v5516_v57 }
0x13bb   : > { %5533 = vmatpush.bf16.msrb.mxu3 %v5515_v21 }
0x13be   : > { %5896 = vmatmul.msk.bf16.vlgmr.msrb.gmra.mxu3 %vm536_vm2, %v5957_v53 }
0x1415   : > { %v5495_v52 = vpop.f32.mrf.mxu1 }
0x141d   : > { %v5497_v50 = vpop.f32.mrf.mxu1 }
0x1441   : > { %v5535_v58 = vpop.f32.mrf.mxu3 }
0x1442   : > { %v5907_v6 = vpack.c.bf16 %v5535_v58, %v5495_v52 }
0x1444   : > { %5908 = vst [vmem:[%s165_s9] sm:$0xff] %v5907_v6  }
0x1445   : > { %6452 = shalt.err (!%p6449_p3)
}
0x1446   : > { %s6489_s29 = smov 64   ;;  %s6490_s30 = smov 4  }
0x1447   : > { %5911 = dma.vmem_to_hbm [thread:$0]  (%p6549_p5), %s5579_s10, 128, %s5581_s11, %s5560_s17, %s6489_s29, %s6489_s29, %s6490_s30  }
0x1449   : > { %v5537_v42 = vpop.f32.mrf.mxu3 }
0x144a PF: > { %p5917_p4 = scmp.ge.s32.totalorder %s6487_s15, 2  ;;  %s5599_s24 = sand.u32 1, %s6475_s12  }
0x144b   : > { %s5600_s4 = scalar_lea.sflag [#allocation3], %s5599_s24 }
0x144c   : > { %p5914_p7 = pnand %p5917_p4, %p6553_p6 }
0x144e   : > { %p5915_p8 = pneg %p5914_p7 }
0x1450   : > { %6470 = dma.done.wait (%p5915_p8), %s5600_s4, 128  }
0x1451   : > { %6472 = vsyncadd (%p5915_p8), %s5600_s4, 4294967168  ;;  %p14_p9 = scmp.ge.s32.totalorder %s6536_s18, 4   ;;  %s9124_s12 = smov %s6479_s13 }
0x1452   : > { %s9125_s13 = smov %s6483_s14  ;;  %s9126_s14 = smov %s6547_s21 }
0x1453   : > { %s9127_s15 = smov %s6536_s18  ;;  %16 = sbr.rel (!%p14_p9) target bundleno = 3 (0x3), region = 75 }
0x1458   :  { %5615 = vsyncpa [#allocation3], 1 }
0x1459   :  { %5617 = vsyncpa [#allocation3 + $0x1], 1 }

</bundles_post_ra>
